<compile_context>
chip_gen: v7x
topology: tpu7x:2x2x1
jax: 0.10.0
libtpu: 0.0.40
codegen_flags: <defaults>
</compile_context>

<pallas_src>
import jax
import jax.numpy as jnp
import numpy as np
from jax.experimental import pallas as pl
from jax.experimental.pallas import tpu as pltpu


# ----------------------------------------------------------------------------
# Fused forward kernel (one batch block per grid step)
# ----------------------------------------------------------------------------
def _net_fused_kernel(xe_ref, xo_ref, wb1_ref, b1_ref, wb2_ref, b2_ref,
                      wf1_ref, bf1_ref, wf2_ref, bf2_ref, o_ref):
    tb = o_ref.shape[0]                       # images in this block (static)

    # ---- conv1 + bias + ReLU + fused 2x2 max-pool --------------------------
    # Matmul rows are (pooled_row, image) with image fastest; output lanes are
    # (col_parity, pooled_col, channel) so both pool reductions are trivial.
    xe = xe_ref[...].reshape(12 * tb, 140)          # even conv1 output rows
    xo = xo_ref[...].reshape(12 * tb, 140)          # odd  conv1 output rows
    wb1 = wb1_ref[...]
    acc_e = jnp.dot(xe, wb1, preferred_element_type=jnp.float32)
    acc_o = jnp.dot(xo, wb1, preferred_element_type=jnp.float32)
    acc = jnp.maximum(acc_e, acc_o)                  # pool over output rows
    acc = jnp.maximum(acc[:, :384], acc[:, 384:])    # pool over output cols
    p1 = jnp.maximum(acc + b1_ref[...], 0.0)         # (12*tb, 384) f32
    p1 = p1.astype(jnp.bfloat16)

    # ---- conv2 + bias + ReLU + fused 2x2 max-pool --------------------------
    # Height im2col: 5 contiguous, block-aligned row windows -> single matmul.
    im2 = jnp.concatenate(
        [p1[di * tb:(di + 8) * tb, :] for di in range(5)], axis=-1)  # (8*tb, 1920)
    acc2 = jnp.dot(im2, wb2_ref[...], preferred_element_type=jnp.float32)
    acc2 = jnp.maximum(acc2[:, :256], acc2[:, 256:])  # pool over output cols
    b2 = b2_ref[...]
    pooled = []
    for i2 in range(4):                               # pool over output rows
        lo = acc2[(2 * i2) * tb:(2 * i2 + 1) * tb, :]
        hi = acc2[(2 * i2 + 1) * tb:(2 * i2 + 2) * tb, :]
        pooled.append(jnp.maximum(jnp.maximum(lo, hi) + b2, 0.0))
    flat = jnp.concatenate(pooled, axis=-1)           # (tb, 1024) f32

    # ---- fc1 + ReLU + fc2 + bias + log_softmax (all f32 epilogues) ---------
    h = jnp.dot(flat.astype(jnp.bfloat16), wf1_ref[...],
                preferred_element_type=jnp.float32)
    h = jnp.maximum(h + bf1_ref[...], 0.0)            # (tb, 512), stays in VMEM
    logits = jnp.dot(h.astype(jnp.bfloat16), wf2_ref[...],
                     preferred_element_type=jnp.float32) + bf2_ref[...]
    m = jnp.max(logits, axis=-1, keepdims=True)
    s = logits - m
    lse = jnp.log(jnp.sum(jnp.exp(s), axis=-1, keepdims=True))
    o_ref[...] = s - lse


# ----------------------------------------------------------------------------
# Wrapper
# ----------------------------------------------------------------------------
def _round_up(v, m):
    return -(-v // m) * m


def _im2col_rows(x, phase):
    """(N, 28, 28) f32 -> (12, N, 140) bf16 height-folded im2col of the conv1
    output rows with the given parity (oh = 2*i + phase).  Lane k = tap*28 + w."""
    taps = [x[:, phase + di: phase + di + 23: 2, :] for di in range(5)]
    y = jnp.concatenate(taps, axis=-1)                 # (N, 12, 140)
    return jnp.transpose(y, (1, 0, 2)).astype(jnp.bfloat16)


def net_forward(prep, x_nchw, block_b=32):
    n = x_nchw.shape[0]
    tb = min(block_b, _round_up(n, 8))     # fixed block; batch padded up to it
    npad = _round_up(n, tb)

    x = x_nchw.reshape(n, 28, 28).astype(jnp.float32)
    if npad != n:
        x = jnp.pad(x, ((0, npad - n), (0, 0), (0, 0)))
    xe = _im2col_rows(x, 0)                # even conv1 output rows
    xo = _im2col_rows(x, 1)                # odd  conv1 output rows

    out = pl.pallas_call(
        _net_fused_kernel,
        out_shape=jax.ShapeDtypeStruct((npad, 10), jnp.float32),
        grid=(npad // tb,),
        in_specs=[
            pl.BlockSpec((12, tb, 140), lambda i: (0, i, 0)),   # im2col (even)
            pl.BlockSpec((12, tb, 140), lambda i: (0, i, 0)),   # im2col (odd)
            pl.BlockSpec((140, 768), lambda i: (0, 0)),         # conv1 band w
            pl.BlockSpec((1, 384), lambda i: (0, 0)),           # conv1 bias
            pl.BlockSpec((1920, 512), lambda i: (0, 0)),        # conv2 band w
            pl.BlockSpec((1, 256), lambda i: (0, 0)),           # conv2 bias
            pl.BlockSpec((1024, 512), lambda i: (0, 0)),        # fc1 w
            pl.BlockSpec((1, 512), lambda i: (0, 0)),           # fc1 bias
            pl.BlockSpec((512, 10), lambda i: (0, 0)),          # fc2 w
            pl.BlockSpec((1, 10), lambda i: (0, 0)),            # fc2 bias
        ],
        out_specs=pl.BlockSpec((tb, 10), lambda i: (i, 0)),
        compiler_params=pltpu.CompilerParams(
            dimension_semantics=("parallel",),
            vmem_limit_bytes=40 * 1024 * 1024),
    )(xe, xo, prep["wb1"], prep["b1"], prep["wb2"], prep["b2"],
      prep["wf1"], prep["bf1"], prep["wf2"], prep["bf2"])
    return out[:n]


# ----------------------------------------------------------------------------
# One-time parameter preprocessing (all layout plumbing hoisted here)
# ----------------------------------------------------------------------------
def prepare_params(params):
    w1 = np.asarray(params["w_conv1"], np.float32)    # (20, 1, 5, 5)
    bc1 = np.asarray(params["b_conv1"], np.float32)
    w2 = np.asarray(params["w_conv2"], np.float32)    # (50, 20, 5, 5)
    bc2 = np.asarray(params["b_conv2"], np.float32)
    wl1 = np.asarray(params["w_fc1"], np.float32)     # (500, 800)
    bl1 = np.asarray(params["b_fc1"], np.float32)
    wl2 = np.asarray(params["w_fc2"], np.float32)     # (10, 500)
    bl2 = np.asarray(params["b_fc2"], np.float32)

    # conv1 band: K = 5*28 (k = tap*28 + input_col),
    # N = 2*12*32 (n = col_parity*384 + pooled_col*32 + channel), ow = 2j + pw.
    C, DI, DJ, OW = np.meshgrid(np.arange(20), np.arange(5), np.arange(5),
                                np.arange(24), indexing="ij")
    wb1 = np.zeros((140, 768), np.float32)
    wb1[(DI * 28 + OW + DJ).ravel(),
        ((OW % 2) * 384 + (OW // 2) * 32 + C).ravel()] = w1[C, 0, DI, DJ].ravel()
    b1 = np.zeros((1, 384), np.float32)
    b1[0, (np.arange(12)[:, None] * 32 + np.arange(20)[None, :]).ravel()] = (
        np.tile(bc1, 12))

    # conv2 band: K = 5*12*32 (k = tap*384 + col*32 + in_channel),
    # N = 2*4*64 (n = col_parity*256 + pooled_col*64 + channel), ow = 2j + pw.
    C2, CI, DI, DJ, OW = np.meshgrid(np.arange(50), np.arange(20), np.arange(5),
                                     np.arange(5), np.arange(8), indexing="ij")
    wb2 = np.zeros((1920, 512), np.float32)
    wb2[(DI * 384 + (OW + DJ) * 32 + CI).ravel(),
        ((OW % 2) * 256 + (OW // 2) * 64 + C2).ravel()] = w2[C2, CI, DI, DJ].ravel()
    b2 = np.zeros((1, 256), np.float32)
    b2[0, (np.arange(4)[:, None] * 64 + np.arange(50)[None, :]).ravel()] = (
        np.tile(bc2, 4))

    # fc1: rows indexed by our kernel flatten order f = row*256 + col*64 + chan
    # (zero rows for padded channels); torch NCHW flatten t = chan*16 + row*4 +
    # col folded in.  Hidden dim padded 500 -> 512.
    I2, J2, CC = np.meshgrid(np.arange(4), np.arange(4), np.arange(50),
                             indexing="ij")
    f_idx = (I2 * 256 + J2 * 64 + CC).ravel()
    t_idx = (CC * 16 + I2 * 4 + J2).ravel()
    wf1 = np.zeros((1024, 512), np.float32)
    wf1[f_idx, :500] = wl1[:, t_idx].T
    bf1 = np.zeros((1, 512), np.float32)
    bf1[0, :500] = bl1

    wf2 = np.zeros((512, 10), np.float32)
    wf2[:500, :] = wl2.T
    bf2 = bl2.reshape(1, 10)

    return {
        "wb1": jnp.asarray(wb1, jnp.bfloat16), "b1": jnp.asarray(b1, jnp.float32),
        "wb2": jnp.asarray(wb2, jnp.bfloat16), "b2": jnp.asarray(b2, jnp.float32),
        "wf1": jnp.asarray(wf1, jnp.bfloat16), "bf1": jnp.asarray(bf1, jnp.float32),
        "wf2": jnp.asarray(wf2, jnp.bfloat16), "bf2": jnp.asarray(bf2, jnp.float32),
    }


# ----------------------------------------------------------------------------
# Pure-XLA f32 reference (for verification) and init
# ----------------------------------------------------------------------------
def net_reference(params, x_nchw):
    dn = ("NCHW", "OIHW", "NCHW")
    y = jax.lax.conv_general_dilated(x_nchw.astype(jnp.float32),
                                     params["w_conv1"], (1, 1), "VALID",
                                     dimension_numbers=dn)
    y = jax.nn.relu(y + params["b_conv1"].reshape(1, -1, 1, 1))
    y = jax.lax.reduce_window(y, -jnp.inf, jax.lax.max,
                              (1, 1, 2, 2), (1, 1, 2, 2), "VALID")
    y = jax.lax.conv_general_dilated(y, params["w_conv2"], (1, 1), "VALID",
                                     dimension_numbers=dn)
    y = jax.nn.relu(y + params["b_conv2"].reshape(1, -1, 1, 1))
    y = jax.lax.reduce_window(y, -jnp.inf, jax.lax.max,
                              (1, 1, 2, 2), (1, 1, 2, 2), "VALID")
    y = y.reshape(y.shape[0], -1)                       # torch NCHW flatten
    y = jax.nn.relu(y @ params["w_fc1"].T + params["b_fc1"])
    y = y @ params["w_fc2"].T + params["b_fc2"]
    return jax.nn.log_softmax(y, axis=-1)


def init_params(key):
    k = jax.random.split(key, 8)
    # PyTorch parameter layouts: conv weight (out_c, in_c, kh, kw); linear (out, in).
    return {
        "w_conv1": jax.random.normal(k[0], (20, 1, 5, 5), jnp.float32) * 0.10,
        "b_conv1": jax.random.normal(k[1], (20,), jnp.float32) * 0.10,
        "w_conv2": jax.random.normal(k[2], (50, 20, 5, 5), jnp.float32) * 0.05,
        "b_conv2": jax.random.normal(k[3], (50,), jnp.float32) * 0.05,
        "w_fc1":   jax.random.normal(k[4], (500, 800), jnp.float32) * 0.02,
        "b_fc1":   jax.random.normal(k[5], (500,), jnp.float32) * 0.02,
        "w_fc2":   jax.random.normal(k[6], (10, 500), jnp.float32) * 0.05,
        "b_fc2":   jax.random.normal(k[7], (10,), jnp.float32) * 0.05,
    }


if __name__ == "__main__":
    key = jax.random.PRNGKey(0)
    pkey, xkey = jax.random.split(key)
    params = init_params(pkey)
    prep = prepare_params(params)          # one-time weight prep (hoisted)

    # forward() implies MNIST-like input: (batch, 1, 28, 28) NCHW.
    x = jax.random.normal(xkey, (2, 1, 28, 28), jnp.float32)

    out = jax.block_until_ready(jax.jit(net_forward)(prep, x))
    assert out.shape == (2, 10) and out.dtype == jnp.float32
    # log_softmax rows must sum to 1 in prob space (epilogue is exact f32).
    assert bool(jnp.all(jnp.abs(jnp.sum(jnp.exp(out), axis=1) - 1.0) < 1e-4))

    # Check against a pure-XLA f32 reference (bf16 matmul operands -> loose tol).
    ref = jax.block_until_ready(jax.jit(net_reference)(params, x))
    max_err = float(jnp.max(jnp.abs(out - ref)))
    assert max_err < 5e-2, f"mismatch vs reference: max |diff| = {max_err}"

    print("KERNEL_OK")
</pallas_src>

<mosaic_0001>
module attributes {stable_mosaic.version = 11 : i64} {
  func.func @_net_fused_kernel(%arg0: i32, %arg1: memref<12x8x140xbf16, #tpu.memory_space<vmem>>, %arg2: memref<12x8x140xbf16, #tpu.memory_space<vmem>>, %arg3: memref<140x768xbf16, #tpu.memory_space<vmem>>, %arg4: memref<1x384xf32, #tpu.memory_space<vmem>>, %arg5: memref<1920x512xbf16, #tpu.memory_space<vmem>>, %arg6: memref<1x256xf32, #tpu.memory_space<vmem>>, %arg7: memref<1024x512xbf16, #tpu.memory_space<vmem>>, %arg8: memref<1x512xf32, #tpu.memory_space<vmem>>, %arg9: memref<512x10xbf16, #tpu.memory_space<vmem>>, %arg10: memref<1x10xf32, #tpu.memory_space<vmem>>, %arg11: memref<8x10xf32, #tpu.memory_space<vmem>>) attributes {dimension_semantics = [#tpu.dimension_semantics<parallel>], iteration_bounds = array<i64: 1>, scalar_prefetch = 0 : i64, scratch_operands = 0 : i64, tpu.core_type = #tpu.core_type<tc>, window_params = [{transform_indices = @transform_0, window_bounds = array<i64: 12, 8, 140>}, {transform_indices = @transform_1, window_bounds = array<i64: 12, 8, 140>}, {pipeline_mode = #tpu.pipeline_mode<synchronous>, transform_indices = @transform_2, window_bounds = array<i64: 140, 768>}, {pipeline_mode = #tpu.pipeline_mode<synchronous>, transform_indices = @transform_3, window_bounds = array<i64: 1, 384>}, {pipeline_mode = #tpu.pipeline_mode<synchronous>, transform_indices = @transform_4, window_bounds = array<i64: 1920, 512>}, {pipeline_mode = #tpu.pipeline_mode<synchronous>, transform_indices = @transform_5, window_bounds = array<i64: 1, 256>}, {pipeline_mode = #tpu.pipeline_mode<synchronous>, transform_indices = @transform_6, window_bounds = array<i64: 1024, 512>}, {pipeline_mode = #tpu.pipeline_mode<synchronous>, transform_indices = @transform_7, window_bounds = array<i64: 1, 512>}, {pipeline_mode = #tpu.pipeline_mode<synchronous>, transform_indices = @transform_8, window_bounds = array<i64: 512, 10>}, {pipeline_mode = #tpu.pipeline_mode<synchronous>, transform_indices = @transform_9, window_bounds = array<i64: 1, 10>}, {transform_indices = @transform_10, window_bounds = array<i64: 8, 10>}]} {
    %c0 = arith.constant 0 : index
    %c0_0 = arith.constant 0 : index
    %c0_1 = arith.constant 0 : index
    %0 = vector.load %arg1[%c0, %c0_0, %c0_1] : memref<12x8x140xbf16, #tpu.memory_space<vmem>>, vector<12x8x140xbf16>
    %1 = vector.shape_cast %0 : vector<12x8x140xbf16> to vector<96x140xbf16>
    %c0_2 = arith.constant 0 : index
    %c0_3 = arith.constant 0 : index
    %c0_4 = arith.constant 0 : index
    %2 = vector.load %arg2[%c0_2, %c0_3, %c0_4] : memref<12x8x140xbf16, #tpu.memory_space<vmem>>, vector<12x8x140xbf16>
    %3 = vector.shape_cast %2 : vector<12x8x140xbf16> to vector<96x140xbf16>
    %c0_5 = arith.constant 0 : index
    %c0_6 = arith.constant 0 : index
    %4 = vector.load %arg3[%c0_5, %c0_6] : memref<140x768xbf16, #tpu.memory_space<vmem>>, vector<140x768xbf16>
    %cst = arith.constant dense<0.000000e+00> : vector<96x768xf32>
    %5 = tpu.matmul %1, %4, %cst {dimension_numbers = #tpu.dot_dimension_numbers<[1], [0], [0], [1], [0, 0, 1, 1], [], []>} : vector<96x140xbf16>, vector<140x768xbf16>, vector<96x768xf32> -> vector<96x768xf32>
    %cst_7 = arith.constant dense<0.000000e+00> : vector<96x768xf32>
    %6 = tpu.matmul %3, %4, %cst_7 {dimension_numbers = #tpu.dot_dimension_numbers<[1], [0], [0], [1], [0, 0, 1, 1], [], []>} : vector<96x140xbf16>, vector<140x768xbf16>, vector<96x768xf32> -> vector<96x768xf32>
    %7 = arith.maximumf %5, %6 : vector<96x768xf32>
    %8 = vector.extract_strided_slice %7 {offsets = [0, 0], sizes = [96, 384], strides = [1, 1]} : vector<96x768xf32> to vector<96x384xf32>
    %9 = vector.extract_strided_slice %7 {offsets = [0, 384], sizes = [96, 384], strides = [1, 1]} : vector<96x768xf32> to vector<96x384xf32>
    %10 = arith.maximumf %8, %9 : vector<96x384xf32>
    %c0_8 = arith.constant 0 : index
    %c0_9 = arith.constant 0 : index
    %11 = vector.load %arg4[%c0_8, %c0_9] : memref<1x384xf32, #tpu.memory_space<vmem>>, vector<1x384xf32>
    %12 = vector.broadcast %11 : vector<1x384xf32> to vector<96x384xf32>
    %13 = arith.addf %10, %12 : vector<96x384xf32>
    %cst_10 = arith.constant 0.000000e+00 : f32
    %14 = vector.broadcast %cst_10 : f32 to vector<96x384xf32>
    %15 = arith.maximumf %13, %14 : vector<96x384xf32>
    %16 = arith.truncf %15 : vector<96x384xf32> to vector<96x384xbf16>
    %17 = vector.extract_strided_slice %16 {offsets = [0, 0], sizes = [64, 384], strides = [1, 1]} : vector<96x384xbf16> to vector<64x384xbf16>
    %18 = vector.extract_strided_slice %16 {offsets = [8, 0], sizes = [64, 384], strides = [1, 1]} : vector<96x384xbf16> to vector<64x384xbf16>
    %19 = vector.extract_strided_slice %16 {offsets = [16, 0], sizes = [64, 384], strides = [1, 1]} : vector<96x384xbf16> to vector<64x384xbf16>
    %20 = vector.extract_strided_slice %16 {offsets = [24, 0], sizes = [64, 384], strides = [1, 1]} : vector<96x384xbf16> to vector<64x384xbf16>
    %21 = vector.extract_strided_slice %16 {offsets = [32, 0], sizes = [64, 384], strides = [1, 1]} : vector<96x384xbf16> to vector<64x384xbf16>
    %22 = tpu.concatenate %17, %18, %19, %20, %21 in 1 : vector<64x384xbf16>, vector<64x384xbf16>, vector<64x384xbf16>, vector<64x384xbf16>, vector<64x384xbf16> -> vector<64x1920xbf16>
    %c0_11 = arith.constant 0 : index
    %c0_12 = arith.constant 0 : index
    %23 = vector.load %arg5[%c0_11, %c0_12] : memref<1920x512xbf16, #tpu.memory_space<vmem>>, vector<1920x512xbf16>
    %cst_13 = arith.constant dense<0.000000e+00> : vector<64x512xf32>
    %24 = tpu.matmul %22, %23, %cst_13 {dimension_numbers = #tpu.dot_dimension_numbers<[1], [0], [0], [1], [0, 0, 1, 1], [], []>} : vector<64x1920xbf16>, vector<1920x512xbf16>, vector<64x512xf32> -> vector<64x512xf32>
    %25 = vector.extract_strided_slice %24 {offsets = [0, 0], sizes = [64, 256], strides = [1, 1]} : vector<64x512xf32> to vector<64x256xf32>
    %26 = vector.extract_strided_slice %24 {offsets = [0, 256], sizes = [64, 256], strides = [1, 1]} : vector<64x512xf32> to vector<64x256xf32>
    %27 = arith.maximumf %25, %26 : vector<64x256xf32>
    %c0_14 = arith.constant 0 : index
    %c0_15 = arith.constant 0 : index
    %28 = vector.load %arg6[%c0_14, %c0_15] : memref<1x256xf32, #tpu.memory_space<vmem>>, vector<1x256xf32>
    %29 = vector.extract_strided_slice %27 {offsets = [0, 0], sizes = [8, 256], strides = [1, 1]} : vector<64x256xf32> to vector<8x256xf32>
    %30 = vector.extract_strided_slice %27 {offsets = [8, 0], sizes = [8, 256], strides = [1, 1]} : vector<64x256xf32> to vector<8x256xf32>
    %31 = arith.maximumf %29, %30 : vector<8x256xf32>
    %32 = vector.broadcast %28 : vector<1x256xf32> to vector<8x256xf32>
    %33 = arith.addf %31, %32 : vector<8x256xf32>
    %cst_16 = arith.constant 0.000000e+00 : f32
    %34 = vector.broadcast %cst_16 : f32 to vector<8x256xf32>
    %35 = arith.maximumf %33, %34 : vector<8x256xf32>
    %36 = vector.extract_strided_slice %27 {offsets = [16, 0], sizes = [8, 256], strides = [1, 1]} : vector<64x256xf32> to vector<8x256xf32>
    %37 = vector.extract_strided_slice %27 {offsets = [24, 0], sizes = [8, 256], strides = [1, 1]} : vector<64x256xf32> to vector<8x256xf32>
    %38 = arith.maximumf %36, %37 : vector<8x256xf32>
    %39 = vector.broadcast %28 : vector<1x256xf32> to vector<8x256xf32>
    %40 = arith.addf %38, %39 : vector<8x256xf32>
    %cst_17 = arith.constant 0.000000e+00 : f32
    %41 = vector.broadcast %cst_17 : f32 to vector<8x256xf32>
    %42 = arith.maximumf %40, %41 : vector<8x256xf32>
    %43 = vector.extract_strided_slice %27 {offsets = [32, 0], sizes = [8, 256], strides = [1, 1]} : vector<64x256xf32> to vector<8x256xf32>
    %44 = vector.extract_strided_slice %27 {offsets = [40, 0], sizes = [8, 256], strides = [1, 1]} : vector<64x256xf32> to vector<8x256xf32>
    %45 = arith.maximumf %43, %44 : vector<8x256xf32>
    %46 = vector.broadcast %28 : vector<1x256xf32> to vector<8x256xf32>
    %47 = arith.addf %45, %46 : vector<8x256xf32>
    %cst_18 = arith.constant 0.000000e+00 : f32
    %48 = vector.broadcast %cst_18 : f32 to vector<8x256xf32>
    %49 = arith.maximumf %47, %48 : vector<8x256xf32>
    %50 = vector.extract_strided_slice %27 {offsets = [48, 0], sizes = [8, 256], strides = [1, 1]} : vector<64x256xf32> to vector<8x256xf32>
    %51 = vector.extract_strided_slice %27 {offsets = [56, 0], sizes = [8, 256], strides = [1, 1]} : vector<64x256xf32> to vector<8x256xf32>
    %52 = arith.maximumf %50, %51 : vector<8x256xf32>
    %53 = vector.broadcast %28 : vector<1x256xf32> to vector<8x256xf32>
    %54 = arith.addf %52, %53 : vector<8x256xf32>
    %cst_19 = arith.constant 0.000000e+00 : f32
    %55 = vector.broadcast %cst_19 : f32 to vector<8x256xf32>
    %56 = arith.maximumf %54, %55 : vector<8x256xf32>
    %57 = tpu.concatenate %35, %42, %49, %56 in 1 : vector<8x256xf32>, vector<8x256xf32>, vector<8x256xf32>, vector<8x256xf32> -> vector<8x1024xf32>
    %58 = arith.truncf %57 : vector<8x1024xf32> to vector<8x1024xbf16>
    %c0_20 = arith.constant 0 : index
    %c0_21 = arith.constant 0 : index
    %59 = vector.load %arg7[%c0_20, %c0_21] : memref<1024x512xbf16, #tpu.memory_space<vmem>>, vector<1024x512xbf16>
    %cst_22 = arith.constant dense<0.000000e+00> : vector<8x512xf32>
    %60 = tpu.matmul %58, %59, %cst_22 {dimension_numbers = #tpu.dot_dimension_numbers<[1], [0], [0], [1], [0, 0, 1, 1], [], []>} : vector<8x1024xbf16>, vector<1024x512xbf16>, vector<8x512xf32> -> vector<8x512xf32>
    %c0_23 = arith.constant 0 : index
    %c0_24 = arith.constant 0 : index
    %61 = vector.load %arg8[%c0_23, %c0_24] : memref<1x512xf32, #tpu.memory_space<vmem>>, vector<1x512xf32>
    %62 = vector.broadcast %61 : vector<1x512xf32> to vector<8x512xf32>
    %63 = arith.addf %60, %62 : vector<8x512xf32>
    %cst_25 = arith.constant 0.000000e+00 : f32
    %64 = vector.broadcast %cst_25 : f32 to vector<8x512xf32>
    %65 = arith.maximumf %63, %64 : vector<8x512xf32>
    %66 = arith.truncf %65 : vector<8x512xf32> to vector<8x512xbf16>
    %c0_26 = arith.constant 0 : index
    %c0_27 = arith.constant 0 : index
    %67 = vector.load %arg9[%c0_26, %c0_27] : memref<512x10xbf16, #tpu.memory_space<vmem>>, vector<512x10xbf16>
    %cst_28 = arith.constant dense<0.000000e+00> : vector<8x10xf32>
    %68 = tpu.matmul %66, %67, %cst_28 {dimension_numbers = #tpu.dot_dimension_numbers<[1], [0], [0], [1], [0, 0, 1, 1], [], []>} : vector<8x512xbf16>, vector<512x10xbf16>, vector<8x10xf32> -> vector<8x10xf32>
    %c0_29 = arith.constant 0 : index
    %c0_30 = arith.constant 0 : index
    %69 = vector.load %arg10[%c0_29, %c0_30] : memref<1x10xf32, #tpu.memory_space<vmem>>, vector<1x10xf32>
    %70 = vector.broadcast %69 : vector<1x10xf32> to vector<8x10xf32>
    %71 = arith.addf %68, %70 : vector<8x10xf32>
    %cst_31 = arith.constant dense<0xFF800000> : vector<8xf32>
    %72 = vector.multi_reduction <maximumf>, %71, %cst_31 [1] : vector<8x10xf32> to vector<8xf32>
    %73 = vector.shape_cast %72 : vector<8xf32> to vector<8x1xf32>
    %74 = vector.broadcast %73 : vector<8x1xf32> to vector<8x10xf32>
    %75 = arith.subf %71, %74 : vector<8x10xf32>
    %76 = math.exp %75 : vector<8x10xf32>
    %cst_32 = arith.constant dense<0.000000e+00> : vector<8xf32>
    %77 = vector.multi_reduction <add>, %76, %cst_32 [1] : vector<8x10xf32> to vector<8xf32>
    %78 = vector.shape_cast %77 : vector<8xf32> to vector<8x1xf32>
    %79 = math.log %78 : vector<8x1xf32>
    %80 = vector.broadcast %79 : vector<8x1xf32> to vector<8x10xf32>
    %81 = arith.subf %75, %80 : vector<8x10xf32>
    %c0_33 = arith.constant 0 : index
    %c0_34 = arith.constant 0 : index
    %82 = vector.load %arg11[%c0_33, %c0_34] : memref<8x10xf32, #tpu.memory_space<vmem>>, vector<8x10xf32>
    tpu.vector_store %arg11[%c0_33, %c0_34], %81 {strides = array<i32>} : memref<8x10xf32, #tpu.memory_space<vmem>>, vector<8x10xf32>,
    return
  }
  func.func @transform_0(%arg0: i32) -> (i32, i32, i32) {
    %c0_i32 = arith.constant 0 : i32
    %c0_i32_0 = arith.constant 0 : i32
    %c0_i32_1 = arith.constant 0 : i32
    return %c0_i32, %arg0, %c0_i32_0 : i32, i32, i32
  }
  func.func @transform_1(%arg0: i32) -> (i32, i32, i32) {
    %c0_i32 = arith.constant 0 : i32
    %c0_i32_0 = arith.constant 0 : i32
    %c0_i32_1 = arith.constant 0 : i32
    return %c0_i32, %arg0, %c0_i32_0 : i32, i32, i32
  }
  func.func @transform_2(%arg0: i32) -> (i32, i32) {
    %c0_i32 = arith.constant 0 : i32
    %c0_i32_0 = arith.constant 0 : i32
    %c0_i32_1 = arith.constant 0 : i32
    return %c0_i32, %c0_i32_0 : i32, i32
  }
  func.func @transform_3(%arg0: i32) -> (i32, i32) {
    %c0_i32 = arith.constant 0 : i32
    %c0_i32_0 = arith.constant 0 : i32
    %c0_i32_1 = arith.constant 0 : i32
    return %c0_i32, %c0_i32_0 : i32, i32
  }
  func.func @transform_4(%arg0: i32) -> (i32, i32) {
    %c0_i32 = arith.constant 0 : i32
    %c0_i32_0 = arith.constant 0 : i32
    %c0_i32_1 = arith.constant 0 : i32
    return %c0_i32, %c0_i32_0 : i32, i32
  }
  func.func @transform_5(%arg0: i32) -> (i32, i32) {
    %c0_i32 = arith.constant 0 : i32
    %c0_i32_0 = arith.constant 0 : i32
    %c0_i32_1 = arith.constant 0 : i32
    return %c0_i32, %c0_i32_0 : i32, i32
  }
  func.func @transform_6(%arg0: i32) -> (i32, i32) {
    %c0_i32 = arith.constant 0 : i32
    %c0_i32_0 = arith.constant 0 : i32
    %c0_i32_1 = arith.constant 0 : i32
    return %c0_i32, %c0_i32_0 : i32, i32
  }
  func.func @transform_7(%arg0: i32) -> (i32, i32) {
    %c0_i32 = arith.constant 0 : i32
    %c0_i32_0 = arith.constant 0 : i32
    %c0_i32_1 = arith.constant 0 : i32
    return %c0_i32, %c0_i32_0 : i32, i32
  }
  func.func @transform_8(%arg0: i32) -> (i32, i32) {
    %c0_i32 = arith.constant 0 : i32
    %c0_i32_0 = arith.constant 0 : i32
    %c0_i32_1 = arith.constant 0 : i32
    return %c0_i32, %c0_i32_0 : i32, i32
  }
  func.func @transform_9(%arg0: i32) -> (i32, i32) {
    %c0_i32 = arith.constant 0 : i32
    %c0_i32_0 = arith.constant 0 : i32
    %c0_i32_1 = arith.constant 0 : i32
    return %c0_i32, %c0_i32_0 : i32, i32
  }
  func.func @transform_10(%arg0: i32) -> (i32, i32) {
    %c0_i32 = arith.constant 0 : i32
    %c0_i32_0 = arith.constant 0 : i32
    return %arg0, %c0_i32 : i32, i32
  }
}

</mosaic_0001>

<bundles_post_ra>
// kernel: net_forward.1
= control target key start
LH: loop header
LB: loop body
LE: loop exit
PB: predicated region body
PF: predicated region fallthrough
CT: control target
= control target key end

     0   :  { %15 = vsyncpa [#allocation3], 0  ;;  %s11819_s0 = inlined_call_operand.vmem [shape: bf16[12,8,140], index: 0, kind: input, shape index: {}]   ;;  %s11820_s1 = inlined_call_operand.vmem [shape: bf16[12,8,140], index: 1, kind: input, shape index: {}]   ;;  %s11821_s2 = inlined_call_operand.hbm [shape: bf16[140,768], index: 2, kind: input, shape index: {}]   ;;  %s11822_s3 = inlined_call_operand.hbm [shape: f32[1,384], index: 3, kind: input, shape index: {}]   ;;  %s11823_s4 = inlined_call_operand.hbm [shape: bf16[1920,512], index: 4, kind: input, shape index: {}]   ;;  %s11824_s5 = inlined_call_operand.hbm [shape: f32[1,256], index: 5, kind: input, shape index: {}]   ;;  %s11825_s6 = inlined_call_operand.hbm [shape: bf16[1024,512], index: 6, kind: input, shape index: {}]   ;;  %s11826_s7 = inlined_call_operand.hbm [shape: f32[1,512], index: 7, kind: input, shape index: {}]   ;;  %s11827_s8 = inlined_call_operand.vmem [shape: bf16[512,10], index: 8, kind: input, shape index: {}]   ;;  %s11828_s9 = inlined_call_operand.hbm [shape: f32[1,10], index: 9, kind: input, shape index: {}]   ;;  %s11829_s10 = inlined_call_operand.vmem [shape: f32[8,10], index: 10, kind: output, shape index: {}]  }
   0x1   :  { %16 = vsyncpa [#allocation5], 0 }
   0x2   :  { %17 = vsyncpa [#allocation8], 0 }
   0x3   :  { %18 = vsyncpa [#allocation11], 0  ;;  %s10452_s13 = smov [#allocation4]   ;;  %s10453_s15 = smov [#allocation7]  }
   0x4   :  { %s41_s14 = sshll.u32 %s10452_s13, 4  ;;  %s63_s16 = sshll.u32 %s10453_s15, 4  ;;  %s42_s14 = int_to_ptr.vmem [resolvable:$true] %s41_s14  ;;  %s64_s16 = int_to_ptr.vmem [resolvable:$true] %s63_s16 }
   0x5   :  { %s10290_s19 = scalar_lea.hbm %s11822_s3, 48 }
   0x6   :  { %p10291_p0 = scmp.ne.s32.totalorder %s11822_s3, %s10290_s19  ;;  %p10294_p1 = scmp.lt.u32.totalorder %s10290_s19, %s11822_s3 }
   0x8   :  { %p10296_p2 = pnand %p10294_p1, %p10291_p0 }
   0xa   :  { %10299 = shalt.err (!%p10296_p2)
}
   0xb   :  { %s10300_s24 = scalar_lea.vmem %s42_s14, 48  ;;  %s10304_s25 = scalar_lea.vmem %s42_s14, 64 }
   0xc   :  { %p10301_p3 = scmp.ne.s32.totalorder %s42_s14, %s10300_s24  ;;  %p10305_p4 = scmp.lt.s32.totalorder %s42_s14, %s42_s14 }
   0xd   :  { %p10306_p5 = scmp.lt.s32.totalorder %s10304_s25, %s10300_s24 }
   0xf   :  { %p10307_p6 = por %p10306_p5, %p10305_p4 }
  0x11   :  { %p10308_p7 = pnand %p10307_p6, %p10301_p3 }
  0x13   :  { %10311 = shalt.err (!%p10308_p7)
}
  0x14   :  { %44 = dma.hbm_to_vmem [thread:$0]  %s11822_s3, 48, %s42_s14, [#allocation5]  }
  0x15   :  { %s10312_s30 = scalar_lea.hbm %s11824_s5, 32 }
  0x16   :  { %p10313_p8 = scmp.ne.s32.totalorder %s11824_s5, %s10312_s30  ;;  %p10316_p9 = scmp.lt.u32.totalorder %s10312_s30, %s11824_s5 }
  0x18   :  { %p10318_p10 = pnand %p10316_p9, %p10313_p8 }
  0x1a   :  { %10321 = shalt.err (!%p10318_p10)
}
  0x1b   :  { %s10322_s17 = scalar_lea.vmem %s64_s16, 32  ;;  %p10327_p12 = scmp.lt.s32.totalorder %s64_s16, %s64_s16 }
  0x1c   :  { %p10323_p11 = scmp.ne.s32.totalorder %s64_s16, %s10322_s17  ;;  %p10328_p13 = scmp.lt.s32.totalorder %s10322_s17, %s10322_s17 }
  0x1e   :  { %p10329_p0 = por %p10328_p13, %p10327_p12 }
  0x20   :  { %p10330_p1 = pnand %p10329_p0, %p10323_p11 }
  0x22   :  { %10333 = shalt.err (!%p10330_p1)
}
  0x23   :  { %66 = dma.hbm_to_vmem [thread:$0]  %s11824_s5, 32, %s64_s16, [#allocation8]  }
  0x24   :  { %s10454_s18 = smov [#allocation10]   ;;  %s10455_s20 = smov [#allocation2]  }
  0x25   :  { %s85_s19 = sshll.u32 %s10454_s18, 4  ;;  %s28_s21 = sshll.u32 %s10455_s20, 4  ;;  %s86_s19 = int_to_ptr.vmem [resolvable:$true] %s85_s19  ;;  %s10543_s21 = int_to_ptr.vmem [resolvable:$true] %s28_s21 }
  0x26   :  { %s10334_s24 = scalar_lea.hbm %s11826_s7, 64 }
  0x27   :  { %p10335_p2 = scmp.ne.s32.totalorder %s11826_s7, %s10334_s24  ;;  %p10338_p3 = scmp.lt.u32.totalorder %s10334_s24, %s11826_s7 }
  0x29   :  { %p10340_p4 = pnand %p10338_p3, %p10335_p2 }
  0x2b   :  { %10343 = shalt.err (!%p10340_p4)
}
  0x2c   :  { %s10344_s5 = scalar_lea.vmem %s86_s19, 64  ;;  %p10349_p6 = scmp.lt.s32.totalorder %s86_s19, %s86_s19 }
  0x2d   :  { %p10345_p5 = scmp.ne.s32.totalorder %s86_s19, %s10344_s5  ;;  %p10350_p7 = scmp.lt.s32.totalorder %s10344_s5, %s10344_s5 }
  0x2f   :  { %p10351_p8 = por %p10350_p7, %p10349_p6 }
  0x31   :  { %p10352_p9 = pnand %p10351_p8, %p10345_p5 }
  0x33   :  { %10355 = shalt.err (!%p10352_p9)
}
  0x34   :  { %88 = dma.hbm_to_vmem [thread:$0]  %s11826_s7, 64, %s86_s19, [#allocation11]  }
  0x35   :  { %s10356_s12 = scalar_lea.hbm %s11821_s2, 6912 }
  0x36   :  { %p10357_p10 = scmp.ne.s32.totalorder %s11821_s2, %s10356_s12  ;;  %p10360_p11 = scmp.lt.u32.totalorder %s10356_s12, %s11821_s2 }
  0x38   :  { %p10362_p12 = pnand %p10360_p11, %p10357_p10 }
  0x3a   :  { %10365 = shalt.err (!%p10362_p12)
}
  0x3b   :  { %s10366_s14 = scalar_lea.vmem %s10543_s21, 6912  ;;  %p10371_p0 = scmp.lt.s32.totalorder %s10543_s21, %s10543_s21 }
  0x3c   :  { %p10367_p13 = scmp.ne.s32.totalorder %s10543_s21, %s10366_s14  ;;  %p10372_p1 = scmp.lt.s32.totalorder %s10366_s14, %s10366_s14 }
  0x3e   :  { %p10373_p2 = por %p10372_p1, %p10371_p0 }
  0x40   :  { %p10374_p3 = pnand %p10373_p2, %p10367_p13 }
  0x42   :  { %10377 = shalt.err (!%p10374_p3)
}
  0x43   :  { %s10456_s7 = smov 384   ;;  %s10457_s18 = smov 24  }
  0x44   :  { %34 = dma.hbm_to_vmem [thread:$0]  %s11821_s2, 6912, %s10543_s21, [#allocation3], %s10456_s7, %s10456_s7, %s10457_s18  }
  0x45   :  { %s10458_s22 = smov [#allocation6]   ;;  %s10378_s26 = scalar_lea.hbm %s11823_s4, 61440 }
  0x46   :  { %s50_s23 = sshll.u32 %s10458_s22, 4  ;;  %p10379_p4 = scmp.ne.s32.totalorder %s11823_s4, %s10378_s26  ;;  %s51_s23 = int_to_ptr.vmem [resolvable:$true] %s50_s23 }
  0x47   :  { %p10382_p5 = scmp.lt.u32.totalorder %s10378_s26, %s11823_s4 }
  0x49   :  { %p10384_p6 = pnand %p10382_p5, %p10379_p4 }
  0x4b   :  { %10387 = shalt.err (!%p10384_p6)
}
  0x4c   :  { %s10388_s29 = scalar_lea.vmem %s51_s23, 61440  ;;  %p10393_p8 = scmp.lt.s32.totalorder %s51_s23, %s51_s23 }
  0x4d   :  { %p10389_p7 = scmp.ne.s32.totalorder %s51_s23, %s10388_s29  ;;  %p10394_p9 = scmp.lt.s32.totalorder %s10388_s29, %s10388_s29 }
  0x4f   :  { %p10395_p10 = por %p10394_p9, %p10393_p8 }
  0x51   :  { %p10396_p11 = pnand %p10395_p10, %p10389_p7 }
  0x53   :  { %10399 = shalt.err (!%p10396_p11)
}
  0x54   :  { %s10459_s2 = smov 256   ;;  %s10460_s21 = smov 16  }
  0x55   :  { %56 = dma.hbm_to_vmem [thread:$0]  %s11823_s4, 61440, %s51_s23, [#allocation5], %s10459_s2, %s10459_s2, %s10460_s21  }
  0x56   :  { %s10461_s12 = smov [#allocation9]   ;;  %s10462_s15 = smov [#allocation12]  }
  0x57   :  { %s72_s13 = sshll.u32 %s10461_s12, 4  ;;  %s97_s17 = sshll.u32 %s10462_s15, 4  ;;  %s73_s13 = int_to_ptr.vmem [resolvable:$true] %s72_s13  ;;  %s98_s17 = int_to_ptr.vmem [resolvable:$true] %s97_s17 }
  0x58   :  { %s10400_s7 = scalar_lea.hbm %s11825_s6, 32768 }
  0x59   :  { %p10401_p12 = scmp.ne.s32.totalorder %s11825_s6, %s10400_s7  ;;  %p10404_p13 = scmp.lt.u32.totalorder %s10400_s7, %s11825_s6 }
  0x5b   :  { %p10406_p0 = pnand %p10404_p13, %p10401_p12 }
  0x5d   :  { %10409 = shalt.err (!%p10406_p0)
}
  0x5e   :  { %s10410_s4 = scalar_lea.vmem %s73_s13, 32768  ;;  %p10415_p2 = scmp.lt.s32.totalorder %s73_s13, %s73_s13 }
  0x5f   :  { %p10411_p1 = scmp.ne.s32.totalorder %s73_s13, %s10410_s4  ;;  %p10416_p3 = scmp.lt.s32.totalorder %s10410_s4, %s10410_s4 }
  0x61   :  { %p10417_p4 = por %p10416_p3, %p10415_p2 }
  0x63   :  { %p10418_p5 = pnand %p10417_p4, %p10411_p1 }
  0x65   :  { %10421 = shalt.err (!%p10418_p5)
}
  0x66   :  { %78 = dma.hbm_to_vmem [thread:$0]  %s11825_s6, 32768, %s73_s13, [#allocation8], %s10459_s2, %s10459_s2, %s10460_s21  }
  0x67   :  { %s10422_s27 = scalar_lea.hbm %s11828_s9, 16 }
  0x68   :  { %p10423_p6 = scmp.ne.s32.totalorder %s11828_s9, %s10422_s27  ;;  %p10426_p7 = scmp.lt.u32.totalorder %s10422_s27, %s11828_s9 }
  0x6a   :  { %p10428_p8 = pnand %p10426_p7, %p10423_p6 }
  0x6c   :  { %10431 = shalt.err (!%p10428_p8)
}
  0x6d   :  { %s10432_s30 = scalar_lea.vmem %s98_s17, 16  ;;  %s10436_s11 = scalar_lea.vmem %s98_s17, 32 }
  0x6e   :  { %p10433_p9 = scmp.ne.s32.totalorder %s98_s17, %s10432_s30  ;;  %p10437_p10 = scmp.lt.s32.totalorder %s98_s17, %s98_s17 }
  0x6f   :  { %p10438_p11 = scmp.lt.s32.totalorder %s10436_s11, %s10432_s30 }
  0x71   :  { %p10439_p12 = por %p10438_p11, %p10437_p10 }
  0x73   :  { %p10440_p13 = pnand %p10439_p12, %p10433_p9 }
  0x75   :  { %10443 = shalt.err (!%p10440_p13)
}
  0x76   :  { %100 = dma.hbm_to_vmem [thread:$0]  %s11828_s9, 16, %s98_s17, [#allocation11]  }
  0x77   :  { %10444 = dma.done.wait [#allocation3], 6912  }
  0x78   :  { %10445 = vsyncadd [#allocation3], 4294960384 }
  0x79   :  { %10446 = dma.done.wait [#allocation5], 61488  }
  0x7a   :  { %10447 = vsyncadd [#allocation5], 4294905808 }
  0x7b   :  { %10448 = dma.done.wait [#allocation8], 32800  }
  0x7c   :  { %10449 = vsyncadd [#allocation8], 4294934496 }
  0x7d   :  { %10450 = dma.done.wait [#allocation11], 80  }
  0x7e   :  { %10451 = vsyncadd [#allocation11], 4294967216  ;;  %v10610_v0 = vld [vmem:[#allocation2 + $0x4] ss:$24 sps:$4 sm:$0xff]   ;;  %v10615_v2 = vld [vmem:[#allocation2] ss:$24 sps:$4 sm:$0xff]  }
  0x7f   :  { %v10612_v1 = vld [vmem:[#allocation2 + $0xc] ss:$24 sps:$4 sm:$0xff]   ;;  %557 = vmatprep.subr.bf16.mxu0 %v10610_v0  ;;  %v10617_v3 = vld [vmem:[#allocation2 + $0x8] ss:$24 sps:$4 sm:$0xff]   ;;  %v10624_v5 = vld [vmem:[#allocation2 + $0x3c] ss:$24 sps:$4 sm:$0xff]  }
  0x80   :  { %650 = vmatprep.subr.bf16.mxu1 %v10612_v1  ;;  %v10620_v4 = vld [vmem:[#allocation2 + $0x34] ss:$24 sps:$4 sm:$0xff]   ;;  %558 = vmatpush1.bf16.msra.mxu0 %v10615_v2  ;;  %v10626_v6 = vld [vmem:[#allocation2 + $0x30] ss:$24 sps:$4 sm:$0xff]   ;;  %v10632_v8 = vld [vmem:[#allocation2 + $0x64] ss:$24 sps:$4 sm:$0xff]  }
  0x81   :  { %651 = vmatpush1.bf16.msra.mxu1 %v10617_v3  ;;  %559 = vmatprep.subr.bf16.mxu0 %v10620_v4  ;;  %v10629_v7 = vld [vmem:[#allocation2 + $0x38] ss:$24 sps:$4 sm:$0xff]   ;;  %v10634_v9 = vld [vmem:[#allocation2 + $0x6c] ss:$24 sps:$4 sm:$0xff]   ;;  %v10638_v11 = vld [vmem:[#allocation2 + $0x68] ss:$24 sps:$4 sm:$0xff]  }
  0x82   :  { %652 = vmatprep.subr.bf16.mxu1 %v10624_v5  ;;  %v10636_v10 = vld [vmem:[#allocation2 + $0x60] ss:$24 sps:$4 sm:$0xff]   ;;  %v10642_v12 = vld [vmem:[#allocation2 + $0x94] ss:$24 sps:$4 sm:$0xff]   ;;  %v10648_v14 = vld [vmem:[#allocation2 + $0x90] ss:$24 sps:$4 sm:$0xff]  }
  0x83   :  { %v10646_v13 = vld [vmem:[#allocation2 + $0x9c] ss:$24 sps:$4 sm:$0xff]   ;;  %v10652_v15 = vld [vmem:[#allocation2 + $0x98] ss:$24 sps:$4 sm:$0xff]   ;;  %v10658_v17 = vld [vmem:[#allocation2 + $0xcc] ss:$24 sps:$4 sm:$0xff]  }
  0x84   :  { %560 = vmatpush1.bf16.msra.mxu0 %v10626_v6  ;;  %v10654_v16 = vld [vmem:[#allocation2 + $0xc4] ss:$24 sps:$4 sm:$0xff]   ;;  %v10660_v18 = vld [vmem:[#allocation2 + $0xc0] ss:$24 sps:$4 sm:$0xff]   ;;  %v10666_v20 = vld [vmem:[#allocation2 + $0xf4] ss:$24 sps:$4 sm:$0xff]  }
  0x85   :  { %653 = vmatpush1.bf16.msra.mxu1 %v10629_v7  ;;  %561 = vmatprep.subr.bf16.mxu0 %v10632_v8  ;;  %v10662_v19 = vld [vmem:[#allocation2 + $0xc8] ss:$24 sps:$4 sm:$0xff]   ;;  %v10670_v21 = vld [vmem:[#allocation2 + $0xfc] ss:$24 sps:$4 sm:$0xff]   ;;  %v10676_v23 = vld [vmem:[#allocation2 + $0xf8] ss:$24 sps:$4 sm:$0xff]  }
  0x86   :  { %654 = vmatprep.subr.bf16.mxu1 %v10634_v9  ;;  %v10672_v22 = vld [vmem:[#allocation2 + $0xf0] ss:$24 sps:$4 sm:$0xff]   ;;  %v10678_v24 = vld [vmem:[#allocation2 + $0x124] ss:$24 sps:$4 sm:$0xff]   ;;  %v10684_v26 = vld [vmem:[#allocation2 + $0x120] ss:$24 sps:$4 sm:$0xff]  }
  0x87   :  { %v10682_v25 = vld [vmem:[#allocation2 + $0x12c] ss:$24 sps:$4 sm:$0xff]   ;;  %v10686_v27 = vld [vmem:[#allocation2 + $0x128] ss:$24 sps:$4 sm:$0xff]   ;;  %vm519_vm0 = vcmask 97280   ;;  %vm538_vm1 = vcmask 1045504  }
  0x88   :  { %562 = vmatpush1.bf16.msra.mxu0 %v10636_v10  ;;  %v10690_v28 = vld [vmem:[#allocation2 + $0x154] ss:$24 sps:$4 sm:$0xff]   ;;  %v10701_v31 = vld [vmem:[#allocation2 + $0x150] ss:$24 sps:$4 sm:$0xff]   ;;  %v10742_v42 = vld [vmem:[#allocation2 + $0x44] ss:$24 sps:$4 sm:$0xff]  }
  0x89   :  { %655 = vmatpush1.bf16.msra.mxu1 %v10638_v11  ;;  %563 = vmatprep.subr.bf16.mxu0 %v10642_v12  ;;  %v10694_v29 = vld [vmem:[#allocation2 + $0x15c] ss:$24 sps:$4 sm:$0xff]   ;;  %v10699_v30 = vld [vmem:[%s11819_s0 + $0x4] ss:$8 sps:$4 sm:$0xff]   ;;  %v10703_v32 = vld [vmem:[#allocation2 + $0x158] ss:$24 sps:$4 sm:$0xff]  }
  0x8a   :  { %656 = vmatprep.subr.bf16.mxu1 %v10646_v13  ;;  %v10705_v33 = vld [vmem:[#allocation2 + $0x184] ss:$24 sps:$4 sm:$0x3f]   ;;  %7903 = vmatprep.mubr.msk.bf16.mxu0 %vm519_vm0, %v10699_v30  ;;  %v9085_v35 = vld [vmem:[#allocation2 + $0x180] ss:$24 sps:$4 sm:$0x3f]  }
  0x8b   :  { %v10707_v34 = vld [vmem:[#allocation2 + $0x18c] ss:$24 sps:$4 sm:$0x3f]   ;;  %7910 = vmatprep.mubr.msk.bf16.mxu1 %vm519_vm0, %v10699_v30  ;;  %v9086_v36 = vld [vmem:[#allocation2 + $0x188] ss:$24 sps:$4 sm:$0x3f]  }
  0x8c   :  { %564 = vmatpush1.bf16.msra.mxu0 %v10648_v14  ;;  %v10724_v37 = vsel %vm538_vm1, %v9085_v35, 0  ;;  %v10727_v38 = vsel %vm538_vm1, %v9086_v36, 0  ;;  %v10729_v39 = vld [vmem:[#allocation2 + $0x14] ss:$24 sps:$4 sm:$0xff]   ;;  %v10734_v40 = vld [vmem:[%s11819_s0] ss:$8 sps:$4 sm:$0xff]  }
  0x8d   :  { %657 = vmatpush1.bf16.msra.mxu1 %v10652_v15  ;;  %565 = vmatprep.subr.bf16.mxu0 %v10654_v16  ;;  %v10738_v41 = vld [vmem:[#allocation2 + $0x10] ss:$24 sps:$4 sm:$0xff]   ;;  %v10747_v43 = vld [vmem:[%s11819_s0 + $0x14] ss:$8 sps:$4 sm:$0xff]   ;;  %v10753_v44 = vld [vmem:[#allocation2 + $0x40] ss:$24 sps:$4 sm:$0xff]  }
  0x8e   :  { %658 = vmatprep.subr.bf16.mxu1 %v10658_v17  ;;  %v10757_v45 = vld [vmem:[#allocation2 + $0x74] ss:$24 sps:$4 sm:$0xff]   ;;  %v10766_v46 = vld [vmem:[%s11819_s0 + $0x10] ss:$8 sps:$4 sm:$0xff]   ;;  %v10779_v49 = vld [vmem:[#allocation2 + $0xa4] ss:$24 sps:$4 sm:$0xff]  }
  0x8f   :  { %v10770_v47 = vld [vmem:[#allocation2 + $0x70] ss:$24 sps:$4 sm:$0xff]   ;;  %v10777_v48 = vld [vmem:[%s11819_s0 + $0x24] ss:$8 sps:$4 sm:$0xff]   ;;  %v10785_v50 = vld [vmem:[#allocation2 + $0xa0] ss:$24 sps:$4 sm:$0xff]  }
  0x90   :  { %566 = vmatpush1.bf16.msra.mxu0 %v10660_v18  ;;  %v10791_v51 = vld [vmem:[#allocation2 + $0xd4] ss:$24 sps:$4 sm:$0xff]   ;;  %v10796_v52 = vld [vmem:[%s11819_s0 + $0x20] ss:$8 sps:$4 sm:$0xff]   ;;  %v10809_v55 = vld [vmem:[#allocation2 + $0x104] ss:$24 sps:$4 sm:$0xff]  }
  0x91   :  { %659 = vmatpush1.bf16.msra.mxu1 %v10662_v19  ;;  %567 = vmatprep.subr.bf16.mxu0 %v10666_v20  ;;  %v10800_v53 = vld [vmem:[#allocation2 + $0xd0] ss:$24 sps:$4 sm:$0xff]   ;;  %v10805_v54 = vld [vmem:[%s11819_s0 + $0x34] ss:$8 sps:$4 sm:$0xff]   ;;  %v10815_v56 = vld [vmem:[#allocation2 + $0x100] ss:$24 sps:$4 sm:$0xff]  }
  0x92   :  { %660 = vmatprep.subr.bf16.mxu1 %v10670_v21  ;;  %v10821_v57 = vld [vmem:[#allocation2 + $0x134] ss:$24 sps:$4 sm:$0xff]   ;;  %v10828_v58 = vld [vmem:[%s11819_s0 + $0x30] ss:$8 sps:$4 sm:$0xff]   ;;  %v10839_v61 = vld [vmem:[#allocation2 + $0x164] ss:$24 sps:$4 sm:$0xff]  }
  0x93   :  { %v10835_v59 = vld [vmem:[%s11819_s0 + $0x44] ss:$8 sps:$4 sm:$0xff]   ;;  %v10837_v60 = vld [vmem:[#allocation2 + $0x130] ss:$24 sps:$4 sm:$0xff]   ;;  %v10847_v62 = vld [vmem:[#allocation2 + $0x160] ss:$24 sps:$4 sm:$0xff]  }
  0x94   :  { %568 = vmatpush1.bf16.msra.mxu0 %v10672_v22  ;;  %v10853_v63 = vld [vmem:[#allocation2 + $0x194] ss:$24 sps:$4 sm:$0x3f]   ;;  %vm1417_vm2 = vcmask 1043456   ;;  %vm7814_vm3 = vcmask 80896  }
  0x95   :  { %661 = vmatpush1.bf16.msra.mxu1 %v10676_v23  ;;  %569 = vmatprep.subr.bf16.mxu0 %v10678_v24  ;;  %v9174_v35 = vld [vmem:[#allocation6 + $0x80] ss:$16 sps:$4 sm:$0xff]   ;;  %v9177_v36 = vld [vmem:[#allocation6 + $0x88] ss:$16 sps:$4 sm:$0xff]  }
  0x96   :  { %662 = vmatprep.subr.bf16.mxu1 %v10682_v25 }
  0x98   :  { %570 = vmatpush1.bf16.msra.mxu0 %v10684_v26 }
  0x99   :  { %663 = vmatpush1.bf16.msra.mxu1 %v10686_v27  ;;  %571 = vmatprep.subr.bf16.mxu0 %v10690_v28 }
  0x9a   :  { %664 = vmatprep.subr.bf16.mxu1 %v10694_v29 }
  0x9c   :  { %572 = vmatpush1.bf16.msra.mxu0 %v10701_v31 }
  0x9d   :  { %665 = vmatpush1.bf16.msra.mxu1 %v10703_v32  ;;  %7902 = vmatprep.subr.msk.bf16.mxu0 %vm538_vm1, %v10705_v33 }
  0x9e   :  { %7909 = vmatprep.subr.msk.bf16.mxu1 %vm538_vm1, %v10707_v34 }
  0xa0   :  { %574 = vmatpush1.bf16.msra.mxu0 %v10724_v37 }
  0xa1   :  { %667 = vmatpush1.bf16.msra.mxu1 %v10727_v38  ;;  %743 = vmatprep.subr.bf16.mxu0 %v10729_v39 }
  0xa2   :  { %908 = vmatprep.subr.bf16.mxu1 %v10610_v0  ;;  %v9131_v0 = vld [vmem:[#allocation2 + $0x190] ss:$24 sps:$4 sm:$0x3f]  }
  0xa3   :  { %590 = vmatmul.mubr.bf16.vlgmr.msra.gmra.mrb[0].mxu0 %v10734_v40 }
  0xa4   :  { %683 = vmatmul.mubr.bf16.vlgmr.msra.gmra.mrb[0].mxu1 %v10734_v40  ;;  %744 = vmatpush1.bf16.msra.mxu0 %v10738_v41 }
  0xa5   :  { %909 = vmatpush1.bf16.msra.mxu1 %v10615_v2  ;;  %745 = vmatprep.subr.bf16.mxu0 %v10742_v42  ;;  %v10858_v2 = vld [vmem:[%s11819_s0 + $0x40] ss:$8 sps:$4 sm:$0xff]  }
  0xa6   :  { %910 = vmatprep.subr.bf16.mxu1 %v10620_v4  ;;  %7904 = vmatprep.mubr.msk.bf16.mxu0 %vm519_vm0, %v10747_v43  ;;  %v10867_v4 = vld [vmem:[%s11819_s0 + $0x54] ss:$8 sps:$4 sm:$0xff]  }
  0xa7   :  { %7911 = vmatprep.mubr.msk.bf16.mxu1 %vm519_vm0, %v10747_v43 }
  0xa8   :  { %746 = vmatpush1.bf16.msra.mxu0 %v10753_v44 }
  0xa9   :  { %911 = vmatpush1.bf16.msra.mxu1 %v10626_v6  ;;  %747 = vmatprep.subr.bf16.mxu0 %v10757_v45  ;;  %v10876_v6 = vsel %vm538_vm1, %v9131_v0, 0  ;;  %v9219_v0 = vld [vmem:[#allocation6 + $0x168] ss:$16 sps:$4 sm:$0xff]  }
  0xaa   :  { %912 = vmatprep.subr.bf16.mxu1 %v10632_v8  ;;  %v10887_v8 = vld [vmem:[%s11819_s0 + $0x50] ss:$8 sps:$4 sm:$0xff]  }
  0xab   :  { %600 = vmatmul.mubr.bf16.gmra.mrb[4].mxu0 %v10766_v46 }
  0xac   :  { %693 = vmatmul.mubr.bf16.gmra.mrb[4].mxu1 %v10766_v46  ;;  %748 = vmatpush1.bf16.msra.mxu0 %v10770_v47 }
  0xad   :  { %913 = vmatpush1.bf16.msra.mxu1 %v10636_v10  ;;  %7905 = vmatprep.mubr.msk.bf16.mxu0 %vm519_vm0, %v10777_v48  ;;  %v10894_v10 = vld [vmem:[%s11820_s1 + $0x4] ss:$8 sps:$4 sm:$0xff]  }
  0xae   :  { %7912 = vmatprep.mubr.msk.bf16.mxu1 %vm519_vm0, %v10777_v48  ;;  %749 = vmatprep.subr.bf16.mxu0 %v10779_v49 }
  0xaf   :  { %914 = vmatprep.subr.bf16.mxu1 %v10642_v12  ;;  %v10907_v12 = vld [vmem:[%s11820_s1] ss:$8 sps:$4 sm:$0xff]  }
  0xb0   :  { %750 = vmatpush1.bf16.msra.mxu0 %v10785_v50 }
  0xb1   :  { %915 = vmatpush1.bf16.msra.mxu1 %v10648_v14  ;;  %751 = vmatprep.subr.bf16.mxu0 %v10791_v51  ;;  %v10923_v14 = vld [vmem:[%s11820_s1 + $0x10] ss:$8 sps:$4 sm:$0xff]  }
  0xb2   :  { %916 = vmatprep.subr.bf16.mxu1 %v10654_v16  ;;  %v9149_v16 = vld [vmem:[%s11820_s1 + $0x50] ss:$8 sps:$4 sm:$0xff]  }
  0xb3   :  { %610 = vmatmul.mubr.bf16.gmra.mrb[8].mxu0 %v10796_v52 }
  0xb4   :  { %703 = vmatmul.mubr.bf16.gmra.mrb[8].mxu1 %v10796_v52  ;;  %7906 = vmatprep.mubr.msk.bf16.mxu0 %vm519_vm0, %v10805_v54 }
  0xb5   :  { %7913 = vmatprep.mubr.msk.bf16.mxu1 %vm519_vm0, %v10805_v54  ;;  %752 = vmatpush1.bf16.msra.mxu0 %v10800_v53 }
  0xb6   :  { %917 = vmatpush1.bf16.msra.mxu1 %v10660_v18  ;;  %753 = vmatprep.subr.bf16.mxu0 %v10809_v55  ;;  %v9152_v18 = vld [vmem:[#allocation6 + $0x4] ss:$16 sps:$4 sm:$0xff]  }
  0xb7   :  { %918 = vmatprep.subr.bf16.mxu1 %v10666_v20  ;;  %v9155_v20 = vld [vmem:[#allocation6 + $0xc] ss:$16 sps:$4 sm:$0xff]  }
  0xb9   :  { %754 = vmatpush1.bf16.msra.mxu0 %v10815_v56 }
  0xba   :  { %919 = vmatpush1.bf16.msra.mxu1 %v10672_v22  ;;  %755 = vmatprep.subr.bf16.mxu0 %v10821_v57  ;;  %v9161_v22 = vld [vmem:[#allocation6 + $0x2c] ss:$16 sps:$4 sm:$0xff]  }
  0xbb   :  { %920 = vmatprep.subr.bf16.mxu1 %v10678_v24  ;;  %620 = vmatmul.mubr.bf16.gmra.mrb[12].mxu0 %v10828_v58  ;;  %v9159_v24 = vld [vmem:[#allocation6 + $0x28] ss:$16 sps:$4 sm:$0xff]  }
  0xbc   :  { %713 = vmatmul.mubr.bf16.gmra.mrb[12].mxu1 %v10828_v58  ;;  %7907 = vmatprep.mubr.msk.bf16.mxu0 %vm519_vm0, %v10835_v59 }
  0xbd   :  { %7914 = vmatprep.mubr.msk.bf16.mxu1 %vm519_vm0, %v10835_v59  ;;  %756 = vmatpush1.bf16.msra.mxu0 %v10837_v60 }
  0xbe   :  { %921 = vmatpush1.bf16.msra.mxu1 %v10684_v26  ;;  %757 = vmatprep.subr.bf16.mxu0 %v10839_v61  ;;  %v9167_v26 = vld [vmem:[#allocation6 + $0x4c] ss:$16 sps:$4 sm:$0xff]  }
  0xbf   :  { %922 = vmatprep.subr.bf16.mxu1 %v10690_v28  ;;  %v9165_v28 = vld [vmem:[#allocation6 + $0x48] ss:$16 sps:$4 sm:$0xff]  }
  0xc1   :  { %758 = vmatpush1.bf16.msra.mxu0 %v10847_v62 }
  0xc2   :  { %923 = vmatpush1.bf16.msra.mxu1 %v10701_v31  ;;  %7916 = vmatprep.subr.msk.bf16.mxu0 %vm538_vm1, %v10853_v63  ;;  %v9168_v31 = vld [vmem:[#allocation6 + $0x60] ss:$16 sps:$4 sm:$0xff]  }
  0xc3   :  { %7935 = vmatprep.subr.msk.bf16.mxu1 %vm538_vm1, %v10705_v33  ;;  %630 = vmatmul.mubr.bf16.gmra.mrb[16].mxu0 %v10858_v2  ;;  %v9176_v33 = vld [vmem:[#allocation6 + $0x84] ss:$16 sps:$4 sm:$0xff]  }
  0xc4   :  { %723 = vmatmul.mubr.bf16.gmra.mrb[16].mxu1 %v10858_v2  ;;  %7908 = vmatprep.mubr.msk.bf16.mxu0 %vm519_vm0, %v10867_v4 }
  0xc5   :  { %7915 = vmatprep.mubr.msk.bf16.mxu1 %vm519_vm0, %v10867_v4  ;;  %760 = vmatpush1.bf16.msra.mxu0 %v10876_v6 }
  0xc6   :  { %925 = vmatpush1.bf16.msra.mxu1 %v10724_v37  ;;  %1001 = vmatprep.subr.bf16.mxu0 %v10612_v1  ;;  %v10912_v1 = vld [vmem:[%s11820_s1 + $0x14] ss:$8 sps:$4 sm:$0xff]   ;;  %v9182_v37 = vld [vmem:[#allocation6 + $0xa4] ss:$16 sps:$4 sm:$0xff]  }
  0xc7   :  { %1094 = vmatprep.subr.bf16.mxu1 %v10729_v39  ;;  %v9180_v39 = vld [vmem:[#allocation6 + $0xa0] ss:$16 sps:$4 sm:$0xff]  }
  0xcb   :  { %640 = vmatmul.mubr.bf16.gmra.mrb[20].mxu0 %v10887_v8 }
  0xcc   :  { %733 = vmatmul.mubr.bf16.gmra.mrb[20].mxu1 %v10887_v8  ;;  %7917 = vmatprep.mubr.msk.bf16.mxu0 %vm519_vm0, %v10699_v30  ;;  %v9173_v30 = vld [vmem:[#allocation6 + $0x6c] ss:$16 sps:$4 sm:$0xff]  }
  0xcd   :  { %7936 = vmatprep.mubr.msk.bf16.mxu1 %vm519_vm0, %v10894_v10 }
  0xd3   :  { %776 = vmatmul.mubr.bf16.vlgmr.msra.gmra.mrb[24].mxu0 %v10734_v40  ;;  %v9183_v40 = vld [vmem:[#allocation6 + $0xa8] ss:$16 sps:$4 sm:$0xff]  }
  0xd4   :  { %941 = vmatmul.mubr.bf16.vlgmr.msra.gmra.mrb[24].mxu1 %v10907_v12  ;;  %1002 = vmatpush1.bf16.msra.mxu0 %v10617_v3  ;;  %v10932_v3 = vld [vmem:[%s11820_s1 + $0x24] ss:$8 sps:$4 sm:$0xff]  }
  0xd5   :  { %1095 = vmatpush1.bf16.msra.mxu1 %v10738_v41  ;;  %1003 = vmatprep.subr.bf16.mxu0 %v10624_v5  ;;  %v9140_v5 = vld [vmem:[%s11820_s1 + $0x20] ss:$8 sps:$4 sm:$0xff]  }
  0xd6   :  { %1096 = vmatprep.subr.bf16.mxu1 %v10742_v42  ;;  %7918 = vmatprep.mubr.msk.bf16.mxu0 %vm519_vm0, %v10747_v43  ;;  %v9188_v41 = vld [vmem:[#allocation6 + $0xc4] ss:$16 sps:$4 sm:$0xff]   ;;  %v9191_v42 = vld [vmem:[#allocation6 + $0xcc] ss:$16 sps:$4 sm:$0xff]   ;;  %v9186_v43 = vld [vmem:[#allocation6 + $0xc0] ss:$16 sps:$4 sm:$0xff]  }
  0xd7   :  { %7937 = vmatprep.mubr.msk.bf16.mxu1 %vm519_vm0, %v10912_v1 }
  0xd8   :  { %1004 = vmatpush1.bf16.msra.mxu0 %v10629_v7  ;;  %v9141_v7 = vld [vmem:[%s11820_s1 + $0x34] ss:$8 sps:$4 sm:$0xff]  }
  0xd9   :  { %1097 = vmatpush1.bf16.msra.mxu1 %v10753_v44  ;;  %1005 = vmatprep.subr.bf16.mxu0 %v10634_v9  ;;  %v9143_v9 = vld [vmem:[%s11820_s1 + $0x30] ss:$8 sps:$4 sm:$0xff]   ;;  %v9189_v44 = vld [vmem:[#allocation6 + $0xc8] ss:$16 sps:$4 sm:$0xff]  }
  0xda   :  { %1098 = vmatprep.subr.bf16.mxu1 %v10757_v45  ;;  %v9194_v45 = vld [vmem:[#allocation6 + $0xe4] ss:$16 sps:$4 sm:$0xff]  }
  0xdb   :  { %786 = vmatmul.mubr.bf16.gmra.mrb[28].mxu0 %v10766_v46  ;;  %v9197_v46 = vld [vmem:[#allocation6 + $0xec] ss:$16 sps:$4 sm:$0xff]  }
  0xdc   :  { %951 = vmatmul.mubr.bf16.gmra.mrb[28].mxu1 %v10923_v14  ;;  %1006 = vmatpush1.bf16.msra.mxu0 %v10638_v11  ;;  %v9144_v11 = vld [vmem:[%s11820_s1 + $0x44] ss:$8 sps:$4 sm:$0xff]  }
  0xdd   :  { %1099 = vmatpush1.bf16.msra.mxu1 %v10770_v47  ;;  %7919 = vmatprep.mubr.msk.bf16.mxu0 %vm519_vm0, %v10777_v48  ;;  %v9192_v47 = vld [vmem:[#allocation6 + $0xe0] ss:$16 sps:$4 sm:$0xff]   ;;  %v9195_v48 = vld [vmem:[#allocation6 + $0xe8] ss:$16 sps:$4 sm:$0xff]  }
  0xde   :  { %7938 = vmatprep.mubr.msk.bf16.mxu1 %vm519_vm0, %v10932_v3  ;;  %1007 = vmatprep.subr.bf16.mxu0 %v10646_v13  ;;  %v9146_v13 = vld [vmem:[%s11820_s1 + $0x40] ss:$8 sps:$4 sm:$0xff]  }
  0xdf   :  { %1100 = vmatprep.subr.bf16.mxu1 %v10779_v49  ;;  %v9200_v49 = vld [vmem:[#allocation6 + $0x104] ss:$16 sps:$4 sm:$0xff]  }
  0xe0   :  { %1008 = vmatpush1.bf16.msra.mxu0 %v10652_v15  ;;  %v9147_v15 = vld [vmem:[%s11820_s1 + $0x54] ss:$8 sps:$4 sm:$0xff]  }
  0xe1   :  { %1101 = vmatpush1.bf16.msra.mxu1 %v10785_v50  ;;  %1009 = vmatprep.subr.bf16.mxu0 %v10658_v17  ;;  %v9150_v17 = vld [vmem:[#allocation6] ss:$16 sps:$4 sm:$0xff]   ;;  %v9203_v50 = vld [vmem:[#allocation6 + $0x10c] ss:$16 sps:$4 sm:$0xff]  }
  0xe2   :  { %1102 = vmatprep.subr.bf16.mxu1 %v10791_v51  ;;  %v9198_v51 = vld [vmem:[#allocation6 + $0x100] ss:$16 sps:$4 sm:$0xff]  }
  0xe3   :  { %796 = vmatmul.mubr.bf16.gmra.mrb[32].mxu0 %v10796_v52  ;;  %v9201_v52 = vld [vmem:[#allocation6 + $0x108] ss:$16 sps:$4 sm:$0xff]  }
  0xe4   :  { %961 = vmatmul.mubr.bf16.gmra.mrb[32].mxu1 %v9140_v5  ;;  %7920 = vmatprep.mubr.msk.bf16.mxu0 %vm519_vm0, %v10805_v54  ;;  %v9209_v54 = vld [vmem:[#allocation6 + $0x12c] ss:$16 sps:$4 sm:$0xff]  }
  0xe5   :  { %7939 = vmatprep.mubr.msk.bf16.mxu1 %vm519_vm0, %v9141_v7  ;;  %1010 = vmatpush1.bf16.msra.mxu0 %v10662_v19  ;;  %v9153_v19 = vld [vmem:[#allocation6 + $0x8] ss:$16 sps:$4 sm:$0xff]  }
  0xe6   :  { %1103 = vmatpush1.bf16.msra.mxu1 %v10800_v53  ;;  %1011 = vmatprep.subr.bf16.mxu0 %v10670_v21  ;;  %v9158_v21 = vld [vmem:[#allocation6 + $0x24] ss:$16 sps:$4 sm:$0xff]  }
  0xe7   :  { %1104 = vmatprep.subr.bf16.mxu1 %v10809_v55  ;;  %v9206_v53 = vld [vmem:[#allocation6 + $0x124] ss:$16 sps:$4 sm:$0xff]   ;;  %v9204_v55 = vld [vmem:[#allocation6 + $0x120] ss:$16 sps:$4 sm:$0xff]  }
  0xe9   :  { %1012 = vmatpush1.bf16.msra.mxu0 %v10676_v23  ;;  %v9156_v23 = vld [vmem:[#allocation6 + $0x20] ss:$16 sps:$4 sm:$0xff]  }
  0xea   :  { %1105 = vmatpush1.bf16.msra.mxu1 %v10815_v56  ;;  %1013 = vmatprep.subr.bf16.mxu0 %v10682_v25  ;;  %v9164_v25 = vld [vmem:[#allocation6 + $0x44] ss:$16 sps:$4 sm:$0xff]   ;;  %v9207_v56 = vld [vmem:[#allocation6 + $0x128] ss:$16 sps:$4 sm:$0xff]  }
  0xeb   :  { %1106 = vmatprep.subr.bf16.mxu1 %v10821_v57  ;;  %806 = vmatmul.mubr.bf16.gmra.mrb[36].mxu0 %v10828_v58  ;;  %v9212_v57 = vld [vmem:[#allocation6 + $0x144] ss:$16 sps:$4 sm:$0xff]   ;;  %v9215_v58 = vld [vmem:[#allocation6 + $0x14c] ss:$16 sps:$4 sm:$0xff]  }
  0xec   :  { %971 = vmatmul.mubr.bf16.gmra.mrb[36].mxu1 %v9143_v9  ;;  %7921 = vmatprep.mubr.msk.bf16.mxu0 %vm519_vm0, %v10835_v59  ;;  %v9210_v59 = vld [vmem:[#allocation6 + $0x140] ss:$16 sps:$4 sm:$0xff]  }
  0xed   :  { %7940 = vmatprep.mubr.msk.bf16.mxu1 %vm519_vm0, %v9144_v11  ;;  %1014 = vmatpush1.bf16.msra.mxu0 %v10686_v27  ;;  %v9162_v27 = vld [vmem:[#allocation6 + $0x40] ss:$16 sps:$4 sm:$0xff]  }
  0xee   :  { %1107 = vmatpush1.bf16.msra.mxu1 %v10837_v60  ;;  %1015 = vmatprep.subr.bf16.mxu0 %v10694_v29  ;;  %v9170_v29 = vld [vmem:[#allocation6 + $0x64] ss:$16 sps:$4 sm:$0xff]   ;;  %v9213_v60 = vld [vmem:[#allocation6 + $0x148] ss:$16 sps:$4 sm:$0xff]  }
  0xef   :  { %1108 = vmatprep.subr.bf16.mxu1 %v10839_v61  ;;  %v9218_v61 = vld [vmem:[#allocation6 + $0x164] ss:$16 sps:$4 sm:$0xff]  }
  0xf1   :  { %1016 = vmatpush1.bf16.msra.mxu0 %v10703_v32  ;;  %v9171_v32 = vld [vmem:[#allocation6 + $0x68] ss:$16 sps:$4 sm:$0xff]  }
  0xf2   :  { %1109 = vmatpush1.bf16.msra.mxu1 %v10847_v62  ;;  %7942 = vmatprep.subr.msk.bf16.mxu0 %vm538_vm1, %v10707_v34  ;;  %v9179_v34 = vld [vmem:[#allocation6 + $0x8c] ss:$16 sps:$4 sm:$0xff]  }
  0xf3   :  { %7949 = vmatprep.subr.msk.bf16.mxu1 %vm538_vm1, %v10853_v63  ;;  %816 = vmatmul.mubr.bf16.gmra.mrb[40].mxu0 %v10858_v2  ;;  %v9221_v62 = vld [vmem:[#allocation6 + $0x16c] ss:$16 sps:$4 sm:$0xff]   ;;  %v9216_v63 = vld [vmem:[#allocation6 + $0x160] ss:$16 sps:$4 sm:$0xff]   ;;  %v9224_v2 = vld [vmem:[#allocation6 + $0x184] ss:$16 sps:$4 sm:$0xff]  }
  0xf4   :  { %981 = vmatmul.mubr.bf16.gmra.mrb[40].mxu1 %v9146_v13  ;;  %7922 = vmatprep.mubr.msk.bf16.mxu0 %vm519_vm0, %v10867_v4  ;;  %v9227_v4 = vld [vmem:[#allocation6 + $0x18c] ss:$16 sps:$4 sm:$0xff]  }
  0xf5   :  { %7941 = vmatprep.mubr.msk.bf16.mxu1 %vm519_vm0, %v9147_v15  ;;  %1018 = vmatpush1.bf16.msra.mxu0 %v10727_v38  ;;  %v9185_v38 = vld [vmem:[#allocation6 + $0xac] ss:$16 sps:$4 sm:$0xff]  }
  0xf6   :  { %1111 = vmatpush1.bf16.msra.mxu1 %v10876_v6  ;;  %4349 = vmatprep.subr.bf16.mxu0 %v9152_v18  ;;  %v9222_v6 = vld [vmem:[#allocation6 + $0x180] ss:$16 sps:$4 sm:$0xff]   ;;  %v9251_v18 = vld [vmem:[#allocation6 + $0x20c] ss:$16 sps:$4 sm:$0xff]  }
  0xf7   :  { %4933 = vmatprep.subr.bf16.mxu1 %v9155_v20 }
  0xfb   :  { %826 = vmatmul.mubr.bf16.gmra.mrb[44].mxu0 %v10887_v8  ;;  %v9225_v8 = vld [vmem:[#allocation6 + $0x188] ss:$16 sps:$4 sm:$0xff]  }
  0xfc   :  { %991 = vmatmul.mubr.bf16.gmra.mrb[44].mxu1 %v9149_v16  ;;  %7943 = vmatprep.mubr.msk.bf16.mxu0 %vm519_vm0, %v10894_v10 }
  0xfd   :  { %7950 = vmatprep.mubr.msk.bf16.mxu1 %vm519_vm0, %v10894_v10  ;;  %v9230_v10 = vld [vmem:[#allocation6 + $0x1a4] ss:$16 sps:$4 sm:$0xff]  }
 0x103   :  { %1034 = vmatmul.mubr.bf16.vlgmr.msra.gmra.mrb[48].mxu0 %v10907_v12 }
 0x104   :  { %1127 = vmatmul.mubr.bf16.vlgmr.msra.gmra.mrb[48].mxu1 %v10907_v12  ;;  %7944 = vmatprep.mubr.msk.bf16.mxu0 %vm519_vm0, %v10912_v1  ;;  %v9233_v12 = vld [vmem:[#allocation6 + $0x1ac] ss:$16 sps:$4 sm:$0xff]  }
 0x105   :  { %7951 = vmatprep.mubr.msk.bf16.mxu1 %vm519_vm0, %v10912_v1  ;;  %4350 = vmatpush1.bf16.msra.mxu0 %v9150_v17  ;;  %v9228_v1 = vld [vmem:[#allocation6 + $0x1a0] ss:$16 sps:$4 sm:$0xff]   ;;  %v9248_v17 = vld [vmem:[#allocation6 + $0x204] ss:$16 sps:$4 sm:$0xff]  }
 0x106   :  { %4934 = vmatpush1.bf16.msra.mxu1 %v9153_v19  ;;  %4351 = vmatprep.subr.bf16.mxu0 %v9158_v21 }
 0x107   :  { %4935 = vmatprep.subr.bf16.mxu1 %v9161_v22 }
 0x109   :  { %4352 = vmatpush1.bf16.msra.mxu0 %v9156_v23 }
 0x10a   :  { %4936 = vmatpush1.bf16.msra.mxu1 %v9159_v24  ;;  %4353 = vmatprep.subr.bf16.mxu0 %v9164_v25 }
 0x10b   :  { %1044 = vmatmul.mubr.bf16.gmra.mrb[52].mxu0 %v10923_v14  ;;  %4937 = vmatprep.subr.bf16.mxu1 %v9167_v26 }
 0x10c   :  { %1137 = vmatmul.mubr.bf16.gmra.mrb[52].mxu1 %v10923_v14  ;;  %7945 = vmatprep.mubr.msk.bf16.mxu0 %vm519_vm0, %v10932_v3  ;;  %v9231_v14 = vld [vmem:[#allocation6 + $0x1a8] ss:$16 sps:$4 sm:$0xff]  }
 0x10d   :  { %7952 = vmatprep.mubr.msk.bf16.mxu1 %vm519_vm0, %v10932_v3  ;;  %4354 = vmatpush1.bf16.msra.mxu0 %v9162_v27  ;;  %v9236_v3 = vld [vmem:[#allocation6 + $0x1c4] ss:$16 sps:$4 sm:$0xff]  }
 0x10e   :  { %4938 = vmatpush1.bf16.msra.mxu1 %v9165_v28  ;;  %4355 = vmatprep.subr.bf16.mxu0 %v9170_v29 }
 0x10f   :  { %4939 = vmatprep.subr.bf16.mxu1 %v9173_v30 }
 0x111   :  { %4356 = vmatpush1.bf16.msra.mxu0 %v9168_v31 }
 0x112   :  { %4940 = vmatpush1.bf16.msra.mxu1 %v9171_v32  ;;  %4357 = vmatprep.subr.bf16.mxu0 %v9176_v33 }
 0x113   :  { %1054 = vmatmul.mubr.bf16.gmra.mrb[56].mxu0 %v9140_v5  ;;  %4941 = vmatprep.subr.bf16.mxu1 %v9179_v34 }
 0x114   :  { %1147 = vmatmul.mubr.bf16.gmra.mrb[56].mxu1 %v9140_v5  ;;  %7946 = vmatprep.mubr.msk.bf16.mxu0 %vm519_vm0, %v9141_v7  ;;  %v9239_v5 = vld [vmem:[#allocation6 + $0x1cc] ss:$16 sps:$4 sm:$0xff]  }
 0x115   :  { %7953 = vmatprep.mubr.msk.bf16.mxu1 %vm519_vm0, %v9141_v7  ;;  %4358 = vmatpush1.bf16.msra.mxu0 %v9174_v35  ;;  %v9234_v7 = vld [vmem:[#allocation6 + $0x1c0] ss:$16 sps:$4 sm:$0xff]  }
 0x116   :  { %4942 = vmatpush1.bf16.msra.mxu1 %v9177_v36  ;;  %4359 = vmatprep.subr.bf16.mxu0 %v9182_v37 }
 0x117   :  { %4943 = vmatprep.subr.bf16.mxu1 %v9185_v38 }
 0x119   :  { %4360 = vmatpush1.bf16.msra.mxu0 %v9180_v39 }
 0x11a   :  { %4944 = vmatpush1.bf16.msra.mxu1 %v9183_v40  ;;  %4361 = vmatprep.subr.bf16.mxu0 %v9188_v41 }
 0x11b   :  { %1064 = vmatmul.mubr.bf16.gmra.mrb[60].mxu0 %v9143_v9  ;;  %4945 = vmatprep.subr.bf16.mxu1 %v9191_v42 }
 0x11c   :  { %1157 = vmatmul.mubr.bf16.gmra.mrb[60].mxu1 %v9143_v9  ;;  %7947 = vmatprep.mubr.msk.bf16.mxu0 %vm519_vm0, %v9144_v11  ;;  %v9237_v9 = vld [vmem:[#allocation6 + $0x1c8] ss:$16 sps:$4 sm:$0xff]  }
 0x11d   :  { %7954 = vmatprep.mubr.msk.bf16.mxu1 %vm519_vm0, %v9144_v11  ;;  %4362 = vmatpush1.bf16.msra.mxu0 %v9186_v43  ;;  %v9242_v11 = vld [vmem:[#allocation6 + $0x1e4] ss:$16 sps:$4 sm:$0xff]  }
 0x11e   :  { %4946 = vmatpush1.bf16.msra.mxu1 %v9189_v44  ;;  %4363 = vmatprep.subr.bf16.mxu0 %v9194_v45 }
 0x11f   :  { %4947 = vmatprep.subr.bf16.mxu1 %v9197_v46 }
 0x121   :  { %4364 = vmatpush1.bf16.msra.mxu0 %v9192_v47 }
 0x122   :  { %4948 = vmatpush1.bf16.msra.mxu1 %v9195_v48  ;;  %4365 = vmatprep.subr.bf16.mxu0 %v9200_v49 }
 0x123   :  { %1074 = vmatmul.mubr.bf16.gmra.mrb[64].mxu0 %v9146_v13  ;;  %4949 = vmatprep.subr.bf16.mxu1 %v9203_v50 }
 0x124   :  { %1167 = vmatmul.mubr.bf16.gmra.mrb[64].mxu1 %v9146_v13  ;;  %7948 = vmatprep.mubr.msk.bf16.mxu0 %vm519_vm0, %v9147_v15  ;;  %v9245_v13 = vld [vmem:[#allocation6 + $0x1ec] ss:$16 sps:$4 sm:$0xff]  }
 0x125   :  { %7955 = vmatprep.mubr.msk.bf16.mxu1 %vm519_vm0, %v9147_v15  ;;  %4366 = vmatpush1.bf16.msra.mxu0 %v9198_v51  ;;  %v9240_v15 = vld [vmem:[#allocation6 + $0x1e0] ss:$16 sps:$4 sm:$0xff]  }
 0x126   :  { %4950 = vmatpush1.bf16.msra.mxu1 %v9201_v52  ;;  %4367 = vmatprep.subr.bf16.mxu0 %v9206_v53 }
 0x127   :  { %4951 = vmatprep.subr.bf16.mxu1 %v9209_v54 }
 0x129   :  { %4368 = vmatpush1.bf16.msra.mxu0 %v9204_v55 }
 0x12a   :  { %4952 = vmatpush1.bf16.msra.mxu1 %v9207_v56  ;;  %4369 = vmatprep.subr.bf16.mxu0 %v9212_v57 }
 0x12b   :  { %1084 = vmatmul.mubr.bf16.gmra.mrb[68].mxu0 %v9149_v16  ;;  %4953 = vmatprep.subr.bf16.mxu1 %v9215_v58 }
 0x12c   :  { %1177 = vmatmul.mubr.bf16.gmra.mrb[68].mxu1 %v9149_v16  ;;  %v9243_v16 = vld [vmem:[#allocation6 + $0x1e8] ss:$16 sps:$4 sm:$0xff]  }
 0x12d   :  { %4370 = vmatpush1.bf16.msra.mxu0 %v9210_v59 }
 0x12e   :  { %4954 = vmatpush1.bf16.msra.mxu1 %v9213_v60  ;;  %4371 = vmatprep.subr.bf16.mxu0 %v9218_v61 }
 0x12f   :  { %4955 = vmatprep.subr.bf16.mxu1 %v9221_v62 }
 0x131   :  { %4372 = vmatpush1.bf16.msra.mxu0 %v9216_v63 }
 0x132   :  { %4956 = vmatpush1.bf16.msra.mxu1 %v9219_v0  ;;  %4373 = vmatprep.subr.bf16.mxu0 %v9224_v2 }
 0x133   :  { %4957 = vmatprep.subr.bf16.mxu1 %v9227_v4 }
 0x135   :  { %4374 = vmatpush1.bf16.msra.mxu0 %v9222_v6 }
 0x136   :  { %4958 = vmatpush1.bf16.msra.mxu1 %v9225_v8  ;;  %4375 = vmatprep.subr.bf16.mxu0 %v9230_v10 }
 0x137   :  { %4959 = vmatprep.subr.bf16.mxu1 %v9233_v12 }
 0x139   :  { %4376 = vmatpush1.bf16.msra.mxu0 %v9228_v1 }
 0x13a   :  { %4960 = vmatpush1.bf16.msra.mxu1 %v9231_v14  ;;  %4377 = vmatprep.subr.bf16.mxu0 %v9236_v3 }
 0x13b   :  { %4961 = vmatprep.subr.bf16.mxu1 %v9239_v5 }
 0x13d   :  { %4378 = vmatpush1.bf16.msra.mxu0 %v9234_v7 }
 0x13e   :  { %4962 = vmatpush1.bf16.msra.mxu1 %v9237_v9  ;;  %4379 = vmatprep.subr.bf16.mxu0 %v9242_v11 }
 0x13f   :  { %4963 = vmatprep.subr.bf16.mxu1 %v9245_v13 }
 0x141   :  { %4380 = vmatpush1.bf16.msra.mxu0 %v9240_v15 }
 0x142   :  { %4964 = vmatpush1.bf16.msra.mxu1 %v9243_v16  ;;  %4422 = vmatprep.subr.bf16.mxu0 %v9248_v17 }
 0x143   :  { %5006 = vmatprep.subr.bf16.mxu1 %v9251_v18 }
 0x176   :  { %v11028_v19 = vpop.f32.mrb[0].mxu0 }
 0x177   :  { %v11030_v20 = vpop.f32.mrb[0].mxu1  ;;  %v11032_v21 = vpop.f32.mrb[1].mxu0 }
 0x178   :  { %v11034_v22 = vpop.f32.mrb[1].mxu1  ;;  %v11036_v23 = vpop.f32.mrb[2].mxu0 }
 0x179   :  { %v11038_v24 = vpop.f32.mrb[2].mxu1  ;;  %v11040_v25 = vpop.f32.mrb[3].mxu0 }
 0x17a   :  { %v11042_v26 = vpop.f32.mrb[3].mxu1 }
 0x17e   :  { %v11044_v27 = vpop.f32.mrb[4].mxu0 }
 0x17f   :  { %v11046_v28 = vpop.f32.mrb[4].mxu1  ;;  %v11048_v29 = vpop.f32.mrb[5].mxu0 }
 0x180   :  { %v11050_v30 = vpop.f32.mrb[5].mxu1  ;;  %v11052_v31 = vpop.f32.mrb[6].mxu0 }
 0x181   :  { %v11054_v32 = vpop.f32.mrb[6].mxu1  ;;  %v11056_v33 = vpop.f32.mrb[7].mxu0 }
 0x182   :  { %v11058_v34 = vpop.f32.mrb[7].mxu1 }
 0x186   :  { %v11060_v35 = vpop.f32.mrb[8].mxu0 }
 0x187   :  { %v11062_v36 = vpop.f32.mrb[8].mxu1  ;;  %v11064_v37 = vpop.f32.mrb[9].mxu0 }
 0x188   :  { %v11066_v38 = vpop.f32.mrb[9].mxu1  ;;  %v11068_v39 = vpop.f32.mrb[10].mxu0 }
 0x189   :  { %11862 = vst [vmem:[#allocation17_spill] sm:$0xff] %v11068_v39  ;;  %v11070_v40 = vpop.f32.mrb[10].mxu1  ;;  %v11072_v41 = vpop.f32.mrb[11].mxu0 }
 0x18a   :  { %v11074_v42 = vpop.f32.mrb[11].mxu1 }
 0x18b   :  { %11863 = vst [vmem:[#allocation18_spill] sm:$0xff] %v11074_v42 }
 0x18e   :  { %v11076_v43 = vpop.f32.mrb[12].mxu0 }
 0x18f   :  { %11864 = vst [vmem:[#allocation19_spill] sm:$0xff] %v11076_v43  ;;  %v11078_v44 = vpop.f32.mrb[12].mxu1  ;;  %v11080_v45 = vpop.f32.mrb[13].mxu0 }
 0x190   :  { %11865 = vst [vmem:[#allocation20_spill] sm:$0xff] %v11078_v44  ;;  %11866 = vst [vmem:[#allocation21_spill] sm:$0xff] %v11080_v45  ;;  %v11082_v46 = vpop.f32.mrb[13].mxu1  ;;  %v11084_v47 = vpop.f32.mrb[14].mxu0 }
 0x191   :  { %11867 = vst [vmem:[#allocation22_spill] sm:$0xff] %v11082_v46  ;;  %11868 = vst [vmem:[#allocation23_spill] sm:$0xff] %v11084_v47  ;;  %v11086_v48 = vpop.f32.mrb[14].mxu1  ;;  %v11088_v49 = vpop.f32.mrb[15].mxu0 }
 0x192   :  { %11869 = vst [vmem:[#allocation24_spill] sm:$0xff] %v11086_v48  ;;  %v11090_v50 = vpop.f32.mrb[15].mxu1 }
 0x193   :  { %11870 = vst [vmem:[#allocation25_spill] sm:$0xff] %v11090_v50 }
 0x196   :  { %v11092_v51 = vpop.f32.mrb[16].mxu0 }
 0x197   :  { %11871 = vst [vmem:[#allocation26_spill] sm:$0xff] %v11092_v51  ;;  %v11094_v52 = vpop.f32.mrb[16].mxu1  ;;  %v11096_v53 = vpop.f32.mrb[17].mxu0 }
 0x198   :  { %11872 = vst [vmem:[#allocation27_spill] sm:$0xff] %v11094_v52  ;;  %v11098_v54 = vpop.f32.mrb[17].mxu1  ;;  %v11100_v55 = vpop.f32.mrb[18].mxu0 }
 0x199   :  { %11873 = vst [vmem:[#allocation28_spill] sm:$0xff] %v11098_v54  ;;  %11874 = vst [vmem:[#allocation29_spill] sm:$0xff] %v11100_v55  ;;  %v11102_v56 = vpop.f32.mrb[18].mxu1  ;;  %v11104_v57 = vpop.f32.mrb[19].mxu0 }
 0x19a   :  { %11875 = vst [vmem:[#allocation30_spill] sm:$0xff] %v11102_v56  ;;  %11876 = vst [vmem:[#allocation31_spill] sm:$0xff] %v11104_v57  ;;  %v11106_v58 = vpop.f32.mrb[19].mxu1 }
 0x19b   :  { %11877 = vst [vmem:[#allocation32_spill] sm:$0xff] %v11106_v58 }
 0x19e   :  { %v11108_v59 = vpop.f32.mrb[20].mxu0 }
 0x19f   :  { %11878 = vst [vmem:[#allocation33_spill] sm:$0xff] %v11108_v59  ;;  %v11110_v60 = vpop.f32.mrb[20].mxu1  ;;  %v11112_v61 = vpop.f32.mrb[21].mxu0 }
 0x1a0   :  { %11879 = vst [vmem:[#allocation34_spill] sm:$0xff] %v11110_v60  ;;  %11880 = vst [vmem:[#allocation35_spill] sm:$0xff] %v11112_v61  ;;  %v11114_v62 = vpop.f32.mrb[21].mxu1  ;;  %v11116_v63 = vpop.f32.mrb[22].mxu0 }
 0x1a1   :  { %11881 = vst [vmem:[#allocation36_spill] sm:$0xff] %v11114_v62  ;;  %11882 = vst [vmem:[#allocation37_spill] sm:$0xff] %v11116_v63  ;;  %v11118_v0 = vpop.f32.mrb[22].mxu1  ;;  %v11120_v2 = vpop.f32.mrb[23].mxu0 }
 0x1a2   :  { %11883 = vst [vmem:[#allocation38_spill] sm:$0xff] %v11118_v0  ;;  %11884 = vst [vmem:[#allocation39_spill] sm:$0xff] %v11120_v2  ;;  %v11122_v4 = vpop.f32.mrb[23].mxu1 }
 0x1a3   :  { %11885 = vst [vmem:[#allocation40_spill] sm:$0xff] %v11122_v4 }
 0x1a6   :  { %v11124_v6 = vpop.f32.mrb[24].mxu0 }
 0x1a7   :  { %v11126_v8 = vpop.f32.mrb[24].mxu1  ;;  %v11130_v12 = vpop.f32.mrb[25].mxu0 }
 0x1a8   :  { %v11132_v1 = vpop.f32.mrb[25].mxu1  ;;  %v11136_v3 = vpop.f32.mrb[26].mxu0 }
 0x1a9   :  { %v11138_v5 = vpop.f32.mrb[26].mxu1  ;;  %v11142_v9 = vpop.f32.mrb[27].mxu0 }
 0x1aa   :  { %v11144_v11 = vpop.f32.mrb[27].mxu1 }
 0x1ae   :  { %v11148_v15 = vpop.f32.mrb[28].mxu0 }
 0x1af   :  { %v11150_v16 = vpop.f32.mrb[28].mxu1  ;;  %v11154_v18 = vpop.f32.mrb[29].mxu0 }
 0x1b0   :  { %v11156_v10 = vpop.f32.mrb[29].mxu1  ;;  %v11160_v14 = vpop.f32.mrb[30].mxu0 }
 0x1b1   :  { %v11162_v4 = vpop.f32.mrb[30].mxu1  ;;  %v11166_v0 = vpop.f32.mrb[31].mxu0 }
 0x1b2   :  { %v11168_v62 = vpop.f32.mrb[31].mxu1 }
 0x1b6   :  { %v11172_v60 = vpop.f32.mrb[32].mxu0 }
 0x1b7   :  { %v11174_v58 = vpop.f32.mrb[32].mxu1  ;;  %v11178_v56 = vpop.f32.mrb[33].mxu0 }
 0x1b8   :  { %11886 = vst [vmem:[#allocation41_spill] sm:$0xff] %v11174_v58  ;;  %v11180_v54 = vpop.f32.mrb[33].mxu1  ;;  %v11184_v52 = vpop.f32.mrb[34].mxu0 }
 0x1b9   :  { %11887 = vst [vmem:[#allocation42_spill] sm:$0xff] %v11184_v52  ;;  %v11186_v50 = vpop.f32.mrb[34].mxu1  ;;  %v11190_v48 = vpop.f32.mrb[35].mxu0 }
 0x1ba   :  { %11888 = vst [vmem:[#allocation43_spill] sm:$0xff] %v11186_v50  ;;  %v11192_v46 = vpop.f32.mrb[35].mxu1 }
 0x1bb   :  { %11889 = vst [vmem:[#allocation44_spill] sm:$0xff] %v11192_v46 }
 0x1be   :  { %v11196_v44 = vpop.f32.mrb[36].mxu0 }
 0x1bf   :  { %11890 = vst [vmem:[#allocation45_spill] sm:$0xff] %v11196_v44  ;;  %v11198_v42 = vpop.f32.mrb[36].mxu1  ;;  %v11202_v52 = vpop.f32.mrb[37].mxu0 }
 0x1c0   :  { %11891 = vst [vmem:[#allocation46_spill] sm:$0xff] %v11198_v42  ;;  %v11204_v58 = vpop.f32.mrb[37].mxu1  ;;  %v11208_v50 = vpop.f32.mrb[38].mxu0 }
 0x1c1   :  { %11892 = vst [vmem:[#allocation47_spill] sm:$0xff] %v11204_v58  ;;  %v11210_v39 = vpop.f32.mrb[38].mxu1  ;;  %v11214_v44 = vpop.f32.mrb[39].mxu0 }
 0x1c2   :  { %11893 = vst [vmem:[#allocation48_spill] sm:$0xff] %v11210_v39  ;;  %11894 = vst [vmem:[#allocation49_spill] sm:$0xff] %v11214_v44  ;;  %v11216_v46 = vpop.f32.mrb[39].mxu1 }
 0x1c6   :  { %v11220_v42 = vpop.f32.mrb[40].mxu0 }
 0x1c7   :  { %11895 = vst [vmem:[#allocation50_spill] sm:$0xff] %v11220_v42  ;;  %v11222_v43 = vpop.f32.mrb[40].mxu1  ;;  %v11226_v58 = vpop.f32.mrb[41].mxu0 }
 0x1c8   :  { %11896 = vst [vmem:[#allocation51_spill] sm:$0xff] %v11222_v43  ;;  %11897 = vst [vmem:[#allocation52_spill] sm:$0xff] %v11226_v58  ;;  %v11228_v45 = vpop.f32.mrb[41].mxu1  ;;  %v11232_v39 = vpop.f32.mrb[42].mxu0  ;;  %v1297_v43 = vlaneseq }
 0x1c9   :  { %11898 = vst [vmem:[#allocation53_spill] sm:$0xff] %v11228_v45  ;;  %11899 = vst [vmem:[#allocation54_spill] sm:$0xff] %v11232_v39  ;;  %v11234_v47 = vpop.f32.mrb[42].mxu1  ;;  %v11238_v42 = vpop.f32.mrb[43].mxu0 }
 0x1ca   :  { %11900 = vst [vmem:[#allocation55_spill] sm:$0xff] %v11234_v47  ;;  %11901 = vst [vmem:[#allocation56_spill] sm:$0xff] %v11238_v42  ;;  %v11240_v44 = vpop.f32.mrb[43].mxu1  ;;  %v11254_v13 = vshrl.u32 %v1297_v43, 7 }
 0x1cb   :  { %11902 = vst [vmem:[#allocation57_spill] sm:$0xff] %v11240_v44 }
 0x1cc   :  { %11907 = vst [vmem:[#allocation62_spill] sm:$0xff] %v11254_v13  ;;  %v11271_v43 = vsub.s32 1, %v11254_v13  ;;  %v11274_v47 = vsub.s32 0, %v11254_v13  ;;  %v11859_v59 = vsub.s32 2, %v11254_v13 }
 0x1ce   :  { %v11244_v51 = vpop.f32.mrb[44].mxu0  ;;  %11912 = vst [vmem:[#allocation67_spill] sm:$0xff] %v11271_v43  ;;  %11913 = vst [vmem:[#allocation68_spill] sm:$0xff] %v11274_v47 }
 0x1cf   :  { %11903 = vst [vmem:[#allocation58_spill] sm:$0xff] %v11244_v51  ;;  %v11246_v58 = vpop.f32.mrb[44].mxu1  ;;  %v11250_v39 = vpop.f32.mrb[45].mxu0 }
 0x1d0   :  { %11904 = vst [vmem:[#allocation59_spill] sm:$0xff] %v11246_v58  ;;  %11905 = vst [vmem:[#allocation60_spill] sm:$0xff] %v11250_v39  ;;  %v11252_v45 = vpop.f32.mrb[45].mxu1  ;;  %v11258_v55 = vpop.f32.mrb[46].mxu0  ;;  %v1295_v58 = vld [vmem:[#allocation4] sm:$0x7] }
 0x1d1   :  { %11906 = vst [vmem:[#allocation61_spill] sm:$0xff] %v11252_v45  ;;  %11908 = vst [vmem:[#allocation63_spill] sm:$0xff] %v11258_v55  ;;  %v11260_v17 = vpop.f32.mrb[46].mxu1  ;;  %v11264_v44 = vpop.f32.mrb[47].mxu0  ;;  %v11280_v63 = vrot.slane %v1295_v58, %v11271_v43  ;;  %v11284_v2 = vrot.slane %v1295_v58, %v11274_v47  ;;  %v11289_v39 = vrot.slane %v1295_v58, %v11859_v59 }
 0x1d2   :  { %11909 = vst [vmem:[#allocation64_spill] sm:$0xff] %v11260_v17  ;;  %11910 = vst [vmem:[#allocation65_spill] sm:$0xff] %v11264_v44  ;;  %v11266_v57 = vpop.f32.mrb[47].mxu1  ;;  %v11915_v47 = vmax.f32 %v11028_v19, %v11126_v8 }
 0x1d3   :  { %11911 = vst [vmem:[#allocation66_spill] sm:$0xff] %v11266_v57 }
 0x1d6   :  { %v1035_v45 = vpop.f32.mrb[48].mxu0 }
 0x1d7   :  { %v1128_v61 = vpop.f32.mrb[48].mxu1  ;;  %v1189_v51 = vmax.f32 %v11030_v20, %v1035_v45  ;;  %v1037_v44 = vpop.f32.mrb[49].mxu0  ;;  %v11914_v45 = vmax.f32 %v11032_v21, %v11132_v1  ;;  %v11916_v21 = vmax.f32 %v11040_v25, %v11144_v11 }
 0x1d8   :  { %v1191_v17 = vmax.f32 %v11124_v6, %v1128_v61  ;;  %v1130_v7 = vpop.f32.mrb[49].mxu1  ;;  %v1190_v57 = vmax.f32 %v11034_v22, %v1037_v44  ;;  %v1039_v42 = vpop.f32.mrb[50].mxu0 }
 0x1d9   :  { %v1192_v55 = vmax.f32 %v11130_v12, %v1130_v7  ;;  %v1132_v20 = vpop.f32.mrb[50].mxu1  ;;  %v1195_v6 = vmax.f32 %v11038_v24, %v1039_v42  ;;  %v1041_v22 = vpop.f32.mrb[51].mxu0 }
 0x1da   :  { %v1260_v61 = vmax.f32 %v11914_v45, %v1191_v17  ;;  %v1197_v43 = vmax.f32 %v11136_v3, %v1132_v20  ;;  %v1134_v44 = vpop.f32.mrb[51].mxu1  ;;  %v1259_v12 = vmax.f32 %v11915_v47, %v1190_v57  ;;  %v1196_v58 = vmax.f32 %v11042_v26, %v1041_v22 }
 0x1db   :  { %v1261_v7 = vmax.f32 %v1189_v51, %v1192_v55  ;;  %v1198_v59 = vmax.f32 %v11142_v9, %v1134_v44  ;;  %v11917_v3 = vmax.f32 %v11036_v23, %v11138_v5  ;;  %v11918_v44 = vmax.f32 %v11048_v29, %v11156_v10  ;;  %v9254_v10 = vld [vmem:[#allocation6 + $0x224] ss:$16 sps:$4 sm:$0xff]  }
 0x1dc   :  { %v1313_v13 = vadd.f32 %v11280_v63, %v1260_v61  ;;  %v1263_v1 = vmax.f32 %v11916_v21, %v1197_v43  ;;  %v1312_v24 = vadd.f32 %v11284_v2, %v1259_v12 }
 0x1dd   :  { %v1314_v42 = vadd.f32 %v11289_v39, %v1261_v7  ;;  %v1262_v19 = vmax.f32 %v11917_v3, %v1196_v58  ;;  %v1264_v47 = vmax.f32 %v1195_v6, %v1198_v59 }
 0x1de   :  { %v1316_v51 = vadd.f32 %v11280_v63, %v1263_v1  ;;  %v1349_v26 = vmax.f32 %v1313_v13, 0.0  ;;  %v1348_v55 = vmax.f32 %v1312_v24, 0.0  ;;  %v1045_v9 = vpop.f32.mrb[52].mxu0  ;;  %v9246_v1 = vld [vmem:[#allocation6 + $0x200] ss:$16 sps:$4 sm:$0xff]  }
 0x1df   :  { %v1315_v57 = vadd.f32 %v11284_v2, %v1262_v19  ;;  %v1317_v8 = vadd.f32 %v11289_v39, %v1264_v47  ;;  %v1138_v25 = vpop.f32.mrb[52].mxu1  ;;  %v1350_v11 = vmax.f32 %v1314_v42, 0.0  ;;  %v1201_v43 = vmax.f32 %v11046_v28, %v1045_v9  ;;  %v1047_v45 = vpop.f32.mrb[53].mxu0  ;;  %v9249_v24 = vld [vmem:[#allocation6 + $0x208] ss:$16 sps:$4 sm:$0xff]  }
 0x1e0   :  { %v1352_v17 = vmax.f32 %v1316_v51, 0.0  ;;  %v1203_v20 = vmax.f32 %v11148_v15, %v1138_v25  ;;  %v1140_v23 = vpop.f32.mrb[53].mxu1  ;;  %v1202_v61 = vmax.f32 %v11050_v30, %v1047_v45  ;;  %v1049_v6 = vpop.f32.mrb[54].mxu0  ;;  %v9257_v19 = vld [vmem:[#allocation6 + $0x22c] ss:$16 sps:$4 sm:$0xff]  }
 0x1e1   :  { %v1351_v5 = vmax.f32 %v1315_v57, 0.0  ;;  %v1353_v59 = vmax.f32 %v1317_v8, 0.0  ;;  %v1204_v13 = vmax.f32 %v11154_v18, %v1140_v23  ;;  %v1142_v22 = vpop.f32.mrb[54].mxu1  ;;  %v1207_v7 = vmax.f32 %v11054_v32, %v1049_v6  ;;  %v1051_v58 = vpop.f32.mrb[55].mxu0 }
 0x1e2   :  { %v1266_v12 = vmax.f32 %v11918_v44, %v1203_v20  ;;  %v1209_v28 = vmax.f32 %v11160_v14, %v1142_v22  ;;  %v1144_v15 = vpop.f32.mrb[55].mxu1  ;;  %v11322_v21 = vpack.c.bf16 %v1352_v17, %v1349_v26  ;;  %v11919_v18 = vmax.f32 %v11044_v27, %v11150_v16  ;;  %v9255_v16 = vld [vmem:[#allocation6 + $0x228] ss:$16 sps:$4 sm:$0xff]   ;;  %v9260_v22 = vld [vmem:[#allocation6 + $0x244] ss:$16 sps:$4 sm:$0xff]  }
 0x1e3   :  { %v11324_v42 = vpack.c.bf16 %v1351_v5, %v1348_v55  ;;  %v11326_v30 = vpack.c.bf16 %v1353_v59, %v1350_v11  ;;  %v1267_v29 = vmax.f32 %v1201_v43, %v1204_v13  ;;  %v11920_v14 = vmax.f32 %v11056_v33, %v11168_v62  ;;  %v9252_v55 = vld [vmem:[#allocation6 + $0x220] ss:$16 sps:$4 sm:$0xff]  }
 0x1e4   :  { %v1265_v3 = vmax.f32 %v11919_v18, %v1202_v61  ;;  %v1319_v32 = vadd.f32 %v11280_v63, %v1266_v12  ;;  %v1208_v51 = vmax.f32 %v11058_v34, %v1051_v58  ;;  %v1210_v26 = vmax.f32 %v11166_v0, %v1144_v15  ;;  %4381 = vmatprep.mubr.bf16.mxu0 %v11322_v21  ;;  %v9263_v15 = vld [vmem:[#allocation6 + $0x24c] ss:$16 sps:$4 sm:$0xff]  }
 0x1e5   :  { %v1269_v47 = vmax.f32 %v11920_v14, %v1209_v28  ;;  %v1320_v27 = vadd.f32 %v11289_v39, %v1267_v29  ;;  %4965 = vmatprep.mubr.bf16.mxu1 %v11322_v21  ;;  %4382 = vmatmul.mubr.bf16.vlgmr.msra.gmra.mrb[72].mxu0 %v11324_v42  ;;  %v11921_v33 = vmax.f32 %v11052_v31, %v11162_v4 }
 0x1e6   :  { %v1318_v57 = vadd.f32 %v11284_v2, %v1265_v3  ;;  %v1270_v62 = vmax.f32 %v1207_v7, %v1210_v26  ;;  %4423 = vmatpush1.bf16.msra.mxu0 %v9246_v1  ;;  %4966 = vmatmul.mubr.bf16.vlgmr.msra.gmra.mrb[72].mxu1 %v11324_v42  ;;  %v1355_v0 = vmax.f32 %v1319_v32, 0.0  ;;  %v1055_v25 = vpop.f32.mrb[56].mxu0  ;;  %v11925_v3 = vld [vmem:[#allocation42_spill] sm:$0xff] }
 0x1e7   :  { %v1322_v8 = vadd.f32 %v11280_v63, %v1269_v47  ;;  %v1268_v34 = vmax.f32 %v11921_v33, %v1208_v51  ;;  %5007 = vmatpush1.bf16.msra.mxu1 %v9249_v24  ;;  %v1148_v11 = vpop.f32.mrb[56].mxu1  ;;  %4424 = vmatprep.subr.bf16.mxu0 %v9254_v10  ;;  %v1213_v45 = vmax.f32 %v11062_v36, %v1055_v25  ;;  %v1057_v23 = vpop.f32.mrb[57].mxu0  ;;  %v1356_v4 = vmax.f32 %v1320_v27, 0.0  ;;  %v9258_v10 = vld [vmem:[#allocation6 + $0x240] ss:$16 sps:$4 sm:$0xff]   ;;  %v11930_v33 = vld [vmem:[#allocation43_spill] sm:$0xff] }
 0x1e8   :  { %v1354_v9 = vmax.f32 %v1318_v57, 0.0  ;;  %v1323_v20 = vadd.f32 %v11289_v39, %v1270_v62  ;;  %v1150_v31 = vpop.f32.mrb[57].mxu1  ;;  %5008 = vmatprep.subr.bf16.mxu1 %v9257_v19  ;;  %v1215_v5 = vmax.f32 %v11172_v60, %v1148_v11  ;;  %v1214_v59 = vmax.f32 %v11066_v38, %v1057_v23  ;;  %v1059_v13 = vpop.f32.mrb[58].mxu0  ;;  %v11923_v38 = vld [vmem:[#allocation41_spill] sm:$0xff]  ;;  %v9266_v32 = vld [vmem:[#allocation6 + $0x264] ss:$16 sps:$4 sm:$0xff]  }
 0x1e9   :  { %v1358_v17 = vmax.f32 %v1322_v8, 0.0  ;;  %v1321_v43 = vadd.f32 %v11284_v2, %v1268_v34  ;;  %v1216_v61 = vmax.f32 %v11178_v56, %v1150_v31  ;;  %v1152_v6 = vpop.f32.mrb[58].mxu1  ;;  %v1219_v28 = vmax.f32 %v11070_v40, %v1059_v13  ;;  %v1061_v36 = vpop.f32.mrb[59].mxu0  ;;  %v9261_v19 = vld [vmem:[#allocation6 + $0x248] ss:$16 sps:$4 sm:$0xff]   ;;  %v11926_v47 = vld [vmem:[#allocation18_spill] sm:$0xff] }
 0x1ea   :  { %v1359_v7 = vmax.f32 %v1323_v20, 0.0  ;;  %4425 = vmatpush1.bf16.msra.mxu0 %v9252_v55  ;;  %v1154_v58 = vpop.f32.mrb[59].mxu1  ;;  %v11922_v60 = vmax.f32 %v11064_v37, %v11180_v54  ;;  %v11924_v56 = vmax.f32 %v11060_v35, %v11923_v38  ;;  %v1221_v29 = vmax.f32 %v11925_v3, %v1152_v6  ;;  %v9269_v54 = vld [vmem:[#allocation6 + $0x26c] ss:$16 sps:$4 sm:$0xff]   ;;  %v11927_v57 = vld [vmem:[#allocation44_spill] sm:$0xff] }
 0x1eb   :  { %v11353_v44 = vpack.c.bf16 %v1358_v17, %v1355_v0  ;;  %v1357_v12 = vmax.f32 %v1321_v43, 0.0  ;;  %v1273_v18 = vmax.f32 %v1213_v45, %v1216_v61  ;;  %5009 = vmatpush1.bf16.msra.mxu1 %v9255_v16  ;;  %v1220_v51 = vmax.f32 %v11926_v47, %v1061_v36  ;;  %4426 = vmatprep.subr.bf16.mxu0 %v9260_v22  ;;  %v11929_v8 = vld [vmem:[#allocation17_spill] sm:$0xff]  ;;  %v11932_v23 = vld [vmem:[#allocation20_spill] sm:$0xff]  ;;  %v11934_v22 = vld [vmem:[#allocation22_spill] sm:$0xff] }
 0x1ec   :  { %v1272_v1 = vmax.f32 %v11922_v60, %v1215_v5  ;;  %v1271_v24 = vmax.f32 %v11924_v56, %v1214_v59  ;;  %v11365_v14 = vpack.c.bf16 %v1359_v7, %v1356_v4  ;;  %v1222_v37 = vmax.f32 %v11190_v48, %v1154_v58  ;;  %5010 = vmatprep.subr.bf16.mxu1 %v9263_v15  ;;  %v9264_v48 = vld [vmem:[#allocation6 + $0x260] ss:$16 sps:$4 sm:$0xff]   ;;  %v9267_v59 = vld [vmem:[#allocation6 + $0x268] ss:$16 sps:$4 sm:$0xff]  }
 0x1ed   :  { %v11363_v40 = vpack.c.bf16 %v1357_v12, %v1354_v9  ;;  %4391 = vmatprep.mubr.bf16.mxu0 %v11353_v44  ;;  %v1326_v55 = vadd.f32 %v11289_v39, %v1273_v18  ;;  %v11928_v27 = vmax.f32 %v11072_v41, %v11927_v57  ;;  %v11931_v34 = vmax.f32 %v11929_v8, %v11930_v33  ;;  %v11933_v13 = vld [vmem:[#allocation45_spill] sm:$0xff]  ;;  %v11935_v60 = vld [vmem:[#allocation24_spill] sm:$0xff] }
 0x1ee   :  { %v1325_v35 = vadd.f32 %v11280_v63, %v1272_v1  ;;  %v1324_v26 = vadd.f32 %v11284_v2, %v1271_v24  ;;  %v1276_v0 = vmax.f32 %v1219_v28, %v1222_v37  ;;  %4975 = vmatprep.mubr.bf16.mxu1 %v11353_v44  ;;  %v1065_v41 = vpop.f32.mrb[60].mxu0  ;;  %4427 = vmatpush1.bf16.msra.mxu0 %v9258_v10  ;;  %v9272_v18 = vld [vmem:[#allocation6 + $0x284] ss:$16 sps:$4 sm:$0xff]   ;;  %v11937_v10 = vld [vmem:[#allocation47_spill] sm:$0xff] }
 0x1ef   :  { %v1275_v16 = vmax.f32 %v11928_v27, %v1221_v29  ;;  %v1274_v62 = vmax.f32 %v11931_v34, %v1220_v51  ;;  %4392 = vmatmul.mubr.bf16.gmra.mrb[76].mxu0 %v11363_v40  ;;  %4976 = vmatmul.mubr.bf16.gmra.mrb[76].mxu1 %v11363_v40  ;;  %v1158_v17 = vpop.f32.mrb[60].mxu1  ;;  %v1362_v43 = vmax.f32 %v1326_v55, 0.0  ;;  %v1225_v31 = vmax.f32 %v11932_v23, %v1065_v41  ;;  %v1067_v4 = vpop.f32.mrb[61].mxu0  ;;  %v11936_v29 = vld [vmem:[#allocation21_spill] sm:$0xff]  ;;  %v9278_v8 = vld [vmem:[#allocation6 + $0x2a4] ss:$16 sps:$4 sm:$0xff]  }
 0x1f0   :  { %v1361_v9 = vmax.f32 %v1325_v35, 0.0  ;;  %v1360_v25 = vmax.f32 %v1324_v26, 0.0  ;;  %v1329_v45 = vadd.f32 %v11289_v39, %v1276_v0  ;;  %5011 = vmatpush1.bf16.msra.mxu1 %v9261_v19  ;;  %v1160_v5 = vpop.f32.mrb[61].mxu1  ;;  %v1227_v6 = vmax.f32 %v11933_v13, %v1158_v17  ;;  %4428 = vmatprep.subr.bf16.mxu0 %v9266_v32  ;;  %v1069_v28 = vpop.f32.mrb[62].mxu0  ;;  %v11940_v32 = vld [vmem:[#allocation46_spill] sm:$0xff]  ;;  %v11944_v41 = vld [vmem:[#allocation49_spill] sm:$0xff] }
 0x1f1   :  { %v1328_v11 = vadd.f32 %v11280_v63, %v1275_v16  ;;  %v1327_v20 = vadd.f32 %v11284_v2, %v1274_v62  ;;  %v1226_v12 = vmax.f32 %v11934_v22, %v1067_v4  ;;  %v1228_v7 = vmax.f32 %v11202_v52, %v1160_v5  ;;  %5012 = vmatprep.subr.bf16.mxu1 %v9269_v54  ;;  %v1162_v36 = vpop.f32.mrb[62].mxu1  ;;  %v1071_v56 = vpop.f32.mrb[63].mxu0  ;;  %v11939_v52 = vld [vmem:[#allocation19_spill] sm:$0xff]  ;;  %v9270_v35 = vld [vmem:[#allocation6 + $0x280] ss:$16 sps:$4 sm:$0xff]  }
 0x1f2   :  { %v1365_v15 = vmax.f32 %v1329_v45, 0.0  ;;  %v1231_v1 = vmax.f32 %v11935_v60, %v1069_v28  ;;  %v1233_v38 = vmax.f32 %v11208_v50, %v1162_v36  ;;  %v1164_v24 = vpop.f32.mrb[63].mxu1  ;;  %v11938_v19 = vmax.f32 %v11936_v29, %v11937_v10  ;;  %v9273_v26 = vld [vmem:[#allocation6 + $0x288] ss:$16 sps:$4 sm:$0xff]   ;;  %v9275_v55 = vld [vmem:[#allocation6 + $0x28c] ss:$16 sps:$4 sm:$0xff]   ;;  %4429 = vmatpush1.bf16.msra.mxu0 %v9264_v48 }
 0x1f3   :  { %v1364_v61 = vmax.f32 %v1328_v11, 0.0  ;;  %v1363_v58 = vmax.f32 %v1327_v20, 0.0  ;;  %v11941_v51 = vmax.f32 %v11939_v52, %v11940_v32  ;;  %v1279_v54 = vmax.f32 %v1225_v31, %v1228_v7  ;;  %v9281_v33 = vld [vmem:[#allocation6 + $0x2ac] ss:$16 sps:$4 sm:$0xff]   ;;  %4430 = vmatprep.subr.bf16.mxu0 %v9272_v18  ;;  %v11946_v20 = vld [vmem:[#allocation48_spill] sm:$0xff]  ;;  %v11949_v22 = vld [vmem:[#allocation50_spill] sm:$0xff] }
 0x1f4   :  { %v1278_v47 = vmax.f32 %v11938_v19, %v1227_v6  ;;  %v11401_v50 = vpack.c.bf16 %v1365_v15, %v1362_v43  ;;  %v11942_v27 = vmax.f32 %v11088_v49, %v11216_v46  ;;  %5013 = vmatpush1.bf16.msra.mxu1 %v9267_v59  ;;  %v1234_v46 = vmax.f32 %v11944_v41, %v1164_v24  ;;  %v11945_v43 = vld [vmem:[#allocation23_spill] sm:$0xff]  ;;  %v9276_v36 = vld [vmem:[#allocation6 + $0x2a0] ss:$16 sps:$4 sm:$0xff]  }
 0x1f5   :  { %v11391_v3 = vpack.c.bf16 %v1364_v61, %v1361_v9  ;;  %v1277_v37 = vmax.f32 %v11941_v51, %v1226_v12  ;;  %v11399_v57 = vpack.c.bf16 %v1363_v58, %v1360_v25  ;;  %v11409_v0 = vadd.f32 %v11289_v39, %v1279_v54  ;;  %v11943_v9 = vld [vmem:[#allocation25_spill] sm:$0xff]  ;;  %5014 = vmatprep.subr.bf16.mxu1 %v9275_v55  ;;  %v11948_v13 = vld [vmem:[#allocation27_spill] sm:$0xff]  ;;  %v11950_v60 = vld [vmem:[#allocation28_spill] sm:$0xff] }
 0x1f6   :  { %v1281_v16 = vmax.f32 %v11942_v27, %v1233_v38  ;;  %v1331_v34 = vadd.f32 %v11280_v63, %v1278_v47  ;;  %v1232_v25 = vmax.f32 %v11943_v9, %v1071_v56  ;;  %v1418_v49 = vrot.slane %v11324_v42, 4  ;;  %v1075_v31 = vpop.f32.mrb[64].mxu0  ;;  %4431 = vmatpush1.bf16.msra.mxu0 %v9270_v35  ;;  %v11951_v56 = vld [vmem:[#allocation52_spill] sm:$0xff]  ;;  %v11952_v47 = vld [vmem:[#allocation53_spill] sm:$0xff]  ;;  %v11954_v51 = vld [vmem:[#allocation30_spill] sm:$0xff] }
 0x1f7   :  { %v1330_v62 = vadd.f32 %v11284_v2, %v1277_v37  ;;  %4401 = vmatprep.mubr.bf16.mxu0 %v11391_v3  ;;  %4985 = vmatprep.mubr.bf16.mxu1 %v11391_v3  ;;  %v11947_v45 = vmax.f32 %v11945_v43, %v11946_v20  ;;  %v1168_v4 = vpop.f32.mrb[64].mxu1  ;;  %v1419_v5 = vrot.slane %v11363_v40, 4  ;;  %v1282_v61 = vmax.f32 %v1231_v1, %v1234_v46  ;;  %v1077_v7 = vpop.f32.mrb[65].mxu0  ;;  %v9279_v1 = vld [vmem:[#allocation6 + $0x2a8] ss:$16 sps:$4 sm:$0xff]   ;;  %v11955_v27 = vld [vmem:[#allocation26_spill] sm:$0xff] }
 0x1f8   :  { %v1334_v11 = vadd.f32 %v11280_v63, %v1281_v16  ;;  %v1367_v48 = vmax.f32 %v1331_v34, 0.0  ;;  %4402 = vmatmul.mubr.bf16.gmra.mrb[80].mxu0 %v11399_v57  ;;  %4986 = vmatmul.mubr.bf16.gmra.mrb[80].mxu1 %v11399_v57  ;;  %v1237_v6 = vmax.f32 %v11948_v13, %v1075_v31  ;;  %v1239_v12 = vmax.f32 %v11949_v22, %v1168_v4  ;;  %v1170_v28 = vpop.f32.mrb[65].mxu1  ;;  %v1079_v18 = vpop.f32.mrb[66].mxu0  ;;  %v11956_v16 = vld [vmem:[#allocation51_spill] sm:$0xff]  ;;  %v11968_v42 = vld [vmem:[#allocation58_spill] sm:$0xff] }
 0x1f9   :  { %v1366_v17 = vmax.f32 %v1330_v62, 0.0  ;;  %v1280_v23 = vmax.f32 %v11947_v45, %v1232_v25  ;;  %v1368_v58 = vmax.f32 %v11409_v0, 0.0  ;;  %5015 = vmatpush1.bf16.msra.mxu1 %v9273_v26  ;;  %v1238_v38 = vmax.f32 %v11950_v60, %v1077_v7  ;;  %4432 = vmatprep.subr.bf16.mxu0 %v9278_v8  ;;  %v1172_v29 = vpop.f32.mrb[66].mxu1  ;;  %v1081_v54 = vpop.f32.mrb[67].mxu0  ;;  %v9284_v26 = vld [vmem:[#allocation6 + $0x2c4] ss:$16 sps:$4 sm:$0xff]  }
 0x1fa   :  { %v1370_v59 = vmax.f32 %v1334_v11, 0.0  ;;  %v1240_v24 = vmax.f32 %v11951_v56, %v1170_v28  ;;  %v1335_v19 = vadd.f32 %v11289_v39, %v1282_v61  ;;  %v11953_v52 = vmax.f32 %v11096_v53, %v11952_v47  ;;  %5016 = vmatprep.subr.bf16.mxu1 %v9281_v33  ;;  %v1174_v35 = vpop.f32.mrb[67].mxu1  ;;  %v11958_v0 = vld [vmem:[#allocation54_spill] sm:$0xff]  ;;  %v9287_v11 = vld [vmem:[#allocation6 + $0x2cc] ss:$16 sps:$4 sm:$0xff]   ;;  %4433 = vmatpush1.bf16.msra.mxu0 %v9276_v36  ;;  %v11959_v33 = vld [vmem:[#allocation32_spill] sm:$0xff] }
 0x1fb   :  { %v1333_v15 = vadd.f32 %v11284_v2, %v1280_v23  ;;  %v1243_v37 = vmax.f32 %v11954_v51, %v1079_v18  ;;  %v11957_v8 = vmax.f32 %v11955_v27, %v11956_v16  ;;  %v1245_v9 = vmax.f32 %v11958_v0, %v1172_v29  ;;  %v9282_v25 = vld [vmem:[#allocation6 + $0x2c0] ss:$16 sps:$4 sm:$0xff]   ;;  %v9285_v20 = vld [vmem:[#allocation6 + $0x2c8] ss:$16 sps:$4 sm:$0xff]   ;;  %v9290_v45 = vld [vmem:[#allocation6 + $0x2e4] ss:$16 sps:$4 sm:$0xff]   ;;  %4434 = vmatprep.subr.bf16.mxu0 %v9284_v26 }
 0x1fc   :  { %v11429_v10 = vpack.c.bf16 %v1370_v59, %v1367_v48  ;;  %v1284_v32 = vmax.f32 %v11953_v52, %v1239_v12  ;;  %v1285_v62 = vmax.f32 %v1237_v6, %v1240_v24  ;;  %v1371_v41 = vmax.f32 %v1335_v19, 0.0  ;;  %v11960_v48 = vld [vmem:[#allocation56_spill] sm:$0xff]  ;;  %v11961_v59 = vld [vmem:[#allocation31_spill] sm:$0xff]  ;;  %v11962_v61 = vld [vmem:[#allocation57_spill] sm:$0xff] }
 0x1fd   :  { %v1369_v55 = vmax.f32 %v1333_v15, 0.0  ;;  %v1283_v34 = vmax.f32 %v11957_v8, %v1238_v38  ;;  %v1244_v46 = vmax.f32 %v11959_v33, %v1081_v54  ;;  %v1246_v43 = vmax.f32 %v11960_v48, %v1174_v35  ;;  %5017 = vmatpush1.bf16.msra.mxu1 %v9279_v1  ;;  %v9293_v22 = vld [vmem:[#allocation6 + $0x2ec] ss:$16 sps:$4 sm:$0xff]   ;;  %v9291_v35 = vld [vmem:[#allocation6 + $0x2e8] ss:$16 sps:$4 sm:$0xff]   ;;  %v11970_v16 = vld [vmem:[#allocation60_spill] sm:$0xff] }
 0x1fe   :  { %v1337_v53 = vadd.f32 %v11280_v63, %v1284_v32  ;;  %4411 = vmatprep.mubr.bf16.mxu0 %v11429_v10  ;;  %v1338_v4 = vadd.f32 %v11289_v39, %v1285_v62  ;;  %v11963_v13 = vmax.f32 %v11961_v59, %v11962_v61  ;;  %v11451_v12 = vpack.c.bf16 %v1371_v41, %v1368_v58  ;;  %v11964_v7 = vld [vmem:[#allocation29_spill] sm:$0xff]  ;;  %v11965_v28 = vld [vmem:[#allocation55_spill] sm:$0xff]  ;;  %v1085_v1 = vpop.f32.mrb[68].mxu0  ;;  %v11967_v32 = vld [vmem:[#allocation34_spill] sm:$0xff] }
 0x1ff   :  { %v11444_v23 = vpack.c.bf16 %v1369_v55, %v1366_v17  ;;  %v1336_v31 = vadd.f32 %v11284_v2, %v1283_v34  ;;  %v11966_v36 = vmax.f32 %v11964_v7, %v11965_v28  ;;  %v1288_v60 = vmax.f32 %v1243_v37, %v1246_v43  ;;  %4995 = vmatprep.mubr.bf16.mxu1 %v11429_v10  ;;  %v9288_v17 = vld [vmem:[#allocation6 + $0x2e0] ss:$16 sps:$4 sm:$0xff]   ;;  %v1178_v29 = vpop.f32.mrb[68].mxu1  ;;  %v1087_v37 = vpop.f32.mrb[69].mxu0  ;;  %v9296_v0 = vld [vmem:[#allocation6 + $0x304] ss:$16 sps:$4 sm:$0xff]  }
 0x200   :  { %v1287_v6 = vmax.f32 %v11963_v13, %v1245_v9  ;;  %v1422_v38 = vrot.slane %v11353_v44, 4  ;;  %v1373_v56 = vmax.f32 %v1337_v53, 0.0  ;;  %5018 = vmatprep.subr.bf16.mxu1 %v9287_v11  ;;  %v1420_v58 = vsel %vm1417_vm2, %v1418_v49, %v1419_v5  ;;  %4435 = vmatpush1.bf16.msra.mxu0 %v9282_v25  ;;  %v1180_v54 = vpop.f32.mrb[69].mxu1  ;;  %v11969_v55 = vld [vmem:[#allocation36_spill] sm:$0xff]  ;;  %v1089_v34 = vpop.f32.mrb[70].mxu0  ;;  %v11971_v11 = vld [vmem:[#allocation38_spill] sm:$0xff] }
 0x201   :  { %v1286_v15 = vmax.f32 %v11966_v36, %v1244_v46  ;;  %v1372_v24 = vmax.f32 %v1336_v31, 0.0  ;;  %4412 = vmatmul.mubr.bf16.gmra.mrb[84].mxu0 %v11444_v23  ;;  %v1374_v19 = vmax.f32 %v1338_v4, 0.0  ;;  %v1341_v52 = vadd.f32 %v11289_v39, %v1288_v60  ;;  %4996 = vmatmul.mubr.bf16.gmra.mrb[84].mxu1 %v11444_v23  ;;  %v1182_v62 = vpop.f32.mrb[70].mxu1  ;;  %v11972_v53 = vld [vmem:[#allocation63_spill] sm:$0xff]  ;;  %v1091_v46 = vpop.f32.mrb[71].mxu0  ;;  %v11974_v4 = vld [vmem:[#allocation61_spill] sm:$0xff] }
 0x202   :  { %v1340_v18 = vadd.f32 %v11280_v63, %v1287_v6  ;;  %v1249_v51 = vmax.f32 %v11967_v32, %v1085_v1  ;;  %5019 = vmatpush1.bf16.msra.mxu1 %v9285_v20  ;;  %4454 = vmatprep.mubr.bf16.mxu0 %v1420_v58  ;;  %v1251_v49 = vmax.f32 %v11968_v42, %v1178_v29  ;;  %v1184_v48 = vpop.f32.mrb[71].mxu1  ;;  %v9299_v43 = vld [vmem:[#allocation6 + $0x30c] ss:$16 sps:$4 sm:$0xff]   ;;  %v11982_v29 = vld [vmem:[#allocation40_spill] sm:$0xff] }
 0x203   :  { %v1339_v47 = vadd.f32 %v11284_v2, %v1286_v15  ;;  %v1250_v27 = vmax.f32 %v11969_v55, %v1087_v37  ;;  %v1252_v8 = vmax.f32 %v11970_v16, %v1180_v54  ;;  %v1377_v25 = vmax.f32 %v1341_v52, 0.0  ;;  %5038 = vmatprep.mubr.bf16.mxu1 %v1420_v58  ;;  %4436 = vmatprep.subr.bf16.mxu0 %v9290_v45  ;;  %v11973_v31 = vld [vmem:[#allocation35_spill] sm:$0xff]  ;;  %v11976_v13 = vld [vmem:[#allocation33_spill] sm:$0xff]  ;;  %v9294_v45 = vld [vmem:[#allocation6 + $0x300] ss:$16 sps:$4 sm:$0xff]  }
 0x204   :  { %v1376_v26 = vmax.f32 %v1340_v18, 0.0  ;;  %v1255_v41 = vmax.f32 %v11971_v11, %v1089_v34  ;;  %v1257_v33 = vmax.f32 %v11972_v53, %v1182_v62  ;;  %v11975_v59 = vmax.f32 %v11973_v31, %v11974_v4  ;;  %v11977_v6 = vld [vmem:[#allocation59_spill] sm:$0xff]  ;;  %5020 = vmatprep.subr.bf16.mxu1 %v9293_v22  ;;  %v11980_v58 = vld [vmem:[#allocation66_spill] sm:$0xff]  ;;  %4437 = vmatpush1.bf16.msra.mxu0 %v9288_v17  ;;  %v11985_v42 = vld [vmem:[#allocation64_spill] sm:$0xff] }
 0x205   :  { %v1375_v9 = vmax.f32 %v1339_v47, 0.0  ;;  %v11978_v7 = vmax.f32 %v11976_v13, %v11977_v6  ;;  %v1291_v36 = vmax.f32 %v1249_v51, %v1252_v8  ;;  %v11484_v60 = vpack.c.bf16 %v1377_v25, %v1374_v19  ;;  %v11979_v18 = vld [vmem:[#allocation39_spill] sm:$0xff]  ;;  %v9302_v32 = vld [vmem:[#allocation6 + $0x324] ss:$16 sps:$4 sm:$0xff]   ;;  %4438 = vmatprep.subr.bf16.mxu0 %v9296_v0 }
 0x206   :  { %v11474_v20 = vpack.c.bf16 %v1376_v26, %v1373_v56  ;;  %v1290_v61 = vmax.f32 %v11975_v59, %v1251_v49  ;;  %v11981_v1 = vmax.f32 %v11979_v18, %v11980_v58  ;;  %v1256_v47 = vmax.f32 %v11982_v29, %v1091_v46  ;;  %v9297_v52 = vld [vmem:[#allocation6 + $0x308] ss:$16 sps:$4 sm:$0xff]   ;;  %5021 = vmatpush1.bf16.msra.mxu1 %v9291_v35  ;;  %v9305_v17 = vld [vmem:[#allocation6 + $0x32c] ss:$16 sps:$4 sm:$0xff]   ;;  %v9300_v35 = vld [vmem:[#allocation6 + $0x320] ss:$16 sps:$4 sm:$0xff]  }
 0x207   :  { %v1289_v28 = vmax.f32 %v11978_v7, %v1250_v27  ;;  %v11482_v15 = vpack.c.bf16 %v1375_v9, %v1372_v24  ;;  %v1344_v22 = vadd.f32 %v11289_v39, %v1291_v36  ;;  %v11983_v24 = vld [vmem:[#allocation65_spill] sm:$0xff]  ;;  %5022 = vmatprep.subr.bf16.mxu1 %v9299_v43  ;;  %v1421_v27 = vrot.slane %v11322_v21, 4  ;;  %v9308_v25 = vld [vmem:[#allocation6 + $0x344] ss:$16 sps:$4 sm:$0xff]   ;;  %v9306_v46 = vld [vmem:[#allocation6 + $0x340] ss:$16 sps:$4 sm:$0xff]  }
 0x208   :  { %v1293_v56 = vmax.f32 %v11981_v1, %v1257_v33  ;;  %v1343_v37 = vadd.f32 %v11280_v63, %v1290_v61  ;;  %v1258_v51 = vmax.f32 %v11983_v24, %v1184_v48  ;;  %v11984_v26 = vld [vmem:[#allocation37_spill] sm:$0xff]  ;;  %4439 = vmatpush1.bf16.msra.mxu0 %v9294_v45  ;;  %v9314_v43 = vld [vmem:[#allocation6 + $0x364] ss:$16 sps:$4 sm:$0xff]   ;;  %v1441_v59 = vrot.slane %v11474_v20, 4  ;;  %v9312_v7 = vld [vmem:[#allocation6 + $0x360] ss:$16 sps:$4 sm:$0xff]  }
 0x209   :  { %v1342_v54 = vadd.f32 %v11284_v2, %v1289_v28  ;;  %v11986_v49 = vmax.f32 %v11984_v26, %v11985_v42  ;;  %4440 = vmatprep.subr.bf16.mxu0 %v9302_v32  ;;  %v11504_v0 = vsel %vm1417_vm2, %v1421_v27, %v1422_v38  ;;  %v9311_v53 = vld [vmem:[#allocation6 + $0x34c] ss:$16 sps:$4 sm:$0xff]   ;;  %v1439_v13 = vrot.slane %v11482_v15, 4  ;;  %v9315_v28 = vld [vmem:[#allocation6 + $0x368] ss:$16 sps:$4 sm:$0xff]  }
 0x20a   :  { %v1346_v19 = vadd.f32 %v11280_v63, %v1293_v56  ;;  %v1294_v16 = vmax.f32 %v1255_v41, %v1258_v51  ;;  %v1379_v8 = vmax.f32 %v1343_v37, 0.0  ;;  %5023 = vmatpush1.bf16.msra.mxu1 %v9297_v52  ;;  %v9303_v63 = vld [vmem:[#allocation6 + $0x328] ss:$16 sps:$4 sm:$0xff]   ;;  %v9317_v31 = vld [vmem:[#allocation6 + $0x36c] ss:$16 sps:$4 sm:$0xff]   ;;  %v1443_v58 = vrot.slane %v11484_v60, 4 }
 0x20b   :  { %v1292_v55 = vmax.f32 %v11986_v49, %v1256_v47  ;;  %v1378_v11 = vmax.f32 %v1342_v54, 0.0  ;;  %5024 = vmatprep.subr.bf16.mxu1 %v9305_v17  ;;  %v9320_v36 = vld [vmem:[#allocation6 + $0x384] ss:$16 sps:$4 sm:$0xff]   ;;  %v9323_v18 = vld [vmem:[#allocation6 + $0x38c] ss:$16 sps:$4 sm:$0xff]  }
 0x20c   :  { %v1382_v34 = vmax.f32 %v1346_v19, 0.0  ;;  %v1347_v9 = vadd.f32 %v11289_v39, %v1294_v16  ;;  %4441 = vmatpush1.bf16.msra.mxu0 %v9300_v35  ;;  %v9309_v39 = vld [vmem:[#allocation6 + $0x348] ss:$16 sps:$4 sm:$0xff]   ;;  %v9318_v47 = vld [vmem:[#allocation6 + $0x380] ss:$16 sps:$4 sm:$0xff]  }
 0x20d   :  { %v1345_v62 = vadd.f32 %v11284_v2, %v1292_v55  ;;  %v1380_v2 = vmax.f32 %v1344_v22, 0.0  ;;  %4442 = vmatprep.subr.bf16.mxu0 %v9308_v25  ;;  %v9321_v52 = vld [vmem:[#allocation6 + $0x388] ss:$16 sps:$4 sm:$0xff]   ;;  %v9326_v32 = vld [vmem:[#allocation6 + $0x3a4] ss:$16 sps:$4 sm:$0xff]  }
 0x20e   :  { %v11506_v21 = vpack.c.bf16 %v1382_v34, %v1379_v8  ;;  %v1383_v33 = vmax.f32 %v1347_v9, 0.0  ;;  %5025 = vmatpush1.bf16.msra.mxu1 %v9303_v63  ;;  %v9329_v37 = vld [vmem:[#allocation6 + $0x3ac] ss:$16 sps:$4 sm:$0xff]   ;;  %v9324_v54 = vld [vmem:[#allocation6 + $0x3a0] ss:$16 sps:$4 sm:$0xff]   ;;  %v1427_v34 = vrot.slane %v11399_v57, 4 }
 0x20f   :  { %v1381_v41 = vmax.f32 %v1345_v62, 0.0  ;;  %5026 = vmatprep.subr.bf16.mxu1 %v9311_v53  ;;  %v9327_v22 = vld [vmem:[#allocation6 + $0x3a8] ss:$16 sps:$4 sm:$0xff]   ;;  %v9332_v24 = vld [vmem:[#allocation6 + $0x3c4] ss:$16 sps:$4 sm:$0xff]  }
 0x210   :  { %v11510_v4 = vpack.c.bf16 %v1383_v33, %v1380_v2  ;;  %v1462_v61 = vrot.slane %v11506_v21, 4  ;;  %4443 = vmatpush1.bf16.msra.mxu0 %v9306_v46  ;;  %v9335_v51 = vld [vmem:[#allocation6 + $0x3cc] ss:$16 sps:$4 sm:$0xff]   ;;  %v9330_v19 = vld [vmem:[#allocation6 + $0x3c0] ss:$16 sps:$4 sm:$0xff]   ;;  %v11538_v63 = vsel %vm1417_vm2, %v1419_v5, %v1427_v34  ;;  %v1433_v2 = vrot.slane %v11444_v23, 4 }
 0x211   :  { %v11508_v48 = vpack.c.bf16 %v1381_v41, %v1378_v11  ;;  %4444 = vmatprep.subr.bf16.mxu0 %v9314_v43  ;;  %v9333_v26 = vld [vmem:[#allocation6 + $0x3c8] ss:$16 sps:$4 sm:$0xff]   ;;  %v9338_v42 = vld [vmem:[#allocation6 + $0x3e4] ss:$16 sps:$4 sm:$0xff]   ;;  %v9341_v49 = vld [vmem:[#allocation6 + $0x3ec] ss:$16 sps:$4 sm:$0xff]  }
 0x212   :  { %v11519_v45 = vsel %vm1417_vm2, %v1441_v59, %v1462_v61  ;;  %v1464_v56 = vrot.slane %v11510_v4, 4  ;;  %5027 = vmatpush1.bf16.msra.mxu1 %v9309_v39  ;;  %v9336_v55 = vld [vmem:[#allocation6 + $0x3e0] ss:$16 sps:$4 sm:$0xff]   ;;  %v9339_v17 = vld [vmem:[#allocation6 + $0x3e8] ss:$16 sps:$4 sm:$0xff]   ;;  %v11546_v39 = vsel %vm1417_vm2, %v1427_v34, %v1433_v2 }
 0x213   :  { %v1460_v6 = vrot.slane %v11508_v48, 4  ;;  %5028 = vmatprep.subr.bf16.mxu1 %v9317_v31  ;;  %v9344_v27 = vld [vmem:[#allocation6 + $0x404] ss:$16 sps:$4 sm:$0xff]   ;;  %v9347_v16 = vld [vmem:[#allocation6 + $0x40c] ss:$16 sps:$4 sm:$0xff]  }
 0x214   :  { %v11531_v29 = vsel %vm1417_vm2, %v1443_v58, %v1464_v56  ;;  %4445 = vmatpush1.bf16.msra.mxu0 %v9312_v7  ;;  %v9342_v8 = vld [vmem:[#allocation6 + $0x400] ss:$16 sps:$4 sm:$0xff]   ;;  %v9345_v62 = vld [vmem:[#allocation6 + $0x408] ss:$16 sps:$4 sm:$0xff]   ;;  %v9350_v35 = vld [vmem:[#allocation6 + $0x424] ss:$16 sps:$4 sm:$0xff]   ;;  %v11555_v56 = vsel %vm1417_vm2, %v1433_v2, %v1439_v13 }
 0x215   :  { %v11525_v1 = vsel %vm1417_vm2, %v1439_v13, %v1460_v6  ;;  %4446 = vmatprep.subr.bf16.mxu0 %v9320_v36  ;;  %v9353_v9 = vld [vmem:[#allocation6 + $0x42c] ss:$16 sps:$4 sm:$0xff]   ;;  %v9348_v25 = vld [vmem:[#allocation6 + $0x420] ss:$16 sps:$4 sm:$0xff]   ;;  %v9351_v11 = vld [vmem:[#allocation6 + $0x428] ss:$16 sps:$4 sm:$0xff]  }
 0x216   :  { %5029 = vmatpush1.bf16.msra.mxu1 %v9315_v28  ;;  %v9356_v41 = vld [vmem:[#allocation6 + $0x444] ss:$16 sps:$4 sm:$0xff]   ;;  %v9359_v53 = vld [vmem:[#allocation6 + $0x44c] ss:$16 sps:$4 sm:$0xff]   ;;  %v9354_v33 = vld [vmem:[#allocation6 + $0x440] ss:$16 sps:$4 sm:$0xff]  }
 0x217   :  { %5030 = vmatprep.subr.bf16.mxu1 %v9323_v18  ;;  %v9357_v5 = vld [vmem:[#allocation6 + $0x448] ss:$16 sps:$4 sm:$0xff]   ;;  %v9362_v46 = vld [vmem:[#allocation6 + $0x464] ss:$16 sps:$4 sm:$0xff]   ;;  %v9365_v43 = vld [vmem:[#allocation6 + $0x46c] ss:$16 sps:$4 sm:$0xff]  }
 0x218   :  { %4447 = vmatpush1.bf16.msra.mxu0 %v9318_v47  ;;  %v9360_v31 = vld [vmem:[#allocation6 + $0x460] ss:$16 sps:$4 sm:$0xff]   ;;  %v9363_v61 = vld [vmem:[#allocation6 + $0x468] ss:$16 sps:$4 sm:$0xff]   ;;  %v9368_v6 = vld [vmem:[#allocation6 + $0x484] ss:$16 sps:$4 sm:$0xff]  }
 0x219   :  { %4448 = vmatprep.subr.bf16.mxu0 %v9326_v32  ;;  %v9371_v7 = vld [vmem:[#allocation6 + $0x48c] ss:$16 sps:$4 sm:$0xff]   ;;  %v9366_v28 = vld [vmem:[#allocation6 + $0x480] ss:$16 sps:$4 sm:$0xff]   ;;  %v9369_v36 = vld [vmem:[#allocation6 + $0x488] ss:$16 sps:$4 sm:$0xff]  }
 0x21a   :  { %5031 = vmatpush1.bf16.msra.mxu1 %v9321_v52  ;;  %v9374_v18 = vld [vmem:[#allocation6 + $0x4a4] ss:$16 sps:$4 sm:$0xff]   ;;  %v9377_v47 = vld [vmem:[#allocation6 + $0x4ac] ss:$16 sps:$4 sm:$0xff]   ;;  %v9372_v52 = vld [vmem:[#allocation6 + $0x4a0] ss:$16 sps:$4 sm:$0xff]  }
 0x21b   :  { %5032 = vmatprep.subr.bf16.mxu1 %v9329_v37  ;;  %v9375_v32 = vld [vmem:[#allocation6 + $0x4a8] ss:$16 sps:$4 sm:$0xff]   ;;  %v9380_v37 = vld [vmem:[#allocation6 + $0x4c4] ss:$16 sps:$4 sm:$0xff]   ;;  %v9378_v13 = vld [vmem:[#allocation6 + $0x4c0] ss:$16 sps:$4 sm:$0xff]  }
 0x21c   :  { %4449 = vmatpush1.bf16.msra.mxu0 %v9324_v54  ;;  %v9383_v54 = vld [vmem:[#allocation6 + $0x4cc] ss:$16 sps:$4 sm:$0xff]  }
 0x21d   :  { %4450 = vmatprep.subr.bf16.mxu0 %v9332_v24  ;;  %v1424_v24 = vrot.slane %v11326_v30, 4  ;;  %v9401_v34 = vld [vmem:[#allocation6 + $0x52c] ss:$16 sps:$4 sm:$0xff]  }
 0x21e   :  { %5033 = vmatpush1.bf16.msra.mxu1 %v9327_v22  ;;  %v1425_v22 = vrot.slane %v11365_v14, 4  ;;  %v9413_v2 = vld [vmem:[#allocation6 + $0x56c] ss:$16 sps:$4 sm:$0xff]  }
 0x21f   :  { %5034 = vmatprep.subr.bf16.mxu1 %v9335_v51  ;;  %v9381_v51 = vld [vmem:[#allocation6 + $0x4c8] ss:$16 sps:$4 sm:$0xff]  }
 0x220   :  { %4451 = vmatpush1.bf16.msra.mxu0 %v9330_v19  ;;  %v9386_v19 = vld [vmem:[#allocation6 + $0x4e4] ss:$16 sps:$4 sm:$0xff]  }
 0x221   :  { %4452 = vmatprep.subr.bf16.mxu0 %v9338_v42  ;;  %v9389_v42 = vld [vmem:[#allocation6 + $0x4ec] ss:$16 sps:$4 sm:$0xff]  }
 0x222   :  { %5035 = vmatpush1.bf16.msra.mxu1 %v9333_v26  ;;  %v1426_v26 = vsel %vm1417_vm2, %v1424_v24, %v1425_v22  ;;  %v9435_v24 = vld [vmem:[#allocation6 + $0x5e8] ss:$16 sps:$4 sm:$0xff]  }
 0x223   :  { %5036 = vmatprep.subr.bf16.mxu1 %v9341_v49  ;;  %v9384_v49 = vld [vmem:[#allocation6 + $0x4e0] ss:$16 sps:$4 sm:$0xff]  }
 0x224   :  { %4453 = vmatpush1.bf16.msra.mxu0 %v9336_v55  ;;  %v9392_v55 = vld [vmem:[#allocation6 + $0x504] ss:$16 sps:$4 sm:$0xff]  }
 0x225   :  { %4495 = vmatprep.subr.bf16.mxu0 %v9344_v27  ;;  %v9390_v27 = vld [vmem:[#allocation6 + $0x500] ss:$16 sps:$4 sm:$0xff]  }
 0x226   :  { %5037 = vmatpush1.bf16.msra.mxu1 %v9339_v17  ;;  %v9395_v17 = vld [vmem:[#allocation6 + $0x50c] ss:$16 sps:$4 sm:$0xff]  }
 0x227   :  { %5079 = vmatprep.subr.bf16.mxu1 %v9347_v16  ;;  %4455 = vmatmul.mubr.bf16.vlgmr.msra.gmra.mrb[72].mxu0 %v11326_v30  ;;  %v9393_v16 = vld [vmem:[#allocation6 + $0x508] ss:$16 sps:$4 sm:$0xff]  }
 0x228   :  { %4464 = vmatprep.mubr.bf16.mxu0 %v11538_v63  ;;  %4496 = vmatpush1.bf16.msra.mxu0 %v9342_v8  ;;  %v9398_v8 = vld [vmem:[#allocation6 + $0x524] ss:$16 sps:$4 sm:$0xff]  }
 0x229   :  { %5039 = vmatmul.mubr.bf16.vlgmr.msra.gmra.mrb[72].mxu1 %v11326_v30  ;;  %4497 = vmatprep.subr.bf16.mxu0 %v9350_v35  ;;  %v9387_v30 = vld [vmem:[#allocation6 + $0x4e8] ss:$16 sps:$4 sm:$0xff]  }
 0x22a   :  { %5048 = vmatprep.mubr.bf16.mxu1 %v11538_v63  ;;  %5080 = vmatpush1.bf16.msra.mxu1 %v9345_v62  ;;  %v9396_v62 = vld [vmem:[#allocation6 + $0x520] ss:$16 sps:$4 sm:$0xff]   ;;  %v9399_v35 = vld [vmem:[#allocation6 + $0x528] ss:$16 sps:$4 sm:$0xff]  }
 0x22b   :  { %5081 = vmatprep.subr.bf16.mxu1 %v9353_v9  ;;  %v9404_v9 = vld [vmem:[#allocation6 + $0x544] ss:$16 sps:$4 sm:$0xff]  }
 0x22c   :  { %4498 = vmatpush1.bf16.msra.mxu0 %v9348_v25  ;;  %v9407_v25 = vld [vmem:[#allocation6 + $0x54c] ss:$16 sps:$4 sm:$0xff]  }
 0x22d   :  { %4499 = vmatprep.subr.bf16.mxu0 %v9356_v41  ;;  %v9405_v41 = vld [vmem:[#allocation6 + $0x548] ss:$16 sps:$4 sm:$0xff]  }
 0x22e   :  { %5082 = vmatpush1.bf16.msra.mxu1 %v9351_v11  ;;  %v9402_v11 = vld [vmem:[#allocation6 + $0x540] ss:$16 sps:$4 sm:$0xff]  }
 0x22f   :  { %4465 = vmatmul.mubr.bf16.gmra.mrb[76].mxu0 %v11365_v14  ;;  %5083 = vmatprep.subr.bf16.mxu1 %v9359_v53  ;;  %v9410_v53 = vld [vmem:[#allocation6 + $0x564] ss:$16 sps:$4 sm:$0xff]  }
 0x230   :  { %4474 = vmatprep.mubr.bf16.mxu0 %v11546_v39  ;;  %4500 = vmatpush1.bf16.msra.mxu0 %v9354_v33  ;;  %v9408_v33 = vld [vmem:[#allocation6 + $0x560] ss:$16 sps:$4 sm:$0xff]  }
 0x231   :  { %5049 = vmatmul.mubr.bf16.gmra.mrb[76].mxu1 %v11365_v14  ;;  %4501 = vmatprep.subr.bf16.mxu0 %v9362_v46  ;;  %v9416_v46 = vld [vmem:[#allocation6 + $0x584] ss:$16 sps:$4 sm:$0xff]  }
 0x232   :  { %5058 = vmatprep.mubr.bf16.mxu1 %v11546_v39  ;;  %5084 = vmatpush1.bf16.msra.mxu1 %v9357_v5  ;;  %v9411_v5 = vld [vmem:[#allocation6 + $0x568] ss:$16 sps:$4 sm:$0xff]  }
 0x233   :  { %5085 = vmatprep.subr.bf16.mxu1 %v9365_v43  ;;  %v9419_v43 = vld [vmem:[#allocation6 + $0x58c] ss:$16 sps:$4 sm:$0xff]  }
 0x234   :  { %4502 = vmatpush1.bf16.msra.mxu0 %v9360_v31  ;;  %v9414_v31 = vld [vmem:[#allocation6 + $0x580] ss:$16 sps:$4 sm:$0xff]  }
 0x235   :  { %4503 = vmatprep.subr.bf16.mxu0 %v9368_v6  ;;  %v9422_v6 = vld [vmem:[#allocation6 + $0x5a4] ss:$16 sps:$4 sm:$0xff]  }
 0x236   :  { %5086 = vmatpush1.bf16.msra.mxu1 %v9363_v61  ;;  %v9417_v61 = vld [vmem:[#allocation6 + $0x588] ss:$16 sps:$4 sm:$0xff]  }
 0x237   :  { %4475 = vmatmul.mubr.bf16.gmra.mrb[80].mxu0 %v11401_v50  ;;  %5087 = vmatprep.subr.bf16.mxu1 %v9371_v7  ;;  %v9425_v7 = vld [vmem:[#allocation6 + $0x5ac] ss:$16 sps:$4 sm:$0xff]  }
 0x238   :  { %4484 = vmatprep.mubr.bf16.mxu0 %v11555_v56  ;;  %4504 = vmatpush1.bf16.msra.mxu0 %v9366_v28  ;;  %v9420_v28 = vld [vmem:[#allocation6 + $0x5a0] ss:$16 sps:$4 sm:$0xff]  }
 0x239   :  { %5059 = vmatmul.mubr.bf16.gmra.mrb[80].mxu1 %v11401_v50  ;;  %4505 = vmatprep.subr.bf16.mxu0 %v9374_v18  ;;  %v9428_v18 = vld [vmem:[#allocation6 + $0x5c4] ss:$16 sps:$4 sm:$0xff]  }
 0x23a   :  { %5068 = vmatprep.mubr.bf16.mxu1 %v11555_v56  ;;  %5088 = vmatpush1.bf16.msra.mxu1 %v9369_v36  ;;  %v9423_v36 = vld [vmem:[#allocation6 + $0x5a8] ss:$16 sps:$4 sm:$0xff]  }
 0x23b   :  { %5089 = vmatprep.subr.bf16.mxu1 %v9377_v47  ;;  %v9431_v47 = vld [vmem:[#allocation6 + $0x5cc] ss:$16 sps:$4 sm:$0xff]  }
 0x23c   :  { %4506 = vmatpush1.bf16.msra.mxu0 %v9372_v52  ;;  %v9426_v52 = vld [vmem:[#allocation6 + $0x5c0] ss:$16 sps:$4 sm:$0xff]  }
 0x23d   :  { %4507 = vmatprep.subr.bf16.mxu0 %v9380_v37  ;;  %v9434_v37 = vld [vmem:[#allocation6 + $0x5e4] ss:$16 sps:$4 sm:$0xff]  }
 0x23e   :  { %5090 = vmatpush1.bf16.msra.mxu1 %v9375_v32  ;;  %v9429_v32 = vld [vmem:[#allocation6 + $0x5c8] ss:$16 sps:$4 sm:$0xff]  }
 0x23f   :  { %4485 = vmatmul.mubr.bf16.gmra.mrb[84].mxu0 %v11451_v12  ;;  %5091 = vmatprep.subr.bf16.mxu1 %v9383_v54  ;;  %v9437_v54 = vld [vmem:[#allocation6 + $0x5ec] ss:$16 sps:$4 sm:$0xff]  }
 0x240   :  { %4527 = vmatprep.mubr.bf16.mxu0 %v1426_v26  ;;  %4508 = vmatpush1.bf16.msra.mxu0 %v9378_v13  ;;  %v9432_v13 = vld [vmem:[#allocation6 + $0x5e0] ss:$16 sps:$4 sm:$0xff]  }
 0x241   :  { %5069 = vmatmul.mubr.bf16.gmra.mrb[84].mxu1 %v11451_v12  ;;  %4509 = vmatprep.subr.bf16.mxu0 %v9386_v19  ;;  %v9443_v19 = vld [vmem:[#allocation6 + $0x60c] ss:$16 sps:$4 sm:$0xff]  }
 0x242   :  { %5111 = vmatprep.mubr.bf16.mxu1 %v1426_v26  ;;  %5092 = vmatpush1.bf16.msra.mxu1 %v9381_v51  ;;  %v9440_v51 = vld [vmem:[#allocation6 + $0x604] ss:$16 sps:$4 sm:$0xff]   ;;  %v1431_v26 = vrot.slane %v11401_v50, 4 }
 0x243   :  { %5093 = vmatprep.subr.bf16.mxu1 %v9389_v42  ;;  %v9438_v42 = vld [vmem:[#allocation6 + $0x600] ss:$16 sps:$4 sm:$0xff]  }
 0x244   :  { %4510 = vmatpush1.bf16.msra.mxu0 %v9384_v49  ;;  %v9441_v49 = vld [vmem:[#allocation6 + $0x608] ss:$16 sps:$4 sm:$0xff]  }
 0x245   :  { %4511 = vmatprep.subr.bf16.mxu0 %v9392_v55  ;;  %v11572_v55 = vsel %vm1417_vm2, %v1425_v22, %v1431_v26  ;;  %v1437_v22 = vrot.slane %v11451_v12, 4 }
 0x246   :  { %5094 = vmatpush1.bf16.msra.mxu1 %v9387_v30  ;;  %v9446_v30 = vld [vmem:[#allocation6 + $0x624] ss:$16 sps:$4 sm:$0xff]  }
 0x247   :  { %5095 = vmatprep.subr.bf16.mxu1 %v9395_v17  ;;  %v9449_v17 = vld [vmem:[#allocation6 + $0x62c] ss:$16 sps:$4 sm:$0xff]  }
 0x248   :  { %4512 = vmatpush1.bf16.msra.mxu0 %v9390_v27  ;;  %v9444_v27 = vld [vmem:[#allocation6 + $0x620] ss:$16 sps:$4 sm:$0xff]  }
 0x249   :  { %4513 = vmatprep.subr.bf16.mxu0 %v9398_v8  ;;  %v1429_v8 = vrot.slane %v11391_v3, 4 }
 0x24a   :  { %5096 = vmatpush1.bf16.msra.mxu1 %v9393_v16  ;;  %v9447_v16 = vld [vmem:[#allocation6 + $0x628] ss:$16 sps:$4 sm:$0xff]  }
 0x24b   :  { %5097 = vmatprep.subr.bf16.mxu1 %v9401_v34  ;;  %v9452_v34 = vld [vmem:[#allocation6 + $0x644] ss:$16 sps:$4 sm:$0xff]  }
 0x24c   :  { %4514 = vmatpush1.bf16.msra.mxu0 %v9396_v62  ;;  %v9455_v62 = vld [vmem:[#allocation6 + $0x64c] ss:$16 sps:$4 sm:$0xff]  }
 0x24d   :  { %4515 = vmatprep.subr.bf16.mxu0 %v9404_v9  ;;  %v9453_v9 = vld [vmem:[#allocation6 + $0x648] ss:$16 sps:$4 sm:$0xff]  }
 0x24e   :  { %5098 = vmatpush1.bf16.msra.mxu1 %v9399_v35  ;;  %v9450_v35 = vld [vmem:[#allocation6 + $0x640] ss:$16 sps:$4 sm:$0xff]  }
 0x24f   :  { %5099 = vmatprep.subr.bf16.mxu1 %v9407_v25  ;;  %v9458_v25 = vld [vmem:[#allocation6 + $0x664] ss:$16 sps:$4 sm:$0xff]  }
 0x250   :  { %4516 = vmatpush1.bf16.msra.mxu0 %v9402_v11  ;;  %v11586_v11 = vsel %vm1417_vm2, %v1431_v26, %v1437_v22  ;;  %v9489_v26 = vld [vmem:[#allocation6 + $0x708] ss:$16 sps:$4 sm:$0xff]  }
 0x251   :  { %4517 = vmatprep.subr.bf16.mxu0 %v9410_v53  ;;  %v9456_v53 = vld [vmem:[#allocation6 + $0x660] ss:$16 sps:$4 sm:$0xff]  }
 0x252   :  { %5100 = vmatpush1.bf16.msra.mxu1 %v9405_v41  ;;  %v9461_v41 = vld [vmem:[#allocation6 + $0x66c] ss:$16 sps:$4 sm:$0xff]  }
 0x253   :  { %5101 = vmatprep.subr.bf16.mxu1 %v9413_v2  ;;  %v1435_v2 = vrot.slane %v11429_v10, 4 }
 0x254   :  { %4518 = vmatpush1.bf16.msra.mxu0 %v9408_v33  ;;  %v9464_v33 = vld [vmem:[#allocation6 + $0x684] ss:$16 sps:$4 sm:$0xff]  }
 0x255   :  { %4519 = vmatprep.subr.bf16.mxu0 %v9416_v46  ;;  %v9462_v46 = vld [vmem:[#allocation6 + $0x680] ss:$16 sps:$4 sm:$0xff]  }
 0x256   :  { %5102 = vmatpush1.bf16.msra.mxu1 %v9411_v5  ;;  %v9467_v5 = vld [vmem:[#allocation6 + $0x68c] ss:$16 sps:$4 sm:$0xff]  }
 0x257   :  { %5103 = vmatprep.subr.bf16.mxu1 %v9419_v43  ;;  %v11593_v43 = vsel %vm1417_vm2, %v1429_v8, %v1435_v2 }
 0x258   :  { %4520 = vmatpush1.bf16.msra.mxu0 %v9414_v31  ;;  %v9465_v31 = vld [vmem:[#allocation6 + $0x688] ss:$16 sps:$4 sm:$0xff]  }
 0x259   :  { %4521 = vmatprep.subr.bf16.mxu0 %v9422_v6  ;;  %v11599_v6 = vsel %vm1417_vm2, %v1437_v22, %v1443_v58  ;;  %v11607_v58 = vsel %vm1417_vm2, %v1435_v2, %v1441_v59  ;;  %v9488_v59 = vld [vmem:[#allocation6 + $0x704] ss:$16 sps:$4 sm:$0xff]   ;;  %v9504_v22 = vld [vmem:[#allocation6 + $0x760] ss:$16 sps:$4 sm:$0xff]   ;;  %v9521_v2 = vld [vmem:[#allocation6 + $0x7ac] ss:$16 sps:$4 sm:$0xff]  }
 0x25a   :  { %5104 = vmatpush1.bf16.msra.mxu1 %v9417_v61  ;;  %v9470_v61 = vld [vmem:[#allocation6 + $0x6a4] ss:$16 sps:$4 sm:$0xff]  }
 0x25b   :  { %5105 = vmatprep.subr.bf16.mxu1 %v9425_v7  ;;  %v9473_v7 = vld [vmem:[#allocation6 + $0x6ac] ss:$16 sps:$4 sm:$0xff]  }
 0x25c   :  { %4522 = vmatpush1.bf16.msra.mxu0 %v9420_v28  ;;  %v9468_v28 = vld [vmem:[#allocation6 + $0x6a0] ss:$16 sps:$4 sm:$0xff]  }
 0x25d   :  { %4523 = vmatprep.subr.bf16.mxu0 %v9428_v18  ;;  %v9476_v18 = vld [vmem:[#allocation6 + $0x6c4] ss:$16 sps:$4 sm:$0xff]  }
 0x25e   :  { %5106 = vmatpush1.bf16.msra.mxu1 %v9423_v36  ;;  %v9471_v36 = vld [vmem:[#allocation6 + $0x6a8] ss:$16 sps:$4 sm:$0xff]  }
 0x25f   :  { %5107 = vmatprep.subr.bf16.mxu1 %v9431_v47  ;;  %v9479_v47 = vld [vmem:[#allocation6 + $0x6cc] ss:$16 sps:$4 sm:$0xff]  }
 0x260   :  { %4524 = vmatpush1.bf16.msra.mxu0 %v9426_v52  ;;  %v9474_v52 = vld [vmem:[#allocation6 + $0x6c0] ss:$16 sps:$4 sm:$0xff]  }
 0x261   :  { %4525 = vmatprep.subr.bf16.mxu0 %v9434_v37  ;;  %v9482_v37 = vld [vmem:[#allocation6 + $0x6e4] ss:$16 sps:$4 sm:$0xff]  }
 0x262   :  { %5108 = vmatpush1.bf16.msra.mxu1 %v9429_v32  ;;  %v9477_v32 = vld [vmem:[#allocation6 + $0x6c8] ss:$16 sps:$4 sm:$0xff]  }
 0x263   :  { %5109 = vmatprep.subr.bf16.mxu1 %v9437_v54  ;;  %v9485_v54 = vld [vmem:[#allocation6 + $0x6ec] ss:$16 sps:$4 sm:$0xff]  }
 0x264   :  { %4526 = vmatpush1.bf16.msra.mxu0 %v9432_v13  ;;  %v9480_v13 = vld [vmem:[#allocation6 + $0x6e0] ss:$16 sps:$4 sm:$0xff]  }
 0x265   :  { %4568 = vmatprep.subr.bf16.mxu0 %v9440_v51  ;;  %v9491_v51 = vld [vmem:[#allocation6 + $0x70c] ss:$16 sps:$4 sm:$0xff]  }
 0x266   :  { %5110 = vmatpush1.bf16.msra.mxu1 %v9435_v24  ;;  %v9483_v24 = vld [vmem:[#allocation6 + $0x6e8] ss:$16 sps:$4 sm:$0xff]  }
 0x267   :  { %5152 = vmatprep.subr.bf16.mxu1 %v9443_v19  ;;  %4528 = vmatmul.mubr.bf16.vlgmr.msra.gmra.mrb[72].mxu0 %v11504_v0  ;;  %v9486_v19 = vld [vmem:[#allocation6 + $0x700] ss:$16 sps:$4 sm:$0xff]  }
 0x268   :  { %4537 = vmatprep.mubr.bf16.mxu0 %v11572_v55  ;;  %4569 = vmatpush1.bf16.msra.mxu0 %v9438_v42  ;;  %v9494_v42 = vld [vmem:[#allocation6 + $0x724] ss:$16 sps:$4 sm:$0xff]  }
 0x269   :  { %5112 = vmatmul.mubr.bf16.vlgmr.msra.gmra.mrb[72].mxu1 %v11504_v0  ;;  %4570 = vmatprep.subr.bf16.mxu0 %v9446_v30  ;;  %v11582_v0 = vsel %vm1417_vm2, %v1422_v38, %v1429_v8  ;;  %v9459_v38 = vld [vmem:[#allocation6 + $0x668] ss:$16 sps:$4 sm:$0xff]   ;;  %v9492_v30 = vld [vmem:[#allocation6 + $0x720] ss:$16 sps:$4 sm:$0xff]  }
 0x26a   :  { %5121 = vmatprep.mubr.bf16.mxu1 %v11572_v55  ;;  %5153 = vmatpush1.bf16.msra.mxu1 %v9441_v49  ;;  %v9497_v49 = vld [vmem:[#allocation6 + $0x72c] ss:$16 sps:$4 sm:$0xff]   ;;  %v9501_v8 = vld [vmem:[#allocation6 + $0x748] ss:$16 sps:$4 sm:$0xff]  }
 0x26b   :  { %5154 = vmatprep.subr.bf16.mxu1 %v9449_v17  ;;  %v9500_v17 = vld [vmem:[#allocation6 + $0x744] ss:$16 sps:$4 sm:$0xff]  }
 0x26c   :  { %4571 = vmatpush1.bf16.msra.mxu0 %v9444_v27  ;;  %v9503_v27 = vld [vmem:[#allocation6 + $0x74c] ss:$16 sps:$4 sm:$0xff]  }
 0x26d   :  { %4572 = vmatprep.subr.bf16.mxu0 %v9452_v34  ;;  %v9506_v34 = vld [vmem:[#allocation6 + $0x764] ss:$16 sps:$4 sm:$0xff]  }
 0x26e   :  { %5155 = vmatpush1.bf16.msra.mxu1 %v9447_v16  ;;  %v9498_v16 = vld [vmem:[#allocation6 + $0x740] ss:$16 sps:$4 sm:$0xff]  }
 0x26f   :  { %4538 = vmatmul.mubr.bf16.gmra.mrb[76].mxu0 %v11582_v0  ;;  %5156 = vmatprep.subr.bf16.mxu1 %v9455_v62  ;;  %v9509_v62 = vld [vmem:[#allocation6 + $0x76c] ss:$16 sps:$4 sm:$0xff]  }
 0x270   :  { %4547 = vmatprep.mubr.bf16.mxu0 %v11586_v11  ;;  %4573 = vmatpush1.bf16.msra.mxu0 %v9450_v35  ;;  %v9507_v35 = vld [vmem:[#allocation6 + $0x768] ss:$16 sps:$4 sm:$0xff]  }
 0x271   :  { %5122 = vmatmul.mubr.bf16.gmra.mrb[76].mxu1 %v11582_v0  ;;  %4574 = vmatprep.subr.bf16.mxu0 %v9458_v25  ;;  %v9515_v25 = vld [vmem:[#allocation6 + $0x78c] ss:$16 sps:$4 sm:$0xff]  }
 0x272   :  { %5131 = vmatprep.mubr.bf16.mxu1 %v11586_v11  ;;  %5157 = vmatpush1.bf16.msra.mxu1 %v9453_v9  ;;  %v9512_v9 = vld [vmem:[#allocation6 + $0x784] ss:$16 sps:$4 sm:$0xff]  }
 0x273   :  { %5158 = vmatprep.subr.bf16.mxu1 %v9461_v41  ;;  %v9510_v41 = vld [vmem:[#allocation6 + $0x780] ss:$16 sps:$4 sm:$0xff]  }
 0x274   :  { %4575 = vmatpush1.bf16.msra.mxu0 %v9456_v53  ;;  %v9513_v53 = vld [vmem:[#allocation6 + $0x788] ss:$16 sps:$4 sm:$0xff]  }
 0x275   :  { %4576 = vmatprep.subr.bf16.mxu0 %v9464_v33  ;;  %v9516_v33 = vld [vmem:[#allocation6 + $0x7a0] ss:$16 sps:$4 sm:$0xff]  }
 0x276   :  { %5159 = vmatpush1.bf16.msra.mxu1 %v9459_v38  ;;  %v9518_v38 = vld [vmem:[#allocation6 + $0x7a4] ss:$16 sps:$4 sm:$0xff]  }
 0x277   :  { %4548 = vmatmul.mubr.bf16.gmra.mrb[80].mxu0 %v11593_v43  ;;  %5160 = vmatprep.subr.bf16.mxu1 %v9467_v5  ;;  %v9519_v5 = vld [vmem:[#allocation6 + $0x7a8] ss:$16 sps:$4 sm:$0xff]  }
 0x278   :  { %4557 = vmatprep.mubr.bf16.mxu0 %v11599_v6  ;;  %4577 = vmatpush1.bf16.msra.mxu0 %v9462_v46  ;;  %v9524_v46 = vld [vmem:[#allocation6 + $0x7c4] ss:$16 sps:$4 sm:$0xff]  }
 0x279   :  { %5132 = vmatmul.mubr.bf16.gmra.mrb[80].mxu1 %v11593_v43  ;;  %4578 = vmatprep.subr.bf16.mxu0 %v9470_v61  ;;  %v9522_v61 = vld [vmem:[#allocation6 + $0x7c0] ss:$16 sps:$4 sm:$0xff]  }
 0x27a   :  { %5141 = vmatprep.mubr.bf16.mxu1 %v11599_v6  ;;  %5161 = vmatpush1.bf16.msra.mxu1 %v9465_v31  ;;  %v9527_v31 = vld [vmem:[#allocation6 + $0x7cc] ss:$16 sps:$4 sm:$0xff]  }
 0x27b   :  { %5162 = vmatprep.subr.bf16.mxu1 %v9473_v7  ;;  %v9525_v7 = vld [vmem:[#allocation6 + $0x7c8] ss:$16 sps:$4 sm:$0xff]  }
 0x27c   :  { %4579 = vmatpush1.bf16.msra.mxu0 %v9468_v28  ;;  %v9530_v28 = vld [vmem:[#allocation6 + $0x7e4] ss:$16 sps:$4 sm:$0xff]  }
 0x27d   :  { %4580 = vmatprep.subr.bf16.mxu0 %v9476_v18  ;;  %v9528_v18 = vld [vmem:[#allocation6 + $0x7e0] ss:$16 sps:$4 sm:$0xff]  }
 0x27e   :  { %5163 = vmatpush1.bf16.msra.mxu1 %v9471_v36  ;;  %v9533_v36 = vld [vmem:[#allocation6 + $0x7ec] ss:$16 sps:$4 sm:$0xff]  }
 0x27f   :  { %4558 = vmatmul.mubr.bf16.gmra.mrb[84].mxu0 %v11607_v58  ;;  %5164 = vmatprep.subr.bf16.mxu1 %v9479_v47  ;;  %v9531_v47 = vld [vmem:[#allocation6 + $0x7e8] ss:$16 sps:$4 sm:$0xff]  }
 0x280   :  { %4600 = vmatprep.mubr.bf16.mxu0 %v11353_v44  ;;  %4581 = vmatpush1.bf16.msra.mxu0 %v9474_v52  ;;  %v9536_v52 = vld [vmem:[#allocation6 + $0x804] ss:$16 sps:$4 sm:$0xff]  }
 0x281   :  { %5142 = vmatmul.mubr.bf16.gmra.mrb[84].mxu1 %v11607_v58  ;;  %4582 = vmatprep.subr.bf16.mxu0 %v9482_v37  ;;  %v9534_v37 = vld [vmem:[#allocation6 + $0x800] ss:$16 sps:$4 sm:$0xff]  }
 0x282   :  { %5184 = vmatprep.mubr.bf16.mxu1 %v11353_v44  ;;  %5165 = vmatpush1.bf16.msra.mxu1 %v9477_v32  ;;  %v9495_v44 = vld [vmem:[#allocation6 + $0x728] ss:$16 sps:$4 sm:$0xff]   ;;  %v9539_v32 = vld [vmem:[#allocation6 + $0x80c] ss:$16 sps:$4 sm:$0xff]  }
 0x283   :  { %5166 = vmatprep.subr.bf16.mxu1 %v9485_v54  ;;  %v9537_v54 = vld [vmem:[#allocation6 + $0x808] ss:$16 sps:$4 sm:$0xff]  }
 0x284   :  { %4583 = vmatpush1.bf16.msra.mxu0 %v9480_v13  ;;  %v9542_v13 = vld [vmem:[#allocation6 + $0x824] ss:$16 sps:$4 sm:$0xff]  }
 0x285   :  { %4584 = vmatprep.subr.bf16.mxu0 %v9488_v59  ;;  %v9540_v59 = vld [vmem:[#allocation6 + $0x820] ss:$16 sps:$4 sm:$0xff]  }
 0x286   :  { %5167 = vmatpush1.bf16.msra.mxu1 %v9483_v24  ;;  %v9545_v24 = vld [vmem:[#allocation6 + $0x82c] ss:$16 sps:$4 sm:$0xff]  }
 0x287   :  { %5168 = vmatprep.subr.bf16.mxu1 %v9491_v51  ;;  %v9543_v51 = vld [vmem:[#allocation6 + $0x828] ss:$16 sps:$4 sm:$0xff]  }
 0x288   :  { %4585 = vmatpush1.bf16.msra.mxu0 %v9486_v19  ;;  %v9548_v19 = vld [vmem:[#allocation6 + $0x844] ss:$16 sps:$4 sm:$0xff]  }
 0x289   :  { %4586 = vmatprep.subr.bf16.mxu0 %v9494_v42  ;;  %v9546_v42 = vld [vmem:[#allocation6 + $0x840] ss:$16 sps:$4 sm:$0xff]  }
 0x28a   :  { %5169 = vmatpush1.bf16.msra.mxu1 %v9489_v26  ;;  %v9551_v26 = vld [vmem:[#allocation6 + $0x84c] ss:$16 sps:$4 sm:$0xff]  }
 0x28b   :  { %5170 = vmatprep.subr.bf16.mxu1 %v9497_v49  ;;  %v9549_v49 = vld [vmem:[#allocation6 + $0x848] ss:$16 sps:$4 sm:$0xff]  }
 0x28c   :  { %4587 = vmatpush1.bf16.msra.mxu0 %v9492_v30  ;;  %v9554_v30 = vld [vmem:[#allocation6 + $0x864] ss:$16 sps:$4 sm:$0xff]  }
 0x28d   :  { %4588 = vmatprep.subr.bf16.mxu0 %v9500_v17  ;;  %v9555_v17 = vld [vmem:[#allocation6 + $0x868] ss:$16 sps:$4 sm:$0xff]  }
 0x28e   :  { %5171 = vmatpush1.bf16.msra.mxu1 %v9495_v44  ;;  %v9552_v44 = vld [vmem:[#allocation6 + $0x860] ss:$16 sps:$4 sm:$0xff]  }
 0x28f   :  { %5172 = vmatprep.subr.bf16.mxu1 %v9503_v27  ;;  %v9560_v27 = vld [vmem:[#allocation6 + $0x884] ss:$16 sps:$4 sm:$0xff]  }
 0x290   :  { %4589 = vmatpush1.bf16.msra.mxu0 %v9498_v16  ;;  %v9563_v16 = vld [vmem:[#allocation6 + $0x88c] ss:$16 sps:$4 sm:$0xff]  }
 0x291   :  { %4590 = vmatprep.subr.bf16.mxu0 %v9506_v34  ;;  %v9561_v34 = vld [vmem:[#allocation6 + $0x888] ss:$16 sps:$4 sm:$0xff]  }
 0x292   :  { %5173 = vmatpush1.bf16.msra.mxu1 %v9501_v8  ;;  %v9558_v8 = vld [vmem:[#allocation6 + $0x880] ss:$16 sps:$4 sm:$0xff]  }
 0x293   :  { %5174 = vmatprep.subr.bf16.mxu1 %v9509_v62  ;;  %v9566_v62 = vld [vmem:[#allocation6 + $0x8a4] ss:$16 sps:$4 sm:$0xff]  }
 0x294   :  { %4591 = vmatpush1.bf16.msra.mxu0 %v9504_v22  ;;  %v9569_v22 = vld [vmem:[#allocation6 + $0x8ac] ss:$16 sps:$4 sm:$0xff]  }
 0x295   :  { %4592 = vmatprep.subr.bf16.mxu0 %v9512_v9  ;;  %v9567_v9 = vld [vmem:[#allocation6 + $0x8a8] ss:$16 sps:$4 sm:$0xff]  }
 0x296   :  { %5175 = vmatpush1.bf16.msra.mxu1 %v9507_v35  ;;  %v9564_v35 = vld [vmem:[#allocation6 + $0x8a0] ss:$16 sps:$4 sm:$0xff]  }
 0x297   :  { %5176 = vmatprep.subr.bf16.mxu1 %v9515_v25  ;;  %v9572_v25 = vld [vmem:[#allocation6 + $0x8c4] ss:$16 sps:$4 sm:$0xff]  }
 0x298   :  { %4593 = vmatpush1.bf16.msra.mxu0 %v9510_v41  ;;  %v9575_v41 = vld [vmem:[#allocation6 + $0x8cc] ss:$16 sps:$4 sm:$0xff]  }
 0x299   :  { %4594 = vmatprep.subr.bf16.mxu0 %v9518_v38  ;;  %v9573_v38 = vld [vmem:[#allocation6 + $0x8c8] ss:$16 sps:$4 sm:$0xff]  }
 0x29a   :  { %5177 = vmatpush1.bf16.msra.mxu1 %v9513_v53  ;;  %v9570_v53 = vld [vmem:[#allocation6 + $0x8c0] ss:$16 sps:$4 sm:$0xff]  }
 0x29b   :  { %5178 = vmatprep.subr.bf16.mxu1 %v9521_v2  ;;  %v9578_v2 = vld [vmem:[#allocation6 + $0x8e4] ss:$16 sps:$4 sm:$0xff]  }
 0x29c   :  { %4595 = vmatpush1.bf16.msra.mxu0 %v9516_v33  ;;  %v9581_v33 = vld [vmem:[#allocation6 + $0x8ec] ss:$16 sps:$4 sm:$0xff]  }
 0x29d   :  { %4596 = vmatprep.subr.bf16.mxu0 %v9524_v46  ;;  %v9579_v46 = vld [vmem:[#allocation6 + $0x8e8] ss:$16 sps:$4 sm:$0xff]  }
 0x29e   :  { %5179 = vmatpush1.bf16.msra.mxu1 %v9519_v5  ;;  %v9576_v5 = vld [vmem:[#allocation6 + $0x8e0] ss:$16 sps:$4 sm:$0xff]  }
 0x29f   :  { %5180 = vmatprep.subr.bf16.mxu1 %v9527_v31  ;;  %v9584_v31 = vld [vmem:[#allocation6 + $0x904] ss:$16 sps:$4 sm:$0xff]  }
 0x2a0   :  { %4597 = vmatpush1.bf16.msra.mxu0 %v9522_v61  ;;  %v9587_v61 = vld [vmem:[#allocation6 + $0x90c] ss:$16 sps:$4 sm:$0xff]  }
 0x2a1   :  { %4598 = vmatprep.subr.bf16.mxu0 %v9530_v28  ;;  %v9585_v28 = vld [vmem:[#allocation6 + $0x908] ss:$16 sps:$4 sm:$0xff]  }
 0x2a2   :  { %5181 = vmatpush1.bf16.msra.mxu1 %v9525_v7  ;;  %v9582_v7 = vld [vmem:[#allocation6 + $0x900] ss:$16 sps:$4 sm:$0xff]  }
 0x2a3   :  { %5182 = vmatprep.subr.bf16.mxu1 %v9533_v36  ;;  %v9590_v36 = vld [vmem:[#allocation6 + $0x924] ss:$16 sps:$4 sm:$0xff]  }
 0x2a4   :  { %4599 = vmatpush1.bf16.msra.mxu0 %v9528_v18  ;;  %v9593_v18 = vld [vmem:[#allocation6 + $0x92c] ss:$16 sps:$4 sm:$0xff]  }
 0x2a5   :  { %4641 = vmatprep.subr.bf16.mxu0 %v9536_v52  ;;  %v9596_v52 = vld [vmem:[#allocation6 + $0x944] ss:$16 sps:$4 sm:$0xff]  }
 0x2a6   :  { %5183 = vmatpush1.bf16.msra.mxu1 %v9531_v47  ;;  %v9588_v47 = vld [vmem:[#allocation6 + $0x920] ss:$16 sps:$4 sm:$0xff]  }
 0x2a7   :  { %5225 = vmatprep.subr.bf16.mxu1 %v9539_v32  ;;  %4601 = vmatmul.mubr.bf16.vlgmr.msra.gmra.mrb[72].mxu0 %v11363_v40  ;;  %v9599_v32 = vld [vmem:[#allocation6 + $0x94c] ss:$16 sps:$4 sm:$0xff]  }
 0x2a8   :  { %4610 = vmatprep.mubr.bf16.mxu0 %v11391_v3  ;;  %4642 = vmatpush1.bf16.msra.mxu0 %v9534_v37  ;;  %v9594_v37 = vld [vmem:[#allocation6 + $0x940] ss:$16 sps:$4 sm:$0xff]  }
 0x2a9   :  { %5185 = vmatmul.mubr.bf16.vlgmr.msra.gmra.mrb[72].mxu1 %v11363_v40  ;;  %4643 = vmatprep.subr.bf16.mxu0 %v9542_v13  ;;  %v9557_v40 = vld [vmem:[#allocation6 + $0x86c] ss:$16 sps:$4 sm:$0xff]   ;;  %v9602_v13 = vld [vmem:[#allocation6 + $0x964] ss:$16 sps:$4 sm:$0xff]  }
 0x2aa   :  { %5194 = vmatprep.mubr.bf16.mxu1 %v11391_v3  ;;  %5226 = vmatpush1.bf16.msra.mxu1 %v9537_v54  ;;  %v9597_v54 = vld [vmem:[#allocation6 + $0x948] ss:$16 sps:$4 sm:$0xff]  }
 0x2ab   :  { %5227 = vmatprep.subr.bf16.mxu1 %v9545_v24  ;;  %v9605_v24 = vld [vmem:[#allocation6 + $0x96c] ss:$16 sps:$4 sm:$0xff]  }
 0x2ac   :  { %4644 = vmatpush1.bf16.msra.mxu0 %v9540_v59  ;;  %v9600_v59 = vld [vmem:[#allocation6 + $0x960] ss:$16 sps:$4 sm:$0xff]  }
 0x2ad   :  { %4645 = vmatprep.subr.bf16.mxu0 %v9548_v19  ;;  %v9608_v19 = vld [vmem:[#allocation6 + $0x984] ss:$16 sps:$4 sm:$0xff]  }
 0x2ae   :  { %5228 = vmatpush1.bf16.msra.mxu1 %v9543_v51  ;;  %v9603_v51 = vld [vmem:[#allocation6 + $0x968] ss:$16 sps:$4 sm:$0xff]  }
 0x2af   :  { %4611 = vmatmul.mubr.bf16.gmra.mrb[76].mxu0 %v11399_v57  ;;  %5229 = vmatprep.subr.bf16.mxu1 %v9551_v26  ;;  %v9611_v26 = vld [vmem:[#allocation6 + $0x98c] ss:$16 sps:$4 sm:$0xff]  }
 0x2b0   :  { %4620 = vmatprep.mubr.bf16.mxu0 %v11429_v10  ;;  %4646 = vmatpush1.bf16.msra.mxu0 %v9546_v42  ;;  %v9606_v42 = vld [vmem:[#allocation6 + $0x980] ss:$16 sps:$4 sm:$0xff]  }
 0x2b1   :  { %5195 = vmatmul.mubr.bf16.gmra.mrb[76].mxu1 %v11399_v57  ;;  %4647 = vmatprep.subr.bf16.mxu0 %v9554_v30  ;;  %v9614_v30 = vld [vmem:[#allocation6 + $0x9a4] ss:$16 sps:$4 sm:$0xff]  }
 0x2b2   :  { %5204 = vmatprep.mubr.bf16.mxu1 %v11429_v10  ;;  %5230 = vmatpush1.bf16.msra.mxu1 %v9549_v49  ;;  %v9609_v49 = vld [vmem:[#allocation6 + $0x988] ss:$16 sps:$4 sm:$0xff]  }
 0x2b3   :  { %5231 = vmatprep.subr.bf16.mxu1 %v9557_v40  ;;  %v9617_v40 = vld [vmem:[#allocation6 + $0x9ac] ss:$16 sps:$4 sm:$0xff]  }
 0x2b4   :  { %4648 = vmatpush1.bf16.msra.mxu0 %v9552_v44  ;;  %v9612_v44 = vld [vmem:[#allocation6 + $0x9a0] ss:$16 sps:$4 sm:$0xff]  }
 0x2b5   :  { %4649 = vmatprep.subr.bf16.mxu0 %v9560_v27  ;;  %v9620_v27 = vld [vmem:[#allocation6 + $0x9c4] ss:$16 sps:$4 sm:$0xff]  }
 0x2b6   :  { %5232 = vmatpush1.bf16.msra.mxu1 %v9555_v17  ;;  %v9615_v17 = vld [vmem:[#allocation6 + $0x9a8] ss:$16 sps:$4 sm:$0xff]  }
 0x2b7   :  { %4621 = vmatmul.mubr.bf16.gmra.mrb[80].mxu0 %v11444_v23  ;;  %5233 = vmatprep.subr.bf16.mxu1 %v9563_v16  ;;  %v9623_v16 = vld [vmem:[#allocation6 + $0x9cc] ss:$16 sps:$4 sm:$0xff]  }
 0x2b8   :  { %4630 = vmatprep.mubr.bf16.mxu0 %v11474_v20  ;;  %4650 = vmatpush1.bf16.msra.mxu0 %v9558_v8  ;;  %v9618_v8 = vld [vmem:[#allocation6 + $0x9c0] ss:$16 sps:$4 sm:$0xff]  }
 0x2b9   :  { %5205 = vmatmul.mubr.bf16.gmra.mrb[80].mxu1 %v11444_v23  ;;  %4651 = vmatprep.subr.bf16.mxu0 %v9566_v62  ;;  %v9626_v62 = vld [vmem:[#allocation6 + $0x9e4] ss:$16 sps:$4 sm:$0xff]  }
 0x2ba   :  { %5214 = vmatprep.mubr.bf16.mxu1 %v11474_v20  ;;  %5234 = vmatpush1.bf16.msra.mxu1 %v9561_v34  ;;  %v9621_v34 = vld [vmem:[#allocation6 + $0x9c8] ss:$16 sps:$4 sm:$0xff]  }
 0x2bb   :  { %5235 = vmatprep.subr.bf16.mxu1 %v9569_v22  ;;  %v9629_v22 = vld [vmem:[#allocation6 + $0x9ec] ss:$16 sps:$4 sm:$0xff]  }
 0x2bc   :  { %4652 = vmatpush1.bf16.msra.mxu0 %v9564_v35  ;;  %v9624_v35 = vld [vmem:[#allocation6 + $0x9e0] ss:$16 sps:$4 sm:$0xff]  }
 0x2bd   :  { %4653 = vmatprep.subr.bf16.mxu0 %v9572_v25  ;;  %v9632_v25 = vld [vmem:[#allocation6 + $0xa04] ss:$16 sps:$4 sm:$0xff]  }
 0x2be   :  { %5236 = vmatpush1.bf16.msra.mxu1 %v9567_v9  ;;  %v9627_v9 = vld [vmem:[#allocation6 + $0x9e8] ss:$16 sps:$4 sm:$0xff]  }
 0x2bf   :  { %4631 = vmatmul.mubr.bf16.gmra.mrb[84].mxu0 %v11482_v15  ;;  %5237 = vmatprep.subr.bf16.mxu1 %v9575_v41  ;;  %v9635_v41 = vld [vmem:[#allocation6 + $0xa0c] ss:$16 sps:$4 sm:$0xff]  }
 0x2c0   :  { %4673 = vmatprep.mubr.bf16.mxu0 %v11538_v63  ;;  %4654 = vmatpush1.bf16.msra.mxu0 %v9570_v53  ;;  %v9630_v53 = vld [vmem:[#allocation6 + $0xa00] ss:$16 sps:$4 sm:$0xff]  }
 0x2c1   :  { %5215 = vmatmul.mubr.bf16.gmra.mrb[84].mxu1 %v11482_v15  ;;  %4655 = vmatprep.subr.bf16.mxu0 %v9578_v2  ;;  %v9638_v2 = vld [vmem:[#allocation6 + $0xa24] ss:$16 sps:$4 sm:$0xff]  }
 0x2c2   :  { %5257 = vmatprep.mubr.bf16.mxu1 %v11538_v63  ;;  %5238 = vmatpush1.bf16.msra.mxu1 %v9573_v38  ;;  %v9591_v63 = vld [vmem:[#allocation6 + $0x928] ss:$16 sps:$4 sm:$0xff]  }
 0x2c3   :  { %5239 = vmatprep.subr.bf16.mxu1 %v9581_v33  ;;  %v9633_v38 = vld [vmem:[#allocation6 + $0xa08] ss:$16 sps:$4 sm:$0xff]   ;;  %v9641_v33 = vld [vmem:[#allocation6 + $0xa2c] ss:$16 sps:$4 sm:$0xff]  }
 0x2c4   :  { %4656 = vmatpush1.bf16.msra.mxu0 %v9576_v5  ;;  %v9636_v5 = vld [vmem:[#allocation6 + $0xa20] ss:$16 sps:$4 sm:$0xff]  }
 0x2c5   :  { %4657 = vmatprep.subr.bf16.mxu0 %v9584_v31  ;;  %v9644_v31 = vld [vmem:[#allocation6 + $0xa44] ss:$16 sps:$4 sm:$0xff]  }
 0x2c6   :  { %5240 = vmatpush1.bf16.msra.mxu1 %v9579_v46  ;;  %v9639_v46 = vld [vmem:[#allocation6 + $0xa28] ss:$16 sps:$4 sm:$0xff]  }
 0x2c7   :  { %5241 = vmatprep.subr.bf16.mxu1 %v9587_v61  ;;  %v9647_v61 = vld [vmem:[#allocation6 + $0xa4c] ss:$16 sps:$4 sm:$0xff]  }
 0x2c8   :  { %4658 = vmatpush1.bf16.msra.mxu0 %v9582_v7  ;;  %v9642_v7 = vld [vmem:[#allocation6 + $0xa40] ss:$16 sps:$4 sm:$0xff]  }
 0x2c9   :  { %4659 = vmatprep.subr.bf16.mxu0 %v9590_v36  ;;  %v9650_v36 = vld [vmem:[#allocation6 + $0xa64] ss:$16 sps:$4 sm:$0xff]  }
 0x2ca   :  { %5242 = vmatpush1.bf16.msra.mxu1 %v9585_v28  ;;  %v9645_v28 = vld [vmem:[#allocation6 + $0xa48] ss:$16 sps:$4 sm:$0xff]  }
 0x2cb   :  { %5243 = vmatprep.subr.bf16.mxu1 %v9593_v18  ;;  %v9651_v18 = vld [vmem:[#allocation6 + $0xa68] ss:$16 sps:$4 sm:$0xff]  }
 0x2cc   :  { %4660 = vmatpush1.bf16.msra.mxu0 %v9588_v47  ;;  %v9656_v47 = vld [vmem:[#allocation6 + $0xa84] ss:$16 sps:$4 sm:$0xff]  }
 0x2cd   :  { %4661 = vmatprep.subr.bf16.mxu0 %v9596_v52  ;;  %v9654_v52 = vld [vmem:[#allocation6 + $0xa80] ss:$16 sps:$4 sm:$0xff]  }
 0x2ce   :  { %5244 = vmatpush1.bf16.msra.mxu1 %v9591_v63  ;;  %v9659_v63 = vld [vmem:[#allocation6 + $0xa8c] ss:$16 sps:$4 sm:$0xff]  }
 0x2cf   :  { %5245 = vmatprep.subr.bf16.mxu1 %v9599_v32  ;;  %v9657_v32 = vld [vmem:[#allocation6 + $0xa88] ss:$16 sps:$4 sm:$0xff]  }
 0x2d0   :  { %4662 = vmatpush1.bf16.msra.mxu0 %v9594_v37  ;;  %v9662_v37 = vld [vmem:[#allocation6 + $0xaa4] ss:$16 sps:$4 sm:$0xff]  }
 0x2d1   :  { %4663 = vmatprep.subr.bf16.mxu0 %v9602_v13  ;;  %v9663_v13 = vld [vmem:[#allocation6 + $0xaa8] ss:$16 sps:$4 sm:$0xff]  }
 0x2d2   :  { %5246 = vmatpush1.bf16.msra.mxu1 %v9597_v54  ;;  %v9665_v54 = vld [vmem:[#allocation6 + $0xaac] ss:$16 sps:$4 sm:$0xff]  }
 0x2d3   :  { %5247 = vmatprep.subr.bf16.mxu1 %v9605_v24  ;;  %v9668_v24 = vld [vmem:[#allocation6 + $0xac4] ss:$16 sps:$4 sm:$0xff]  }
 0x2d4   :  { %4664 = vmatpush1.bf16.msra.mxu0 %v9600_v59  ;;  %v9671_v59 = vld [vmem:[#allocation6 + $0xacc] ss:$16 sps:$4 sm:$0xff]  }
 0x2d5   :  { %4665 = vmatprep.subr.bf16.mxu0 %v9608_v19  ;;  %v9669_v19 = vld [vmem:[#allocation6 + $0xac8] ss:$16 sps:$4 sm:$0xff]  }
 0x2d6   :  { %5248 = vmatpush1.bf16.msra.mxu1 %v9603_v51  ;;  %v9666_v51 = vld [vmem:[#allocation6 + $0xac0] ss:$16 sps:$4 sm:$0xff]  }
 0x2d7   :  { %5249 = vmatprep.subr.bf16.mxu1 %v9611_v26  ;;  %v9674_v26 = vld [vmem:[#allocation6 + $0xae4] ss:$16 sps:$4 sm:$0xff]  }
 0x2d8   :  { %4666 = vmatpush1.bf16.msra.mxu0 %v9606_v42  ;;  %v9677_v42 = vld [vmem:[#allocation6 + $0xaec] ss:$16 sps:$4 sm:$0xff]  }
 0x2d9   :  { %4667 = vmatprep.subr.bf16.mxu0 %v9614_v30  ;;  %v9680_v30 = vld [vmem:[#allocation6 + $0xb04] ss:$16 sps:$4 sm:$0xff]  }
 0x2da   :  { %5250 = vmatpush1.bf16.msra.mxu1 %v9609_v49  ;;  %v9675_v49 = vld [vmem:[#allocation6 + $0xae8] ss:$16 sps:$4 sm:$0xff]  }
 0x2db   :  { %5251 = vmatprep.subr.bf16.mxu1 %v9617_v40  ;;  %v9683_v40 = vld [vmem:[#allocation6 + $0xb0c] ss:$16 sps:$4 sm:$0xff]  }
 0x2dc   :  { %4668 = vmatpush1.bf16.msra.mxu0 %v9612_v44  ;;  %v9678_v44 = vld [vmem:[#allocation6 + $0xb00] ss:$16 sps:$4 sm:$0xff]  }
 0x2dd   :  { %4669 = vmatprep.subr.bf16.mxu0 %v9620_v27  ;;  %v9686_v27 = vld [vmem:[#allocation6 + $0xb24] ss:$16 sps:$4 sm:$0xff]  }
 0x2de   :  { %5252 = vmatpush1.bf16.msra.mxu1 %v9615_v17  ;;  %v9681_v17 = vld [vmem:[#allocation6 + $0xb08] ss:$16 sps:$4 sm:$0xff]  }
 0x2df   :  { %5253 = vmatprep.subr.bf16.mxu1 %v9623_v16  ;;  %v9689_v16 = vld [vmem:[#allocation6 + $0xb2c] ss:$16 sps:$4 sm:$0xff]  }
 0x2e0   :  { %4670 = vmatpush1.bf16.msra.mxu0 %v9618_v8  ;;  %v9684_v8 = vld [vmem:[#allocation6 + $0xb20] ss:$16 sps:$4 sm:$0xff]  }
 0x2e1   :  { %4671 = vmatprep.subr.bf16.mxu0 %v9626_v62  ;;  %v9695_v62 = vld [vmem:[#allocation6 + $0xb4c] ss:$16 sps:$4 sm:$0xff]  }
 0x2e2   :  { %5254 = vmatpush1.bf16.msra.mxu1 %v9621_v34  ;;  %v9692_v34 = vld [vmem:[#allocation6 + $0xb44] ss:$16 sps:$4 sm:$0xff]  }
 0x2e3   :  { %5255 = vmatprep.subr.bf16.mxu1 %v9629_v22  ;;  %v9690_v22 = vld [vmem:[#allocation6 + $0xb40] ss:$16 sps:$4 sm:$0xff]  }
 0x2e4   :  { %4672 = vmatpush1.bf16.msra.mxu0 %v9624_v35  ;;  %v9693_v35 = vld [vmem:[#allocation6 + $0xb48] ss:$16 sps:$4 sm:$0xff]  }
 0x2e5   :  { %4714 = vmatprep.subr.bf16.mxu0 %v9632_v25  ;;  %v9701_v25 = vld [vmem:[#allocation6 + $0xb6c] ss:$16 sps:$4 sm:$0xff]  }
 0x2e6   :  { %5256 = vmatpush1.bf16.msra.mxu1 %v9627_v9  ;;  %v9698_v9 = vld [vmem:[#allocation6 + $0xb64] ss:$16 sps:$4 sm:$0xff]  }
 0x2e7   :  { %5298 = vmatprep.subr.bf16.mxu1 %v9635_v41  ;;  %4674 = vmatmul.mubr.bf16.vlgmr.msra.gmra.mrb[72].mxu0 %v11365_v14  ;;  %v9696_v41 = vld [vmem:[#allocation6 + $0xb60] ss:$16 sps:$4 sm:$0xff]  }
 0x2e8   :  { %4683 = vmatprep.mubr.bf16.mxu0 %v11546_v39  ;;  %4715 = vmatpush1.bf16.msra.mxu0 %v9630_v53  ;;  %v9699_v53 = vld [vmem:[#allocation6 + $0xb68] ss:$16 sps:$4 sm:$0xff]  }
 0x2e9   :  { %5258 = vmatmul.mubr.bf16.vlgmr.msra.gmra.mrb[72].mxu1 %v11365_v14  ;;  %4716 = vmatprep.subr.bf16.mxu0 %v9638_v2  ;;  %v9653_v14 = vld [vmem:[#allocation6 + $0xa6c] ss:$16 sps:$4 sm:$0xff]  }
 0x2ea   :  { %5267 = vmatprep.mubr.bf16.mxu1 %v11546_v39  ;;  %5299 = vmatpush1.bf16.msra.mxu1 %v9633_v38  ;;  %v9648_v39 = vld [vmem:[#allocation6 + $0xa60] ss:$16 sps:$4 sm:$0xff]   ;;  %v9704_v38 = vld [vmem:[#allocation6 + $0xb84] ss:$16 sps:$4 sm:$0xff]   ;;  %v9707_v2 = vld [vmem:[#allocation6 + $0xb8c] ss:$16 sps:$4 sm:$0xff]  }
 0x2eb   :  { %5300 = vmatprep.subr.bf16.mxu1 %v9641_v33  ;;  %v9702_v33 = vld [vmem:[#allocation6 + $0xb80] ss:$16 sps:$4 sm:$0xff]  }
 0x2ec   :  { %4717 = vmatpush1.bf16.msra.mxu0 %v9636_v5  ;;  %v9705_v5 = vld [vmem:[#allocation6 + $0xb88] ss:$16 sps:$4 sm:$0xff]  }
 0x2ed   :  { %4718 = vmatprep.subr.bf16.mxu0 %v9644_v31  ;;  %v9713_v31 = vld [vmem:[#allocation6 + $0xbac] ss:$16 sps:$4 sm:$0xff]  }
 0x2ee   :  { %5301 = vmatpush1.bf16.msra.mxu1 %v9639_v46  ;;  %v9710_v46 = vld [vmem:[#allocation6 + $0xba4] ss:$16 sps:$4 sm:$0xff]  }
 0x2ef   :  { %4684 = vmatmul.mubr.bf16.gmra.mrb[76].mxu0 %v11401_v50  ;;  %5302 = vmatprep.subr.bf16.mxu1 %v9647_v61  ;;  %v9708_v61 = vld [vmem:[#allocation6 + $0xba0] ss:$16 sps:$4 sm:$0xff]  }
 0x2f0   :  { %4693 = vmatprep.mubr.bf16.mxu0 %v11555_v56  ;;  %4719 = vmatpush1.bf16.msra.mxu0 %v9642_v7  ;;  %v9711_v7 = vld [vmem:[#allocation6 + $0xba8] ss:$16 sps:$4 sm:$0xff]  }
 0x2f1   :  { %5268 = vmatmul.mubr.bf16.gmra.mrb[76].mxu1 %v11401_v50  ;;  %4720 = vmatprep.subr.bf16.mxu0 %v9650_v36  ;;  %v9719_v36 = vld [vmem:[#allocation6 + $0xbcc] ss:$16 sps:$4 sm:$0xff]  }
 0x2f2   :  { %5277 = vmatprep.mubr.bf16.mxu1 %v11555_v56  ;;  %5303 = vmatpush1.bf16.msra.mxu1 %v9645_v28  ;;  %v9660_v56 = vld [vmem:[#allocation6 + $0xaa0] ss:$16 sps:$4 sm:$0xff]   ;;  %v9716_v28 = vld [vmem:[#allocation6 + $0xbc4] ss:$16 sps:$4 sm:$0xff]  }
 0x2f3   :  { %5304 = vmatprep.subr.bf16.mxu1 %v9653_v14  ;;  %v9714_v14 = vld [vmem:[#allocation6 + $0xbc0] ss:$16 sps:$4 sm:$0xff]  }
 0x2f4   :  { %4721 = vmatpush1.bf16.msra.mxu0 %v9648_v39  ;;  %v9717_v39 = vld [vmem:[#allocation6 + $0xbc8] ss:$16 sps:$4 sm:$0xff]  }
 0x2f5   :  { %4722 = vmatprep.subr.bf16.mxu0 %v9656_v47  ;;  %v9725_v47 = vld [vmem:[#allocation6 + $0xbec] ss:$16 sps:$4 sm:$0xff]  }
 0x2f6   :  { %5305 = vmatpush1.bf16.msra.mxu1 %v9651_v18  ;;  %v9722_v18 = vld [vmem:[#allocation6 + $0xbe4] ss:$16 sps:$4 sm:$0xff]  }
 0x2f7   :  { %4694 = vmatmul.mubr.bf16.gmra.mrb[80].mxu0 %v11451_v12  ;;  %5306 = vmatprep.subr.bf16.mxu1 %v9659_v63  ;;  %v9720_v63 = vld [vmem:[#allocation6 + $0xbe0] ss:$16 sps:$4 sm:$0xff]  }
 0x2f8   :  { %4703 = vmatprep.mubr.bf16.mxu0 %v11525_v1  ;;  %4723 = vmatpush1.bf16.msra.mxu0 %v9654_v52  ;;  %v9723_v52 = vld [vmem:[#allocation6 + $0xbe8] ss:$16 sps:$4 sm:$0xff]  }
 0x2f9   :  { %5278 = vmatmul.mubr.bf16.gmra.mrb[80].mxu1 %v11451_v12  ;;  %4724 = vmatprep.subr.bf16.mxu0 %v9662_v37  ;;  %v9731_v37 = vld [vmem:[#allocation6 + $0xc0c] ss:$16 sps:$4 sm:$0xff]  }
 0x2fa   :  { %5287 = vmatprep.mubr.bf16.mxu1 %v11525_v1  ;;  %5307 = vmatpush1.bf16.msra.mxu1 %v9657_v32  ;;  %v9672_v1 = vld [vmem:[#allocation6 + $0xae0] ss:$16 sps:$4 sm:$0xff]   ;;  %v9728_v32 = vld [vmem:[#allocation6 + $0xc04] ss:$16 sps:$4 sm:$0xff]  }
 0x2fb   :  { %5308 = vmatprep.subr.bf16.mxu1 %v9665_v54  ;;  %v9726_v54 = vld [vmem:[#allocation6 + $0xc00] ss:$16 sps:$4 sm:$0xff]  }
 0x2fc   :  { %4725 = vmatpush1.bf16.msra.mxu0 %v9660_v56  ;;  %v9729_v56 = vld [vmem:[#allocation6 + $0xc08] ss:$16 sps:$4 sm:$0xff]  }
 0x2fd   :  { %4726 = vmatprep.subr.bf16.mxu0 %v9668_v24  ;;  %v9737_v24 = vld [vmem:[#allocation6 + $0xc2c] ss:$16 sps:$4 sm:$0xff]  }
 0x2fe   :  { %5309 = vmatpush1.bf16.msra.mxu1 %v9663_v13  ;;  %v9734_v13 = vld [vmem:[#allocation6 + $0xc24] ss:$16 sps:$4 sm:$0xff]  }
 0x2ff   :  { %4704 = vmatmul.mubr.bf16.gmra.mrb[84].mxu0 %v11484_v60  ;;  %5310 = vmatprep.subr.bf16.mxu1 %v9671_v59  ;;  %v9732_v59 = vld [vmem:[#allocation6 + $0xc20] ss:$16 sps:$4 sm:$0xff]  }
 0x300   :  { %4746 = vmatprep.mubr.bf16.mxu0 %v11572_v55  ;;  %4727 = vmatpush1.bf16.msra.mxu0 %v9666_v51  ;;  %v9735_v51 = vld [vmem:[#allocation6 + $0xc28] ss:$16 sps:$4 sm:$0xff]  }
 0x301   :  { %5288 = vmatmul.mubr.bf16.gmra.mrb[84].mxu1 %v11484_v60  ;;  %4728 = vmatprep.subr.bf16.mxu0 %v9674_v26  ;;  %v9743_v26 = vld [vmem:[#allocation6 + $0xc4c] ss:$16 sps:$4 sm:$0xff]  }
 0x302   :  { %5330 = vmatprep.mubr.bf16.mxu1 %v11572_v55  ;;  %5311 = vmatpush1.bf16.msra.mxu1 %v9669_v19  ;;  %v9687_v55 = vld [vmem:[#allocation6 + $0xb28] ss:$16 sps:$4 sm:$0xff]   ;;  %v9740_v19 = vld [vmem:[#allocation6 + $0xc44] ss:$16 sps:$4 sm:$0xff]  }
 0x303   :  { %5312 = vmatprep.subr.bf16.mxu1 %v9677_v42  ;;  %v9738_v42 = vld [vmem:[#allocation6 + $0xc40] ss:$16 sps:$4 sm:$0xff]  }
 0x304   :  { %4729 = vmatpush1.bf16.msra.mxu0 %v9672_v1  ;;  %v9741_v1 = vld [vmem:[#allocation6 + $0xc48] ss:$16 sps:$4 sm:$0xff]  }
 0x305   :  { %4730 = vmatprep.subr.bf16.mxu0 %v9680_v30  ;;  %v9747_v30 = vld [vmem:[#allocation6 + $0xc68] ss:$16 sps:$4 sm:$0xff]  }
 0x306   :  { %5313 = vmatpush1.bf16.msra.mxu1 %v9675_v49  ;;  %v9746_v49 = vld [vmem:[#allocation6 + $0xc64] ss:$16 sps:$4 sm:$0xff]  }
 0x307   :  { %5314 = vmatprep.subr.bf16.mxu1 %v9683_v40  ;;  %v9752_v40 = vld [vmem:[#allocation6 + $0xc84] ss:$16 sps:$4 sm:$0xff]  }
 0x308   :  { %4731 = vmatpush1.bf16.msra.mxu0 %v9678_v44  ;;  %v9755_v44 = vld [vmem:[#allocation6 + $0xc8c] ss:$16 sps:$4 sm:$0xff]  }
 0x309   :  { %4732 = vmatprep.subr.bf16.mxu0 %v9686_v27  ;;  %v9753_v27 = vld [vmem:[#allocation6 + $0xc88] ss:$16 sps:$4 sm:$0xff]  }
 0x30a   :  { %5315 = vmatpush1.bf16.msra.mxu1 %v9681_v17  ;;  %v9750_v17 = vld [vmem:[#allocation6 + $0xc80] ss:$16 sps:$4 sm:$0xff]  }
 0x30b   :  { %5316 = vmatprep.subr.bf16.mxu1 %v9689_v16  ;;  %v9758_v16 = vld [vmem:[#allocation6 + $0xca4] ss:$16 sps:$4 sm:$0xff]  }
 0x30c   :  { %4733 = vmatpush1.bf16.msra.mxu0 %v9684_v8  ;;  %v9759_v8 = vld [vmem:[#allocation6 + $0xca8] ss:$16 sps:$4 sm:$0xff]  }
 0x30d   :  { %4734 = vmatprep.subr.bf16.mxu0 %v9692_v34  ;;  %v9767_v34 = vld [vmem:[#allocation6 + $0xccc] ss:$16 sps:$4 sm:$0xff]  }
 0x30e   :  { %5317 = vmatpush1.bf16.msra.mxu1 %v9687_v55  ;;  %v9764_v55 = vld [vmem:[#allocation6 + $0xcc4] ss:$16 sps:$4 sm:$0xff]  }
 0x30f   :  { %5318 = vmatprep.subr.bf16.mxu1 %v9695_v62  ;;  %v9762_v62 = vld [vmem:[#allocation6 + $0xcc0] ss:$16 sps:$4 sm:$0xff]  }
 0x310   :  { %4735 = vmatpush1.bf16.msra.mxu0 %v9690_v22  ;;  %v9765_v22 = vld [vmem:[#allocation6 + $0xcc8] ss:$16 sps:$4 sm:$0xff]  }
 0x311   :  { %4736 = vmatprep.subr.bf16.mxu0 %v9698_v9  ;;  %v9771_v9 = vld [vmem:[#allocation6 + $0xce8] ss:$16 sps:$4 sm:$0xff]  }
 0x312   :  { %5319 = vmatpush1.bf16.msra.mxu1 %v9693_v35  ;;  %v9770_v35 = vld [vmem:[#allocation6 + $0xce4] ss:$16 sps:$4 sm:$0xff]  }
 0x313   :  { %5320 = vmatprep.subr.bf16.mxu1 %v9701_v25  ;;  %v9776_v25 = vld [vmem:[#allocation6 + $0xd04] ss:$16 sps:$4 sm:$0xff]  }
 0x314   :  { %4737 = vmatpush1.bf16.msra.mxu0 %v9696_v41  ;;  %v9779_v41 = vld [vmem:[#allocation6 + $0xd0c] ss:$16 sps:$4 sm:$0xff]  }
 0x315   :  { %4738 = vmatprep.subr.bf16.mxu0 %v9704_v38  ;;  %v9777_v38 = vld [vmem:[#allocation6 + $0xd08] ss:$16 sps:$4 sm:$0xff]  }
 0x316   :  { %5321 = vmatpush1.bf16.msra.mxu1 %v9699_v53  ;;  %v9774_v53 = vld [vmem:[#allocation6 + $0xd00] ss:$16 sps:$4 sm:$0xff]  }
 0x317   :  { %5322 = vmatprep.subr.bf16.mxu1 %v9707_v2  ;;  %v9782_v2 = vld [vmem:[#allocation6 + $0xd24] ss:$16 sps:$4 sm:$0xff]  }
 0x318   :  { %4739 = vmatpush1.bf16.msra.mxu0 %v9702_v33  ;;  %v9780_v33 = vld [vmem:[#allocation6 + $0xd20] ss:$16 sps:$4 sm:$0xff]  }
 0x319   :  { %4740 = vmatprep.subr.bf16.mxu0 %v9710_v46  ;;  %v9791_v46 = vld [vmem:[#allocation6 + $0xd4c] ss:$16 sps:$4 sm:$0xff]  }
 0x31a   :  { %5323 = vmatpush1.bf16.msra.mxu1 %v9705_v5  ;;  %v9788_v5 = vld [vmem:[#allocation6 + $0xd44] ss:$16 sps:$4 sm:$0xff]  }
 0x31b   :  { %5324 = vmatprep.subr.bf16.mxu1 %v9713_v31  ;;  %v9786_v31 = vld [vmem:[#allocation6 + $0xd40] ss:$16 sps:$4 sm:$0xff]  }
 0x31c   :  { %4741 = vmatpush1.bf16.msra.mxu0 %v9708_v61  ;;  %v9789_v61 = vld [vmem:[#allocation6 + $0xd48] ss:$16 sps:$4 sm:$0xff]  }
 0x31d   :  { %4742 = vmatprep.subr.bf16.mxu0 %v9716_v28  ;;  %v9797_v28 = vld [vmem:[#allocation6 + $0xd6c] ss:$16 sps:$4 sm:$0xff]  }
 0x31e   :  { %5325 = vmatpush1.bf16.msra.mxu1 %v9711_v7  ;;  %v9794_v7 = vld [vmem:[#allocation6 + $0xd64] ss:$16 sps:$4 sm:$0xff]  }
 0x31f   :  { %5326 = vmatprep.subr.bf16.mxu1 %v9719_v36  ;;  %v9792_v36 = vld [vmem:[#allocation6 + $0xd60] ss:$16 sps:$4 sm:$0xff]  }
 0x320   :  { %4743 = vmatpush1.bf16.msra.mxu0 %v9714_v14  ;;  %v9795_v14 = vld [vmem:[#allocation6 + $0xd68] ss:$16 sps:$4 sm:$0xff]  }
 0x321   :  { %4744 = vmatprep.subr.bf16.mxu0 %v9722_v18  ;;  %v9803_v18 = vld [vmem:[#allocation6 + $0xd8c] ss:$16 sps:$4 sm:$0xff]  }
 0x322   :  { %5327 = vmatpush1.bf16.msra.mxu1 %v9717_v39  ;;  %v9800_v39 = vld [vmem:[#allocation6 + $0xd84] ss:$16 sps:$4 sm:$0xff]  }
 0x323   :  { %5328 = vmatprep.subr.bf16.mxu1 %v9725_v47  ;;  %v9798_v47 = vld [vmem:[#allocation6 + $0xd80] ss:$16 sps:$4 sm:$0xff]  }
 0x324   :  { %4745 = vmatpush1.bf16.msra.mxu0 %v9720_v63  ;;  %v9801_v63 = vld [vmem:[#allocation6 + $0xd88] ss:$16 sps:$4 sm:$0xff]  }
 0x325   :  { %4787 = vmatprep.subr.bf16.mxu0 %v9728_v32  ;;  %v9809_v32 = vld [vmem:[#allocation6 + $0xdac] ss:$16 sps:$4 sm:$0xff]  }
 0x326   :  { %5329 = vmatpush1.bf16.msra.mxu1 %v9723_v52  ;;  %v9806_v52 = vld [vmem:[#allocation6 + $0xda4] ss:$16 sps:$4 sm:$0xff]  }
 0x327   :  { %5371 = vmatprep.subr.bf16.mxu1 %v9731_v37  ;;  %4747 = vmatmul.mubr.bf16.vlgmr.msra.gmra.mrb[72].mxu0 %v11582_v0  ;;  %v9804_v37 = vld [vmem:[#allocation6 + $0xda0] ss:$16 sps:$4 sm:$0xff]  }
 0x328   :  { %4756 = vmatprep.mubr.bf16.mxu0 %v11586_v11  ;;  %4788 = vmatpush1.bf16.msra.mxu0 %v9726_v54  ;;  %v9807_v54 = vld [vmem:[#allocation6 + $0xda8] ss:$16 sps:$4 sm:$0xff]  }
 0x329   :  { %5331 = vmatmul.mubr.bf16.vlgmr.msra.gmra.mrb[72].mxu1 %v11582_v0  ;;  %4789 = vmatprep.subr.bf16.mxu0 %v9734_v13  ;;  %v9749_v0 = vld [vmem:[#allocation6 + $0xc6c] ss:$16 sps:$4 sm:$0xff]  }
 0x32a   :  { %5340 = vmatprep.mubr.bf16.mxu1 %v11586_v11  ;;  %5372 = vmatpush1.bf16.msra.mxu1 %v9729_v56  ;;  %v9744_v11 = vld [vmem:[#allocation6 + $0xc60] ss:$16 sps:$4 sm:$0xff]   ;;  %v9812_v56 = vld [vmem:[#allocation6 + $0xdc4] ss:$16 sps:$4 sm:$0xff]   ;;  %v9815_v13 = vld [vmem:[#allocation6 + $0xdcc] ss:$16 sps:$4 sm:$0xff]  }
 0x32b   :  { %5373 = vmatprep.subr.bf16.mxu1 %v9737_v24  ;;  %v9810_v24 = vld [vmem:[#allocation6 + $0xdc0] ss:$16 sps:$4 sm:$0xff]  }
 0x32c   :  { %4790 = vmatpush1.bf16.msra.mxu0 %v9732_v59  ;;  %v9813_v59 = vld [vmem:[#allocation6 + $0xdc8] ss:$16 sps:$4 sm:$0xff]  }
 0x32d   :  { %4791 = vmatprep.subr.bf16.mxu0 %v9740_v19  ;;  %v9821_v19 = vld [vmem:[#allocation6 + $0xdec] ss:$16 sps:$4 sm:$0xff]  }
 0x32e   :  { %5374 = vmatpush1.bf16.msra.mxu1 %v9735_v51  ;;  %v9818_v51 = vld [vmem:[#allocation6 + $0xde4] ss:$16 sps:$4 sm:$0xff]  }
 0x32f   :  { %4757 = vmatmul.mubr.bf16.gmra.mrb[76].mxu0 %v11593_v43  ;;  %5375 = vmatprep.subr.bf16.mxu1 %v9743_v26  ;;  %v9816_v26 = vld [vmem:[#allocation6 + $0xde0] ss:$16 sps:$4 sm:$0xff]  }
 0x330   :  { %4766 = vmatprep.mubr.bf16.mxu0 %v11599_v6  ;;  %4792 = vmatpush1.bf16.msra.mxu0 %v9738_v42  ;;  %v9819_v42 = vld [vmem:[#allocation6 + $0xde8] ss:$16 sps:$4 sm:$0xff]  }
 0x331   :  { %5341 = vmatmul.mubr.bf16.gmra.mrb[76].mxu1 %v11593_v43  ;;  %4793 = vmatprep.subr.bf16.mxu0 %v9746_v49  ;;  %v9761_v43 = vld [vmem:[#allocation6 + $0xcac] ss:$16 sps:$4 sm:$0xff]  }
 0x332   :  { %5350 = vmatprep.mubr.bf16.mxu1 %v11599_v6  ;;  %5376 = vmatpush1.bf16.msra.mxu1 %v9741_v1  ;;  %v9756_v6 = vld [vmem:[#allocation6 + $0xca0] ss:$16 sps:$4 sm:$0xff]   ;;  %v9824_v1 = vld [vmem:[#allocation6 + $0xe04] ss:$16 sps:$4 sm:$0xff]   ;;  %v9827_v49 = vld [vmem:[#allocation6 + $0xe0c] ss:$16 sps:$4 sm:$0xff]  }
 0x333   :  { %5377 = vmatprep.subr.bf16.mxu1 %v9749_v0  ;;  %v9822_v0 = vld [vmem:[#allocation6 + $0xe00] ss:$16 sps:$4 sm:$0xff]  }
 0x334   :  { %4794 = vmatpush1.bf16.msra.mxu0 %v9744_v11  ;;  %v9825_v11 = vld [vmem:[#allocation6 + $0xe08] ss:$16 sps:$4 sm:$0xff]  }
 0x335   :  { %4795 = vmatprep.subr.bf16.mxu0 %v9752_v40  ;;  %v9833_v40 = vld [vmem:[#allocation6 + $0xe2c] ss:$16 sps:$4 sm:$0xff]  }
 0x336   :  { %5378 = vmatpush1.bf16.msra.mxu1 %v9747_v30  ;;  %v9830_v30 = vld [vmem:[#allocation6 + $0xe24] ss:$16 sps:$4 sm:$0xff]  }
 0x337   :  { %4767 = vmatmul.mubr.bf16.gmra.mrb[80].mxu0 %v11607_v58  ;;  %5379 = vmatprep.subr.bf16.mxu1 %v9755_v44  ;;  %v9828_v44 = vld [vmem:[#allocation6 + $0xe20] ss:$16 sps:$4 sm:$0xff]  }
 0x338   :  { %4776 = vmatprep.mubr.bf16.mxu0 %v11531_v29  ;;  %4796 = vmatpush1.bf16.msra.mxu0 %v9750_v17  ;;  %v9831_v17 = vld [vmem:[#allocation6 + $0xe28] ss:$16 sps:$4 sm:$0xff]  }
 0x339   :  { %5351 = vmatmul.mubr.bf16.gmra.mrb[80].mxu1 %v11607_v58  ;;  %4797 = vmatprep.subr.bf16.mxu0 %v9758_v16  ;;  %v9773_v58 = vld [vmem:[#allocation6 + $0xcec] ss:$16 sps:$4 sm:$0xff]  }
 0x33a   :  { %5360 = vmatprep.mubr.bf16.mxu1 %v11531_v29  ;;  %5380 = vmatpush1.bf16.msra.mxu1 %v9753_v27  ;;  %v9768_v29 = vld [vmem:[#allocation6 + $0xce0] ss:$16 sps:$4 sm:$0xff]   ;;  %v9836_v27 = vld [vmem:[#allocation6 + $0xe44] ss:$16 sps:$4 sm:$0xff]   ;;  %v9839_v16 = vld [vmem:[#allocation6 + $0xe4c] ss:$16 sps:$4 sm:$0xff]  }
 0x33b   :  { %5381 = vmatprep.subr.bf16.mxu1 %v9761_v43  ;;  %v9834_v43 = vld [vmem:[#allocation6 + $0xe40] ss:$16 sps:$4 sm:$0xff]  }
 0x33c   :  { %4798 = vmatpush1.bf16.msra.mxu0 %v9756_v6  ;;  %v9837_v6 = vld [vmem:[#allocation6 + $0xe48] ss:$16 sps:$4 sm:$0xff]  }
 0x33d   :  { %4799 = vmatprep.subr.bf16.mxu0 %v9764_v55  ;;  %v9843_v55 = vld [vmem:[#allocation6 + $0xe68] ss:$16 sps:$4 sm:$0xff]  }
 0x33e   :  { %5382 = vmatpush1.bf16.msra.mxu1 %v9759_v8  ;;  %v9842_v8 = vld [vmem:[#allocation6 + $0xe64] ss:$16 sps:$4 sm:$0xff]  }
 0x33f   :  { %4777 = vmatmul.mubr.bf16.gmra.mrb[84].mxu0 %v11519_v45  ;;  %5383 = vmatprep.subr.bf16.mxu1 %v9767_v34  ;;  %v9848_v34 = vld [vmem:[#allocation6 + $0xe84] ss:$16 sps:$4 sm:$0xff]  }
 0x340   :  { %4819 = vmatprep.mubr.bf16.mxu0 %v11391_v3  ;;  %4800 = vmatpush1.bf16.msra.mxu0 %v9762_v62  ;;  %v9851_v62 = vld [vmem:[#allocation6 + $0xe8c] ss:$16 sps:$4 sm:$0xff]  }
 0x341   :  { %5361 = vmatmul.mubr.bf16.gmra.mrb[84].mxu1 %v11519_v45  ;;  %4801 = vmatprep.subr.bf16.mxu0 %v9770_v35  ;;  %v9785_v45 = vld [vmem:[#allocation6 + $0xd2c] ss:$16 sps:$4 sm:$0xff]   ;;  %v9849_v35 = vld [vmem:[#allocation6 + $0xe88] ss:$16 sps:$4 sm:$0xff]  }
 0x342   :  { %5403 = vmatprep.mubr.bf16.mxu1 %v11391_v3  ;;  %5384 = vmatpush1.bf16.msra.mxu1 %v9765_v22  ;;  %v9783_v3 = vld [vmem:[#allocation6 + $0xd28] ss:$16 sps:$4 sm:$0xff]   ;;  %v9846_v22 = vld [vmem:[#allocation6 + $0xe80] ss:$16 sps:$4 sm:$0xff]  }
 0x343   :  { %5385 = vmatprep.subr.bf16.mxu1 %v9773_v58  ;;  %v9854_v58 = vld [vmem:[#allocation6 + $0xea4] ss:$16 sps:$4 sm:$0xff]  }
 0x344   :  { %4802 = vmatpush1.bf16.msra.mxu0 %v9768_v29  ;;  %v9855_v29 = vld [vmem:[#allocation6 + $0xea8] ss:$16 sps:$4 sm:$0xff]  }
 0x345   :  { %4803 = vmatprep.subr.bf16.mxu0 %v9776_v25  ;;  %v9863_v25 = vld [vmem:[#allocation6 + $0xecc] ss:$16 sps:$4 sm:$0xff]  }
 0x346   :  { %5386 = vmatpush1.bf16.msra.mxu1 %v9771_v9  ;;  %v9860_v9 = vld [vmem:[#allocation6 + $0xec4] ss:$16 sps:$4 sm:$0xff]  }
 0x347   :  { %5387 = vmatprep.subr.bf16.mxu1 %v9779_v41  ;;  %v9858_v41 = vld [vmem:[#allocation6 + $0xec0] ss:$16 sps:$4 sm:$0xff]  }
 0x348   :  { %4804 = vmatpush1.bf16.msra.mxu0 %v9774_v53  ;;  %v9861_v53 = vld [vmem:[#allocation6 + $0xec8] ss:$16 sps:$4 sm:$0xff]  }
 0x349   :  { %4805 = vmatprep.subr.bf16.mxu0 %v9782_v2  ;;  %v9864_v2 = vld [vmem:[#allocation6 + $0xee0] ss:$16 sps:$4 sm:$0xff]  }
 0x34a   :  { %5388 = vmatpush1.bf16.msra.mxu1 %v9777_v38  ;;  %v9866_v38 = vld [vmem:[#allocation6 + $0xee4] ss:$16 sps:$4 sm:$0xff]  }
 0x34b   :  { %5389 = vmatprep.subr.bf16.mxu1 %v9785_v45  ;;  %v9867_v45 = vld [vmem:[#allocation6 + $0xee8] ss:$16 sps:$4 sm:$0xff]  }
 0x34c   :  { %4806 = vmatpush1.bf16.msra.mxu0 %v9780_v33  ;;  %v9872_v33 = vld [vmem:[#allocation9 + $0x4] ss:$16 sps:$4 sm:$0xff]  }
 0x34d   :  { %4807 = vmatprep.subr.bf16.mxu0 %v9788_v5  ;;  %v9870_v5 = vld [vmem:[#allocation9] ss:$16 sps:$4 sm:$0xff]  }
 0x34e   :  { %5390 = vmatpush1.bf16.msra.mxu1 %v9783_v3  ;;  %v9875_v3 = vld [vmem:[#allocation9 + $0xc] ss:$16 sps:$4 sm:$0xff]  }
 0x34f   :  { %5391 = vmatprep.subr.bf16.mxu1 %v9791_v46  ;;  %v9873_v46 = vld [vmem:[#allocation9 + $0x8] ss:$16 sps:$4 sm:$0xff]  }
 0x350   :  { %4808 = vmatpush1.bf16.msra.mxu0 %v9786_v31  ;;  %v9878_v31 = vld [vmem:[#allocation9 + $0x24] ss:$16 sps:$4 sm:$0xff]  }
 0x351   :  { %4809 = vmatprep.subr.bf16.mxu0 %v9794_v7  ;;  %v9879_v7 = vld [vmem:[#allocation9 + $0x28] ss:$16 sps:$4 sm:$0xff]  }
 0x352   :  { %5392 = vmatpush1.bf16.msra.mxu1 %v9789_v61  ;;  %v9876_v61 = vld [vmem:[#allocation9 + $0x20] ss:$16 sps:$4 sm:$0xff]  }
 0x353   :  { %5393 = vmatprep.subr.bf16.mxu1 %v9797_v28  ;;  %v9884_v28 = vld [vmem:[#allocation9 + $0x44] ss:$16 sps:$4 sm:$0xff]  }
 0x354   :  { %4810 = vmatpush1.bf16.msra.mxu0 %v9792_v36  ;;  %v9887_v36 = vld [vmem:[#allocation9 + $0x4c] ss:$16 sps:$4 sm:$0xff]  }
 0x355   :  { %4811 = vmatprep.subr.bf16.mxu0 %v9800_v39  ;;  %v9885_v39 = vld [vmem:[#allocation9 + $0x48] ss:$16 sps:$4 sm:$0xff]  }
 0x356   :  { %5394 = vmatpush1.bf16.msra.mxu1 %v9795_v14  ;;  %v9882_v14 = vld [vmem:[#allocation9 + $0x40] ss:$16 sps:$4 sm:$0xff]  }
 0x357   :  { %5395 = vmatprep.subr.bf16.mxu1 %v9803_v18  ;;  %v9890_v18 = vld [vmem:[#allocation9 + $0x64] ss:$16 sps:$4 sm:$0xff]  }
 0x358   :  { %4812 = vmatpush1.bf16.msra.mxu0 %v9798_v47  ;;  %v9888_v47 = vld [vmem:[#allocation9 + $0x60] ss:$16 sps:$4 sm:$0xff]  }
 0x359   :  { %4813 = vmatprep.subr.bf16.mxu0 %v9806_v52  ;;  %v9896_v52 = vld [vmem:[#allocation9 + $0x84] ss:$16 sps:$4 sm:$0xff]  }
 0x35a   :  { %5396 = vmatpush1.bf16.msra.mxu1 %v9801_v63  ;;  %v9891_v63 = vld [vmem:[#allocation9 + $0x68] ss:$16 sps:$4 sm:$0xff]  }
 0x35b   :  { %5397 = vmatprep.subr.bf16.mxu1 %v9809_v32  ;;  %v9899_v32 = vld [vmem:[#allocation9 + $0x8c] ss:$16 sps:$4 sm:$0xff]  }
 0x35c   :  { %4814 = vmatpush1.bf16.msra.mxu0 %v9804_v37  ;;  %v9894_v37 = vld [vmem:[#allocation9 + $0x80] ss:$16 sps:$4 sm:$0xff]  }
 0x35d   :  { %4815 = vmatprep.subr.bf16.mxu0 %v9812_v56  ;;  %v9902_v56 = vld [vmem:[#allocation9 + $0xa4] ss:$16 sps:$4 sm:$0xff]  }
 0x35e   :  { %5398 = vmatpush1.bf16.msra.mxu1 %v9807_v54  ;;  %v9897_v54 = vld [vmem:[#allocation9 + $0x88] ss:$16 sps:$4 sm:$0xff]  }
 0x35f   :  { %5399 = vmatprep.subr.bf16.mxu1 %v9815_v13  ;;  %v9900_v13 = vld [vmem:[#allocation9 + $0xa0] ss:$16 sps:$4 sm:$0xff]  }
 0x360   :  { %4816 = vmatpush1.bf16.msra.mxu0 %v9810_v24  ;;  %v9903_v24 = vld [vmem:[#allocation9 + $0xa8] ss:$16 sps:$4 sm:$0xff]  }
 0x361   :  { %4817 = vmatprep.subr.bf16.mxu0 %v9818_v51  ;;  %v9911_v51 = vld [vmem:[#allocation9 + $0xcc] ss:$16 sps:$4 sm:$0xff]  }
 0x362   :  { %5400 = vmatpush1.bf16.msra.mxu1 %v9813_v59  ;;  %v9908_v59 = vld [vmem:[#allocation9 + $0xc4] ss:$16 sps:$4 sm:$0xff]  }
 0x363   :  { %5401 = vmatprep.subr.bf16.mxu1 %v9821_v19  ;;  %v9906_v19 = vld [vmem:[#allocation9 + $0xc0] ss:$16 sps:$4 sm:$0xff]  }
 0x364   :  { %4818 = vmatpush1.bf16.msra.mxu0 %v9816_v26  ;;  %v9909_v26 = vld [vmem:[#allocation9 + $0xc8] ss:$16 sps:$4 sm:$0xff]  }
 0x365   :  { %4860 = vmatprep.subr.bf16.mxu0 %v9824_v1  ;;  %v9912_v1 = vld [vmem:[#allocation9 + $0xe0] ss:$16 sps:$4 sm:$0xff]  }
 0x366   :  { %5402 = vmatpush1.bf16.msra.mxu1 %v9819_v42  ;;  %v9914_v42 = vld [vmem:[#allocation9 + $0xe4] ss:$16 sps:$4 sm:$0xff]  }
 0x367   :  { %5444 = vmatprep.subr.bf16.mxu1 %v9827_v49  ;;  %4820 = vmatmul.mubr.bf16.vlgmr.msra.gmra.mrb[72].mxu0 %v11399_v57  ;;  %v9915_v49 = vld [vmem:[#allocation9 + $0xe8] ss:$16 sps:$4 sm:$0xff]  }
 0x368   :  { %4829 = vmatprep.mubr.bf16.mxu0 %v11429_v10  ;;  %4861 = vmatpush1.bf16.msra.mxu0 %v9822_v0  ;;  %v9920_v0 = vld [vmem:[#allocation9 + $0x104] ss:$16 sps:$4 sm:$0xff]  }
 0x369   :  { %5404 = vmatmul.mubr.bf16.vlgmr.msra.gmra.mrb[72].mxu1 %v11399_v57  ;;  %4862 = vmatprep.subr.bf16.mxu0 %v9830_v30  ;;  %v9845_v57 = vld [vmem:[#allocation6 + $0xe6c] ss:$16 sps:$4 sm:$0xff]   ;;  %v9918_v30 = vld [vmem:[#allocation9 + $0x100] ss:$16 sps:$4 sm:$0xff]  }
 0x36a   :  { %5413 = vmatprep.mubr.bf16.mxu1 %v11429_v10  ;;  %5445 = vmatpush1.bf16.msra.mxu1 %v9825_v11  ;;  %v9840_v10 = vld [vmem:[#allocation6 + $0xe60] ss:$16 sps:$4 sm:$0xff]  }
 0x36b   :  { %5446 = vmatprep.subr.bf16.mxu1 %v9833_v40  ;;  %v9923_v11 = vld [vmem:[#allocation9 + $0x10c] ss:$16 sps:$4 sm:$0xff]   ;;  %v9921_v40 = vld [vmem:[#allocation9 + $0x108] ss:$16 sps:$4 sm:$0xff]  }
 0x36c   :  { %4863 = vmatpush1.bf16.msra.mxu0 %v9828_v44  ;;  %v9926_v44 = vld [vmem:[#allocation9 + $0x124] ss:$16 sps:$4 sm:$0xff]  }
 0x36d   :  { %4864 = vmatprep.subr.bf16.mxu0 %v9836_v27  ;;  %v9924_v27 = vld [vmem:[#allocation9 + $0x120] ss:$16 sps:$4 sm:$0xff]  }
 0x36e   :  { %5447 = vmatpush1.bf16.msra.mxu1 %v9831_v17  ;;  %v9929_v17 = vld [vmem:[#allocation9 + $0x12c] ss:$16 sps:$4 sm:$0xff]  }
 0x36f   :  { %4830 = vmatmul.mubr.bf16.gmra.mrb[76].mxu0 %v11444_v23  ;;  %5448 = vmatprep.subr.bf16.mxu1 %v9839_v16  ;;  %v9932_v16 = vld [vmem:[#allocation9 + $0x144] ss:$16 sps:$4 sm:$0xff]  }
 0x370   :  { %4839 = vmatprep.mubr.bf16.mxu0 %v11474_v20  ;;  %4865 = vmatpush1.bf16.msra.mxu0 %v9834_v43  ;;  %v9935_v43 = vld [vmem:[#allocation9 + $0x14c] ss:$16 sps:$4 sm:$0xff]  }
 0x371   :  { %5414 = vmatmul.mubr.bf16.gmra.mrb[76].mxu1 %v11444_v23  ;;  %4866 = vmatprep.subr.bf16.mxu0 %v9842_v8  ;;  %v9857_v23 = vld [vmem:[#allocation6 + $0xeac] ss:$16 sps:$4 sm:$0xff]  }
 0x372   :  { %5423 = vmatprep.mubr.bf16.mxu1 %v11474_v20  ;;  %5449 = vmatpush1.bf16.msra.mxu1 %v9837_v6  ;;  %v9852_v20 = vld [vmem:[#allocation6 + $0xea0] ss:$16 sps:$4 sm:$0xff]   ;;  %v9933_v8 = vld [vmem:[#allocation9 + $0x148] ss:$16 sps:$4 sm:$0xff]  }
 0x373   :  { %5450 = vmatprep.subr.bf16.mxu1 %v9845_v57  ;;  %v9930_v6 = vld [vmem:[#allocation9 + $0x140] ss:$16 sps:$4 sm:$0xff]   ;;  %v9938_v57 = vld [vmem:[#allocation9 + $0x164] ss:$16 sps:$4 sm:$0xff]  }
 0x374   :  { %4867 = vmatpush1.bf16.msra.mxu0 %v9840_v10  ;;  %v9941_v10 = vld [vmem:[#allocation9 + $0x16c] ss:$16 sps:$4 sm:$0xff]  }
 0x375   :  { %4868 = vmatprep.subr.bf16.mxu0 %v9848_v34  ;;  %v9939_v34 = vld [vmem:[#allocation9 + $0x168] ss:$16 sps:$4 sm:$0xff]  }
 0x376   :  { %5451 = vmatpush1.bf16.msra.mxu1 %v9843_v55  ;;  %v9936_v55 = vld [vmem:[#allocation9 + $0x160] ss:$16 sps:$4 sm:$0xff]  }
 0x377   :  { %4840 = vmatmul.mubr.bf16.gmra.mrb[80].mxu0 %v11482_v15  ;;  %5452 = vmatprep.subr.bf16.mxu1 %v9851_v62  ;;  %v9944_v62 = vld [vmem:[#allocation9 + $0x184] ss:$16 sps:$4 sm:$0xff]  }
 0x378   :  { %4849 = vmatprep.mubr.bf16.mxu0 %v11506_v21  ;;  %4869 = vmatpush1.bf16.msra.mxu0 %v9846_v22  ;;  %v9947_v22 = vld [vmem:[#allocation9 + $0x18c] ss:$16 sps:$4 sm:$0xff]  }
 0x379   :  { %5424 = vmatmul.mubr.bf16.gmra.mrb[80].mxu1 %v11482_v15  ;;  %4870 = vmatprep.subr.bf16.mxu0 %v9854_v58  ;;  %v9869_v15 = vld [vmem:[#allocation6 + $0xeec] ss:$16 sps:$4 sm:$0xff]  }
 0x37a   :  { %5433 = vmatprep.mubr.bf16.mxu1 %v11506_v21  ;;  %5453 = vmatpush1.bf16.msra.mxu1 %v9849_v35  ;;  %v10463_v21 = vmov 0   ;;  %v9942_v35 = vld [vmem:[#allocation9 + $0x180] ss:$16 sps:$4 sm:$0xff]   ;;  %v9945_v58 = vld [vmem:[#allocation9 + $0x188] ss:$16 sps:$4 sm:$0xff]  }
 0x37b   :  { %5454 = vmatprep.subr.bf16.mxu1 %v9857_v23  ;;  %v9948_v23 = vld [vmem:[#allocation9 + $0x1a0] ss:$16 sps:$4 sm:$0xff]  }
 0x37c   :  { %4871 = vmatpush1.bf16.msra.mxu0 %v9852_v20  ;;  %v9950_v20 = vld [vmem:[#allocation9 + $0x1a4] ss:$16 sps:$4 sm:$0xff]  }
 0x37d   :  { %4872 = vmatprep.subr.bf16.mxu0 %v9860_v9  ;;  %v9953_v9 = vld [vmem:[#allocation9 + $0x1ac] ss:$16 sps:$4 sm:$0xff]  }
 0x37e   :  { %5455 = vmatpush1.bf16.msra.mxu1 %v9855_v29  ;;  %v9951_v29 = vld [vmem:[#allocation9 + $0x1a8] ss:$16 sps:$4 sm:$0xff]  }
 0x37f   :  { %4850 = vmatmul.mubr.bf16.gmra.mrb[84].mxu0 %v11508_v48  ;;  %5456 = vmatprep.subr.bf16.mxu1 %v9863_v25  ;;  %v9956_v25 = vld [vmem:[#allocation9 + $0x1c4] ss:$16 sps:$4 sm:$0xff]  }
 0x380   :  { %4892 = vmatprep.mubr.bf16.mxu0 %v10463_v21  ;;  %4873 = vmatpush1.bf16.msra.mxu0 %v9858_v41  ;;  %v9959_v41 = vld [vmem:[#allocation9 + $0x1cc] ss:$16 sps:$4 sm:$0xff]  }
 0x381   :  { %5434 = vmatmul.mubr.bf16.gmra.mrb[84].mxu1 %v11508_v48  ;;  %4874 = vmatprep.subr.bf16.mxu0 %v9866_v38  ;;  %v9881_v48 = vld [vmem:[#allocation9 + $0x2c] ss:$16 sps:$4 sm:$0xff]   ;;  %v9957_v38 = vld [vmem:[#allocation9 + $0x1c8] ss:$16 sps:$4 sm:$0xff]  }
 0x382   :  { %5476 = vmatprep.mubr.bf16.mxu1 %v10463_v21  ;;  %5457 = vmatpush1.bf16.msra.mxu1 %v9861_v53  ;;  %v9954_v53 = vld [vmem:[#allocation9 + $0x1c0] ss:$16 sps:$4 sm:$0xff]  }
 0x383   :  { %5458 = vmatprep.subr.bf16.mxu1 %v9869_v15  ;;  %v9960_v15 = vld [vmem:[#allocation9 + $0x1e0] ss:$16 sps:$4 sm:$0xff]  }
 0x384   :  { %4875 = vmatpush1.bf16.msra.mxu0 %v9864_v2  ;;  %v9963_v2 = vld [vmem:[#allocation9 + $0x1e8] ss:$16 sps:$4 sm:$0xff]  }
 0x385   :  { %7135 = vmatprep.subr.bf16.mxu0 %v9872_v33  ;;  %v9968_v33 = vld [vmem:[#allocation9 + $0x204] ss:$16 sps:$4 sm:$0xff]  }
 0x386   :  { %5459 = vmatpush1.bf16.msra.mxu1 %v9867_v45  ;;  %v9965_v45 = vld [vmem:[#allocation9 + $0x1ec] ss:$16 sps:$4 sm:$0xff]  }
 0x387   :  { %7299 = vmatprep.subr.bf16.mxu1 %v9875_v3  ;;  %4893 = vmatmul.mubr.bf16.vlgmr.msra.gmra.mrb[72].mxu0 %v11401_v50  ;;  %v9971_v3 = vld [vmem:[#allocation9 + $0x20c] ss:$16 sps:$4 sm:$0xff]  }
 0x388   :  { %4902 = vmatprep.mubr.bf16.mxu0 %v10463_v21  ;;  %7136 = vmatpush1.bf16.msra.mxu0 %v9870_v5 }
 0x389   :  { %5477 = vmatmul.mubr.bf16.vlgmr.msra.gmra.mrb[72].mxu1 %v11401_v50  ;;  %7137 = vmatprep.subr.bf16.mxu0 %v9878_v31  ;;  %v9893_v50 = vld [vmem:[#allocation9 + $0x6c] ss:$16 sps:$4 sm:$0xff]  }
 0x38a   :  { %5486 = vmatprep.mubr.bf16.mxu1 %v10463_v21  ;;  %7300 = vmatpush1.bf16.msra.mxu1 %v9873_v46 }
 0x38b   :  { %7301 = vmatprep.subr.bf16.mxu1 %v9881_v48  ;;  %v5533_v48 = vld [vmem:[#allocation7] sm:$0x3] }
 0x38c   :  { %7138 = vmatpush1.bf16.msra.mxu0 %v9876_v61 }
 0x38d   :  { %7139 = vmatprep.subr.bf16.mxu0 %v9884_v28 }
 0x38e   :  { %7302 = vmatpush1.bf16.msra.mxu1 %v9879_v7 }
 0x38f   :  { %4903 = vmatmul.mubr.bf16.gmra.mrb[76].mxu0 %v11451_v12  ;;  %7303 = vmatprep.subr.bf16.mxu1 %v9887_v36 }
 0x390   :  { %4912 = vmatprep.mubr.bf16.mxu0 %v10463_v21  ;;  %7140 = vmatpush1.bf16.msra.mxu0 %v9882_v14 }
 0x391   :  { %5487 = vmatmul.mubr.bf16.gmra.mrb[76].mxu1 %v11451_v12  ;;  %7141 = vmatprep.subr.bf16.mxu0 %v9890_v18  ;;  %v9905_v12 = vld [vmem:[#allocation9 + $0xac] ss:$16 sps:$4 sm:$0xff]  }
 0x392   :  { %5496 = vmatprep.mubr.bf16.mxu1 %v10463_v21  ;;  %7304 = vmatpush1.bf16.msra.mxu1 %v9885_v39 }
 0x393   :  { %7305 = vmatprep.subr.bf16.mxu1 %v9893_v50  ;;  %v11987_v50 = vld [vmem:[#allocation68_spill] sm:$0xff] }
 0x394   :  { %7142 = vmatpush1.bf16.msra.mxu0 %v9888_v47  ;;  %v11684_v47 = vrot.slane %v5533_v48, %v11987_v50 }
 0x395   :  { %7143 = vmatprep.subr.bf16.mxu0 %v9896_v52 }
 0x396   :  { %7306 = vmatpush1.bf16.msra.mxu1 %v9891_v63 }
 0x397   :  { %4913 = vmatmul.mubr.bf16.gmra.mrb[80].mxu0 %v11484_v60  ;;  %7307 = vmatprep.subr.bf16.mxu1 %v9899_v32  ;;  %v11988_v32 = vld [vmem:[#allocation67_spill] sm:$0xff] }
 0x398   :  { %4922 = vmatprep.mubr.bf16.mxu0 %v10463_v21  ;;  %7144 = vmatpush1.bf16.msra.mxu0 %v9894_v37  ;;  %v11687_v37 = vrot.slane %v5533_v48, %v11988_v32  ;;  %v9989_v48 = vld [vmem:[#allocation9 + $0x26c] ss:$16 sps:$4 sm:$0xff]  }
 0x399   :  { %5497 = vmatmul.mubr.bf16.gmra.mrb[80].mxu1 %v11484_v60  ;;  %7145 = vmatprep.subr.bf16.mxu0 %v9902_v56  ;;  %v9917_v60 = vld [vmem:[#allocation9 + $0xec] ss:$16 sps:$4 sm:$0xff]  }
 0x39a   :  { %5506 = vmatprep.mubr.bf16.mxu1 %v10463_v21  ;;  %7308 = vmatpush1.bf16.msra.mxu1 %v9897_v54  ;;  %v9962_v21 = vld [vmem:[#allocation9 + $0x1e4] ss:$16 sps:$4 sm:$0xff]  }
 0x39b   :  { %7309 = vmatprep.subr.bf16.mxu1 %v9905_v12 }
 0x39c   :  { %7146 = vmatpush1.bf16.msra.mxu0 %v9900_v13 }
 0x39d   :  { %7147 = vmatprep.subr.bf16.mxu0 %v9908_v59 }
 0x39e   :  { %7310 = vmatpush1.bf16.msra.mxu1 %v9903_v24 }
 0x39f   :  { %4923 = vmatmul.mubr.bf16.gmra.mrb[84].mxu0 %v11510_v4  ;;  %7311 = vmatprep.subr.bf16.mxu1 %v9911_v51 }
 0x3a0   :  { %7148 = vmatpush1.bf16.msra.mxu0 %v9906_v19 }
 0x3a1   :  { %5507 = vmatmul.mubr.bf16.gmra.mrb[84].mxu1 %v11510_v4  ;;  %7149 = vmatprep.subr.bf16.mxu0 %v9914_v42  ;;  %v9927_v4 = vld [vmem:[#allocation9 + $0x128] ss:$16 sps:$4 sm:$0xff]  }
 0x3a2   :  { %7312 = vmatpush1.bf16.msra.mxu1 %v9909_v26 }
 0x3a3   :  { %7313 = vmatprep.subr.bf16.mxu1 %v9917_v60 }
 0x3a4   :  { %7150 = vmatpush1.bf16.msra.mxu0 %v9912_v1 }
 0x3a5   :  { %7151 = vmatprep.subr.bf16.mxu0 %v9920_v0 }
 0x3a6   :  { %7314 = vmatpush1.bf16.msra.mxu1 %v9915_v49 }
 0x3a7   :  { %7315 = vmatprep.subr.bf16.mxu1 %v9923_v11 }
 0x3a8   :  { %7152 = vmatpush1.bf16.msra.mxu0 %v9918_v30 }
 0x3a9   :  { %7153 = vmatprep.subr.bf16.mxu0 %v9926_v44 }
 0x3aa   :  { %7316 = vmatpush1.bf16.msra.mxu1 %v9921_v40 }
 0x3ab   :  { %7317 = vmatprep.subr.bf16.mxu1 %v9929_v17 }
 0x3ac   :  { %7154 = vmatpush1.bf16.msra.mxu0 %v9924_v27  ;;  %v9966_v27 = vld [vmem:[#allocation9 + $0x200] ss:$16 sps:$4 sm:$0xff]  }
 0x3ad   :  { %7155 = vmatprep.subr.bf16.mxu0 %v9932_v16 }
 0x3ae   :  { %7318 = vmatpush1.bf16.msra.mxu1 %v9927_v4  ;;  %v9969_v4 = vld [vmem:[#allocation9 + $0x208] ss:$16 sps:$4 sm:$0xff]  }
 0x3af   :  { %7319 = vmatprep.subr.bf16.mxu1 %v9935_v43 }
 0x3b0   :  { %7156 = vmatpush1.bf16.msra.mxu0 %v9930_v6  ;;  %v9974_v6 = vld [vmem:[#allocation9 + $0x224] ss:$16 sps:$4 sm:$0xff]  }
 0x3b1   :  { %7157 = vmatprep.subr.bf16.mxu0 %v9938_v57 }
 0x3b2   :  { %7320 = vmatpush1.bf16.msra.mxu1 %v9933_v8  ;;  %v9977_v8 = vld [vmem:[#allocation9 + $0x22c] ss:$16 sps:$4 sm:$0xff]  }
 0x3b3   :  { %7321 = vmatprep.subr.bf16.mxu1 %v9941_v10 }
 0x3b4   :  { %7158 = vmatpush1.bf16.msra.mxu0 %v9936_v55 }
 0x3b5   :  { %7159 = vmatprep.subr.bf16.mxu0 %v9944_v62 }
 0x3b6   :  { %7322 = vmatpush1.bf16.msra.mxu1 %v9939_v34 }
 0x3b7   :  { %7323 = vmatprep.subr.bf16.mxu1 %v9947_v22 }
 0x3b8   :  { %7160 = vmatpush1.bf16.msra.mxu0 %v9942_v35  ;;  %v9972_v35 = vld [vmem:[#allocation9 + $0x220] ss:$16 sps:$4 sm:$0xff]  }
 0x3b9   :  { %7161 = vmatprep.subr.bf16.mxu0 %v9950_v20 }
 0x3ba   :  { %7324 = vmatpush1.bf16.msra.mxu1 %v9945_v58  ;;  %v9975_v58 = vld [vmem:[#allocation9 + $0x228] ss:$16 sps:$4 sm:$0xff]  }
 0x3bb   :  { %7325 = vmatprep.subr.bf16.mxu1 %v9953_v9  ;;  %v9980_v9 = vld [vmem:[#allocation9 + $0x244] ss:$16 sps:$4 sm:$0xff]  }
 0x3bc   :  { %7162 = vmatpush1.bf16.msra.mxu0 %v9948_v23 }
 0x3bd   :  { %7163 = vmatprep.subr.bf16.mxu0 %v9956_v25  ;;  %v9983_v25 = vld [vmem:[#allocation9 + $0x24c] ss:$16 sps:$4 sm:$0xff]  }
 0x3be   :  { %7326 = vmatpush1.bf16.msra.mxu1 %v9951_v29 }
 0x3bf   :  { %7327 = vmatprep.subr.bf16.mxu1 %v9959_v41 }
 0x3c0   :  { %7164 = vmatpush1.bf16.msra.mxu0 %v9954_v53 }
 0x3c1   :  { %7165 = vmatprep.subr.bf16.mxu0 %v9962_v21 }
 0x3c2   :  { %7328 = vmatpush1.bf16.msra.mxu1 %v9957_v38 }
 0x3c3   :  { %7329 = vmatprep.subr.bf16.mxu1 %v9965_v45 }
 0x3c4   :  { %7166 = vmatpush1.bf16.msra.mxu0 %v9960_v15 }
 0x3c5   :  { %7176 = vmatprep.subr.bf16.mxu0 %v9968_v33  ;;  %v9978_v33 = vld [vmem:[#allocation9 + $0x240] ss:$16 sps:$4 sm:$0xff]  }
 0x3c6   :  { %7330 = vmatpush1.bf16.msra.mxu1 %v9963_v2 }
 0x3c7   :  { %7340 = vmatprep.subr.bf16.mxu1 %v9971_v3 }
 0x45a   :  { %v4894_v5 = vpop.f32.mrb[72].mxu0 }
 0x45b   :  { %v4896_v31 = vpop.f32.mrb[73].mxu0 }
 0x45c   :  { %v5478_v46 = vpop.f32.mrb[72].mxu1  ;;  %v4898_v28 = vpop.f32.mrb[74].mxu0 }
 0x45d   :  { %v5517_v61 = vmax.f32 %v4894_v5, %v5478_v46  ;;  %v5480_v7 = vpop.f32.mrb[73].mxu1  ;;  %v4900_v39 = vpop.f32.mrb[75].mxu0  ;;  %v9981_v5 = vld [vmem:[#allocation9 + $0x248] ss:$16 sps:$4 sm:$0xff]  }
 0x45e   :  { %v5518_v36 = vmax.f32 %v4896_v31, %v5480_v7  ;;  %v5482_v14 = vpop.f32.mrb[74].mxu1  ;;  %v9986_v31 = vld [vmem:[#allocation9 + $0x264] ss:$16 sps:$4 sm:$0xff]  }
 0x45f   :  { %v5519_v18 = vmax.f32 %v4898_v28, %v5482_v14  ;;  %v5484_v63 = vpop.f32.mrb[75].mxu1 }
 0x460   :  { %v5520_v52 = vmax.f32 %v4900_v39, %v5484_v63  ;;  %v9987_v63 = vld [vmem:[#allocation9 + $0x268] ss:$16 sps:$4 sm:$0xff]  }
 0x461   :  { %v5534_v54 = vmax.f32 %v5517_v61, %v5519_v18  ;;  %v9984_v18 = vld [vmem:[#allocation9 + $0x260] ss:$16 sps:$4 sm:$0xff]  }
 0x462   :  { %v5535_v56 = vmax.f32 %v5518_v36, %v5520_v52  ;;  %v4904_v13 = vpop.f32.mrb[76].mxu0 }
 0x463   :  { %v5547_v12 = vadd.f32 %v11684_v47, %v5534_v54  ;;  %v4906_v51 = vpop.f32.mrb[77].mxu0 }
 0x464   :  { %v5548_v24 = vadd.f32 %v11687_v37, %v5535_v56  ;;  %v5488_v59 = vpop.f32.mrb[76].mxu1  ;;  %v4908_v60 = vpop.f32.mrb[78].mxu0 }
 0x465   :  { %v5549_v19 = vmax.f32 %v5547_v12, 0.0  ;;  %v5521_v26 = vmax.f32 %v4904_v13, %v5488_v59  ;;  %v5490_v42 = vpop.f32.mrb[77].mxu1  ;;  %v4910_v0 = vpop.f32.mrb[79].mxu0  ;;  %v9992_v12 = vld [vmem:[#allocation9 + $0x284] ss:$16 sps:$4 sm:$0xff]  }
 0x466   :  { %v5522_v1 = vmax.f32 %v4906_v51, %v5490_v42  ;;  %v5492_v49 = vpop.f32.mrb[78].mxu1  ;;  %v5550_v11 = vmax.f32 %v5548_v24, 0.0  ;;  %v9995_v13 = vld [vmem:[#allocation9 + $0x28c] ss:$16 sps:$4 sm:$0xff]  }
 0x467   :  { %v5523_v30 = vmax.f32 %v4908_v60, %v5492_v49  ;;  %v5494_v40 = vpop.f32.mrb[79].mxu1  ;;  %v5569_v16 = vpack.c.bf16 %v5549_v19, %v5549_v19  ;;  %v9990_v60 = vld [vmem:[#allocation9 + $0x280] ss:$16 sps:$4 sm:$0xff]  }
 0x468   :  { %v5524_v44 = vmax.f32 %v4910_v0, %v5494_v40  ;;  %v5570_v17 = vpack.c.bf16 %v5550_v11, %v5550_v11  ;;  %v9998_v0 = vld [vmem:[#allocation9 + $0x2a4] ss:$16 sps:$4 sm:$0xff]   ;;  %v10001_v11 = vld [vmem:[#allocation9 + $0x2ac] ss:$16 sps:$4 sm:$0xff]  }
 0x469   :  { %v5551_v43 = vmax.f32 %v5521_v26, %v5523_v30 }
 0x46a   :  { %v5552_v57 = vmax.f32 %v5522_v1, %v5524_v44  ;;  %7167 = vmatprep.mubr.bf16.mxu0 %v5570_v17  ;;  %7331 = vmatprep.mubr.bf16.mxu1 %v5570_v17  ;;  %v4914_v55 = vpop.f32.mrb[80].mxu0  ;;  %v9993_v1 = vld [vmem:[#allocation9 + $0x288] ss:$16 sps:$4 sm:$0xff]   ;;  %v9996_v17 = vld [vmem:[#allocation9 + $0x2a0] ss:$16 sps:$4 sm:$0xff]  }
 0x46b   :  { %v11692_v10 = vadd.f32 %v5551_v43, %v11684_v47  ;;  %7168 = vmatmul.mubr.bf16.vlgmr.msra.gmra.mrb[88].mxu0 %v5569_v16  ;;  %7332 = vmatmul.mubr.bf16.vlgmr.msra.gmra.mrb[88].mxu1 %v5569_v16  ;;  %v4916_v22 = vpop.f32.mrb[81].mxu0  ;;  %v10007_v16 = vld [vmem:[#allocation9 + $0x2cc] ss:$16 sps:$4 sm:$0xff]   ;;  %v10002_v43 = vld [vmem:[#allocation9 + $0x2c0] ss:$16 sps:$4 sm:$0xff]  }
 0x46c   :  { %v5554_v34 = vadd.f32 %v5552_v57, %v11687_v37  ;;  %7177 = vmatpush1.bf16.msra.mxu0 %v9966_v27  ;;  %7341 = vmatpush1.bf16.msra.mxu1 %v9969_v4  ;;  %v5498_v62 = vpop.f32.mrb[80].mxu1  ;;  %v4918_v29 = vpop.f32.mrb[82].mxu0  ;;  %v9999_v27 = vld [vmem:[#allocation9 + $0x2a8] ss:$16 sps:$4 sm:$0xff]   ;;  %v10004_v4 = vld [vmem:[#allocation9 + $0x2c4] ss:$16 sps:$4 sm:$0xff]  }
 0x46d   :  { %v5525_v23 = vmax.f32 %v4914_v55, %v5498_v62  ;;  %v5500_v20 = vpop.f32.mrb[81].mxu1  ;;  %7178 = vmatprep.subr.bf16.mxu0 %v9974_v6  ;;  %7342 = vmatprep.subr.bf16.mxu1 %v9977_v8  ;;  %v4920_v38 = vpop.f32.mrb[83].mxu0  ;;  %v10005_v6 = vld [vmem:[#allocation9 + $0x2c8] ss:$16 sps:$4 sm:$0xff]   ;;  %v10010_v8 = vld [vmem:[#allocation9 + $0x2e4] ss:$16 sps:$4 sm:$0xff]  }
 0x46e   :  { %v5526_v41 = vmax.f32 %v4916_v22, %v5500_v20  ;;  %v5502_v53 = vpop.f32.mrb[82].mxu1  ;;  %v5556_v15 = vmax.f32 %v5554_v34, 0.0  ;;  %v10011_v57 = vld [vmem:[#allocation9 + $0x2e8] ss:$16 sps:$4 sm:$0xff]   ;;  %v10016_v55 = vld [vmem:[#allocation9 + $0x304] ss:$16 sps:$4 sm:$0xff]  }
 0x46f   :  { %v5527_v21 = vmax.f32 %v4918_v29, %v5502_v53  ;;  %v5504_v2 = vpop.f32.mrb[83].mxu1  ;;  %v10019_v34 = vld [vmem:[#allocation9 + $0x30c] ss:$16 sps:$4 sm:$0xff]   ;;  %v10014_v62 = vld [vmem:[#allocation9 + $0x300] ss:$16 sps:$4 sm:$0xff]  }
 0x470   :  { %v5528_v45 = vmax.f32 %v4920_v38, %v5504_v2  ;;  %7179 = vmatpush1.bf16.msra.mxu0 %v9972_v35  ;;  %7343 = vmatpush1.bf16.msra.mxu1 %v9975_v58  ;;  %v5572_v3 = vpack.c.bf16 %v5556_v15, %v5556_v15  ;;  %v10017_v22 = vld [vmem:[#allocation9 + $0x308] ss:$16 sps:$4 sm:$0xff]   ;;  %v10022_v35 = vld [vmem:[#allocation9 + $0x324] ss:$16 sps:$4 sm:$0xff]   ;;  %v10025_v58 = vld [vmem:[#allocation9 + $0x32c] ss:$16 sps:$4 sm:$0xff]  }
 0x471   :  { %v5557_v46 = vmax.f32 %v5525_v23, %v5527_v21  ;;  %7180 = vmatprep.subr.bf16.mxu0 %v9980_v9  ;;  %7344 = vmatprep.subr.bf16.mxu1 %v9983_v25  ;;  %v10020_v23 = vld [vmem:[#allocation9 + $0x320] ss:$16 sps:$4 sm:$0xff]   ;;  %v10023_v20 = vld [vmem:[#allocation9 + $0x328] ss:$16 sps:$4 sm:$0xff]   ;;  %v10028_v29 = vld [vmem:[#allocation9 + $0x344] ss:$16 sps:$4 sm:$0xff]  }
 0x472   :  { %v5558_v61 = vmax.f32 %v5526_v41, %v5528_v45  ;;  %7208 = vmatprep.mubr.bf16.mxu0 %v5572_v3  ;;  %7372 = vmatprep.mubr.bf16.mxu1 %v5572_v3  ;;  %v4924_v28 = vpop.f32.mrb[84].mxu0  ;;  %v10031_v9 = vld [vmem:[#allocation9 + $0x34c] ss:$16 sps:$4 sm:$0xff]   ;;  %v10026_v25 = vld [vmem:[#allocation9 + $0x340] ss:$16 sps:$4 sm:$0xff]  }
 0x473   :  { %v11696_v7 = vadd.f32 %v5557_v46, %v11684_v47  ;;  %v4926_v39 = vpop.f32.mrb[85].mxu0  ;;  %v10029_v41 = vld [vmem:[#allocation9 + $0x348] ss:$16 sps:$4 sm:$0xff]   ;;  %v10034_v53 = vld [vmem:[#allocation9 + $0x364] ss:$16 sps:$4 sm:$0xff]  }
 0x474   :  { %v11699_v36 = vadd.f32 %v5558_v61, %v11687_v37  ;;  %7181 = vmatpush1.bf16.msra.mxu0 %v9978_v33  ;;  %7345 = vmatpush1.bf16.msra.mxu1 %v9981_v5  ;;  %v5508_v14 = vpop.f32.mrb[84].mxu1  ;;  %v4928_v56 = vpop.f32.mrb[86].mxu0  ;;  %v10037_v38 = vld [vmem:[#allocation9 + $0x36c] ss:$16 sps:$4 sm:$0xff]   ;;  %v10032_v15 = vld [vmem:[#allocation9 + $0x360] ss:$16 sps:$4 sm:$0xff]  }
 0x475   :  { %v5529_v52 = vmax.f32 %v4924_v28, %v5508_v14  ;;  %v5510_v54 = vpop.f32.mrb[85].mxu1  ;;  %7182 = vmatprep.subr.bf16.mxu0 %v9986_v31  ;;  %7346 = vmatprep.subr.bf16.mxu1 %v9989_v48  ;;  %v4930_v51 = vpop.f32.mrb[87].mxu0  ;;  %v10035_v21 = vld [vmem:[#allocation9 + $0x368] ss:$16 sps:$4 sm:$0xff]   ;;  %v10040_v2 = vld [vmem:[#allocation9 + $0x384] ss:$16 sps:$4 sm:$0xff]  }
 0x476   :  { %v5530_v24 = vmax.f32 %v4926_v39, %v5510_v54  ;;  %v5512_v59 = vpop.f32.mrb[86].mxu1  ;;  %v10043_v45 = vld [vmem:[#allocation9 + $0x38c] ss:$16 sps:$4 sm:$0xff]   ;;  %v10038_v33 = vld [vmem:[#allocation9 + $0x380] ss:$16 sps:$4 sm:$0xff]  }
 0x477   :  { %v5531_v19 = vmax.f32 %v4928_v56, %v5512_v59  ;;  %v5514_v26 = vpop.f32.mrb[87].mxu1  ;;  %v10041_v3 = vld [vmem:[#allocation9 + $0x388] ss:$16 sps:$4 sm:$0xff]   ;;  %v10046_v5 = vld [vmem:[#allocation9 + $0x3a4] ss:$16 sps:$4 sm:$0xff]   ;;  %v5555_v56 = vmax.f32 %v11692_v10, 0.0 }
 0x478   :  { %v5532_v42 = vmax.f32 %v4930_v51, %v5514_v26  ;;  %7183 = vmatpush1.bf16.msra.mxu0 %v9984_v18  ;;  %7347 = vmatpush1.bf16.msra.mxu1 %v9987_v63  ;;  %v10049_v46 = vld [vmem:[#allocation9 + $0x3ac] ss:$16 sps:$4 sm:$0xff]   ;;  %v10044_v31 = vld [vmem:[#allocation9 + $0x3a0] ss:$16 sps:$4 sm:$0xff]   ;;  %v10047_v48 = vld [vmem:[#allocation9 + $0x3a8] ss:$16 sps:$4 sm:$0xff]  }
 0x479   :  { %v5563_v49 = vmax.f32 %v5529_v52, %v5531_v19  ;;  %7184 = vmatprep.subr.bf16.mxu0 %v9992_v12  ;;  %7348 = vmatprep.subr.bf16.mxu1 %v9995_v13  ;;  %v10052_v61 = vld [vmem:[#allocation9 + $0x3c4] ss:$16 sps:$4 sm:$0xff]   ;;  %v10055_v28 = vld [vmem:[#allocation9 + $0x3cc] ss:$16 sps:$4 sm:$0xff]   ;;  %v10050_v14 = vld [vmem:[#allocation9 + $0x3c0] ss:$16 sps:$4 sm:$0xff]   ;;  %v5571_v51 = vpack.c.bf16 %v5555_v56, %v5555_v56 }
 0x47a   :  { %v5564_v30 = vmax.f32 %v5530_v24, %v5532_v42  ;;  %v10053_v39 = vld [vmem:[#allocation9 + $0x3c8] ss:$16 sps:$4 sm:$0xff]   ;;  %v10058_v18 = vld [vmem:[#allocation9 + $0x3e4] ss:$16 sps:$4 sm:$0xff]   ;;  %v10061_v63 = vld [vmem:[#allocation9 + $0x3ec] ss:$16 sps:$4 sm:$0xff]  }
 0x47b   :  { %v11702_v40 = vadd.f32 %v5563_v49, %v11684_v47  ;;  %v10013_v47 = vld [vmem:[#allocation9 + $0x2ec] ss:$16 sps:$4 sm:$0xff]   ;;  %v10056_v52 = vld [vmem:[#allocation9 + $0x3e0] ss:$16 sps:$4 sm:$0xff]   ;;  %v10059_v54 = vld [vmem:[#allocation9 + $0x3e8] ss:$16 sps:$4 sm:$0xff]  }
 0x47c   :  { %v11705_v44 = vadd.f32 %v5564_v30, %v11687_v37  ;;  %7185 = vmatpush1.bf16.msra.mxu0 %v9990_v60  ;;  %7349 = vmatpush1.bf16.msra.mxu1 %v9993_v1  ;;  %v10008_v37 = vld [vmem:[#allocation9 + $0x2e0] ss:$16 sps:$4 sm:$0xff]   ;;  %v10064_v12 = vld [vmem:[#allocation9 + $0x404] ss:$16 sps:$4 sm:$0xff]   ;;  %v10067_v13 = vld [vmem:[#allocation9 + $0x40c] ss:$16 sps:$4 sm:$0xff]  }
 0x47d   :  { %7186 = vmatprep.subr.bf16.mxu0 %v9998_v0  ;;  %7350 = vmatprep.subr.bf16.mxu1 %v10001_v11  ;;  %v5562_v24 = vmax.f32 %v11699_v36, 0.0  ;;  %v10062_v59 = vld [vmem:[#allocation9 + $0x400] ss:$16 sps:$4 sm:$0xff]   ;;  %v10065_v19 = vld [vmem:[#allocation9 + $0x408] ss:$16 sps:$4 sm:$0xff]  }
 0x47e   :  { %v10070_v42 = vld [vmem:[#allocation9 + $0x424] ss:$16 sps:$4 sm:$0xff]   ;;  %v10073_v60 = vld [vmem:[#allocation9 + $0x42c] ss:$16 sps:$4 sm:$0xff]   ;;  %v10068_v10 = vld [vmem:[#allocation9 + $0x420] ss:$16 sps:$4 sm:$0xff]  }
 0x47f   :  { %v5574_v26 = vpack.c.bf16 %v5562_v24, %v5562_v24  ;;  %v10071_v1 = vld [vmem:[#allocation9 + $0x428] ss:$16 sps:$4 sm:$0xff]   ;;  %v10076_v49 = vld [vmem:[#allocation9 + $0x444] ss:$16 sps:$4 sm:$0xff]   ;;  %v10079_v36 = vld [vmem:[#allocation9 + $0x44c] ss:$16 sps:$4 sm:$0xff]  }
 0x480   :  { %7187 = vmatpush1.bf16.msra.mxu0 %v9996_v17  ;;  %7351 = vmatpush1.bf16.msra.mxu1 %v9999_v27  ;;  %v10074_v0 = vld [vmem:[#allocation9 + $0x440] ss:$16 sps:$4 sm:$0xff]   ;;  %v10077_v11 = vld [vmem:[#allocation9 + $0x448] ss:$16 sps:$4 sm:$0xff]   ;;  %v10082_v30 = vld [vmem:[#allocation9 + $0x464] ss:$16 sps:$4 sm:$0xff]  }
 0x481   :  { %7188 = vmatprep.subr.bf16.mxu0 %v10004_v4  ;;  %7352 = vmatprep.subr.bf16.mxu1 %v10007_v16  ;;  %v10085_v17 = vld [vmem:[#allocation9 + $0x46c] ss:$16 sps:$4 sm:$0xff]   ;;  %v10080_v27 = vld [vmem:[#allocation9 + $0x460] ss:$16 sps:$4 sm:$0xff]   ;;  %v10083_v4 = vld [vmem:[#allocation9 + $0x468] ss:$16 sps:$4 sm:$0xff]  }
 0x482   :  { %v10088_v16 = vld [vmem:[#allocation9 + $0x484] ss:$16 sps:$4 sm:$0xff]   ;;  %v10143_v56 = vld [vmem:[#allocation9 + $0x5a8] ss:$16 sps:$4 sm:$0xff]   ;;  %v10146_v24 = vld [vmem:[#allocation9 + $0x5c0] ss:$16 sps:$4 sm:$0xff]  }
 0x484   :  { %7189 = vmatpush1.bf16.msra.mxu0 %v10002_v43  ;;  %7353 = vmatpush1.bf16.msra.mxu1 %v10005_v6  ;;  %v10091_v43 = vld [vmem:[#allocation9 + $0x48c] ss:$16 sps:$4 sm:$0xff]   ;;  %v10086_v6 = vld [vmem:[#allocation9 + $0x480] ss:$16 sps:$4 sm:$0xff]  }
 0x485   :  { %7190 = vmatprep.subr.bf16.mxu0 %v10010_v8  ;;  %7354 = vmatprep.subr.bf16.mxu1 %v10013_v47  ;;  %v10089_v8 = vld [vmem:[#allocation9 + $0x488] ss:$16 sps:$4 sm:$0xff]   ;;  %v10094_v47 = vld [vmem:[#allocation9 + $0x4a4] ss:$16 sps:$4 sm:$0xff]  }
 0x488   :  { %7191 = vmatpush1.bf16.msra.mxu0 %v10008_v37  ;;  %7355 = vmatpush1.bf16.msra.mxu1 %v10011_v57  ;;  %v10097_v37 = vld [vmem:[#allocation9 + $0x4ac] ss:$16 sps:$4 sm:$0xff]   ;;  %v10092_v57 = vld [vmem:[#allocation9 + $0x4a0] ss:$16 sps:$4 sm:$0xff]  }
 0x489   :  { %7192 = vmatprep.subr.bf16.mxu0 %v10016_v55  ;;  %7356 = vmatprep.subr.bf16.mxu1 %v10019_v34  ;;  %v10095_v55 = vld [vmem:[#allocation9 + $0x4a8] ss:$16 sps:$4 sm:$0xff]   ;;  %v10100_v34 = vld [vmem:[#allocation9 + $0x4c4] ss:$16 sps:$4 sm:$0xff]  }
 0x48c   :  { %7193 = vmatpush1.bf16.msra.mxu0 %v10014_v62  ;;  %7357 = vmatpush1.bf16.msra.mxu1 %v10017_v22  ;;  %v10103_v62 = vld [vmem:[#allocation9 + $0x4cc] ss:$16 sps:$4 sm:$0xff]   ;;  %v10098_v22 = vld [vmem:[#allocation9 + $0x4c0] ss:$16 sps:$4 sm:$0xff]  }
 0x48d   :  { %7194 = vmatprep.subr.bf16.mxu0 %v10022_v35  ;;  %7358 = vmatprep.subr.bf16.mxu1 %v10025_v58  ;;  %v10101_v35 = vld [vmem:[#allocation9 + $0x4c8] ss:$16 sps:$4 sm:$0xff]   ;;  %v10106_v58 = vld [vmem:[#allocation9 + $0x4e4] ss:$16 sps:$4 sm:$0xff]  }
 0x490   :  { %7195 = vmatpush1.bf16.msra.mxu0 %v10020_v23  ;;  %7359 = vmatpush1.bf16.msra.mxu1 %v10023_v20  ;;  %v10109_v23 = vld [vmem:[#allocation9 + $0x4ec] ss:$16 sps:$4 sm:$0xff]   ;;  %v10104_v20 = vld [vmem:[#allocation9 + $0x4e0] ss:$16 sps:$4 sm:$0xff]  }
 0x491   :  { %7196 = vmatprep.subr.bf16.mxu0 %v10028_v29  ;;  %7360 = vmatprep.subr.bf16.mxu1 %v10031_v9  ;;  %v10107_v29 = vld [vmem:[#allocation9 + $0x4e8] ss:$16 sps:$4 sm:$0xff]   ;;  %v10112_v9 = vld [vmem:[#allocation9 + $0x504] ss:$16 sps:$4 sm:$0xff]  }
 0x494   :  { %7197 = vmatpush1.bf16.msra.mxu0 %v10026_v25  ;;  %7361 = vmatpush1.bf16.msra.mxu1 %v10029_v41  ;;  %v10115_v25 = vld [vmem:[#allocation9 + $0x50c] ss:$16 sps:$4 sm:$0xff]   ;;  %v10110_v41 = vld [vmem:[#allocation9 + $0x500] ss:$16 sps:$4 sm:$0xff]  }
 0x495   :  { %7198 = vmatprep.subr.bf16.mxu0 %v10034_v53  ;;  %7362 = vmatprep.subr.bf16.mxu1 %v10037_v38  ;;  %v10113_v53 = vld [vmem:[#allocation9 + $0x508] ss:$16 sps:$4 sm:$0xff]   ;;  %v10118_v38 = vld [vmem:[#allocation9 + $0x524] ss:$16 sps:$4 sm:$0xff]  }
 0x498   :  { %7199 = vmatpush1.bf16.msra.mxu0 %v10032_v15  ;;  %7363 = vmatpush1.bf16.msra.mxu1 %v10035_v21  ;;  %v10121_v15 = vld [vmem:[#allocation9 + $0x52c] ss:$16 sps:$4 sm:$0xff]   ;;  %v10116_v21 = vld [vmem:[#allocation9 + $0x520] ss:$16 sps:$4 sm:$0xff]  }
 0x499   :  { %7200 = vmatprep.subr.bf16.mxu0 %v10040_v2  ;;  %7364 = vmatprep.subr.bf16.mxu1 %v10043_v45  ;;  %v10119_v2 = vld [vmem:[#allocation9 + $0x528] ss:$16 sps:$4 sm:$0xff]   ;;  %v10124_v45 = vld [vmem:[#allocation9 + $0x544] ss:$16 sps:$4 sm:$0xff]  }
 0x49c   :  { %7201 = vmatpush1.bf16.msra.mxu0 %v10038_v33  ;;  %7365 = vmatpush1.bf16.msra.mxu1 %v10041_v3  ;;  %v10127_v33 = vld [vmem:[#allocation9 + $0x54c] ss:$16 sps:$4 sm:$0xff]   ;;  %v10122_v3 = vld [vmem:[#allocation9 + $0x540] ss:$16 sps:$4 sm:$0xff]  }
 0x49d   :  { %7202 = vmatprep.subr.bf16.mxu0 %v10046_v5  ;;  %7366 = vmatprep.subr.bf16.mxu1 %v10049_v46  ;;  %v10125_v5 = vld [vmem:[#allocation9 + $0x548] ss:$16 sps:$4 sm:$0xff]   ;;  %v10130_v46 = vld [vmem:[#allocation9 + $0x564] ss:$16 sps:$4 sm:$0xff]  }
 0x4a0   :  { %7203 = vmatpush1.bf16.msra.mxu0 %v10044_v31  ;;  %7367 = vmatpush1.bf16.msra.mxu1 %v10047_v48  ;;  %v10133_v31 = vld [vmem:[#allocation9 + $0x56c] ss:$16 sps:$4 sm:$0xff]   ;;  %v10128_v48 = vld [vmem:[#allocation9 + $0x560] ss:$16 sps:$4 sm:$0xff]  }
 0x4a1   :  { %7204 = vmatprep.subr.bf16.mxu0 %v10052_v61  ;;  %7368 = vmatprep.subr.bf16.mxu1 %v10055_v28  ;;  %v10131_v61 = vld [vmem:[#allocation9 + $0x568] ss:$16 sps:$4 sm:$0xff]   ;;  %v10136_v28 = vld [vmem:[#allocation9 + $0x584] ss:$16 sps:$4 sm:$0xff]  }
 0x4a4   :  { %7205 = vmatpush1.bf16.msra.mxu0 %v10050_v14  ;;  %7369 = vmatpush1.bf16.msra.mxu1 %v10053_v39  ;;  %v10139_v14 = vld [vmem:[#allocation9 + $0x58c] ss:$16 sps:$4 sm:$0xff]   ;;  %v10134_v39 = vld [vmem:[#allocation9 + $0x580] ss:$16 sps:$4 sm:$0xff]  }
 0x4a5   :  { %7206 = vmatprep.subr.bf16.mxu0 %v10058_v18  ;;  %7370 = vmatprep.subr.bf16.mxu1 %v10061_v63  ;;  %v10137_v18 = vld [vmem:[#allocation9 + $0x588] ss:$16 sps:$4 sm:$0xff]   ;;  %v10142_v63 = vld [vmem:[#allocation9 + $0x5a4] ss:$16 sps:$4 sm:$0xff]  }
 0x4a8   :  { %7207 = vmatpush1.bf16.msra.mxu0 %v10056_v52  ;;  %7371 = vmatpush1.bf16.msra.mxu1 %v10059_v54  ;;  %v10145_v52 = vld [vmem:[#allocation9 + $0x5ac] ss:$16 sps:$4 sm:$0xff]   ;;  %v10140_v54 = vld [vmem:[#allocation9 + $0x5a0] ss:$16 sps:$4 sm:$0xff]  }
 0x4a9   :  { %7217 = vmatprep.subr.bf16.mxu0 %v10064_v12  ;;  %7381 = vmatprep.subr.bf16.mxu1 %v10067_v13  ;;  %v10148_v12 = vld [vmem:[#allocation9 + $0x5c4] ss:$16 sps:$4 sm:$0xff]   ;;  %v10151_v13 = vld [vmem:[#allocation9 + $0x5cc] ss:$16 sps:$4 sm:$0xff]  }
 0x4ab   :  { %7209 = vmatmul.mubr.bf16.vlgmr.msra.gmra.mrb[88].mxu0 %v5571_v51  ;;  %7373 = vmatmul.mubr.bf16.vlgmr.msra.gmra.mrb[88].mxu1 %v5571_v51  ;;  %v10154_v51 = vld [vmem:[#allocation9 + $0x5e4] ss:$16 sps:$4 sm:$0xff]  }
 0x4ac   :  { %7218 = vmatpush1.bf16.msra.mxu0 %v10062_v59  ;;  %7249 = vmatprep.mubr.bf16.mxu0 %v5574_v26  ;;  %v10149_v59 = vld [vmem:[#allocation9 + $0x5c8] ss:$16 sps:$4 sm:$0xff]  }
 0x4ad   :  { %7382 = vmatpush1.bf16.msra.mxu1 %v10065_v19  ;;  %7413 = vmatprep.mubr.bf16.mxu1 %v5574_v26  ;;  %v10157_v19 = vld [vmem:[#allocation9 + $0x5ec] ss:$16 sps:$4 sm:$0xff]   ;;  %v10152_v26 = vld [vmem:[#allocation9 + $0x5e0] ss:$16 sps:$4 sm:$0xff]  }
 0x4ae   :  { %7219 = vmatprep.subr.bf16.mxu0 %v10070_v42  ;;  %7383 = vmatprep.subr.bf16.mxu1 %v10073_v60  ;;  %v5561_v42 = vmax.f32 %v11696_v7, 0.0  ;;  %v10155_v60 = vld [vmem:[#allocation9 + $0x5e8] ss:$16 sps:$4 sm:$0xff]   ;;  %v10164_v7 = vld [vmem:[#allocation9 + $0x620] ss:$16 sps:$4 sm:$0xff]  }
 0x4b0   :  { %7220 = vmatpush1.bf16.msra.mxu0 %v10068_v10  ;;  %v10160_v10 = vld [vmem:[#allocation9 + $0x604] ss:$16 sps:$4 sm:$0xff]  }
 0x4b1   :  { %7384 = vmatpush1.bf16.msra.mxu1 %v10071_v1  ;;  %7221 = vmatprep.subr.bf16.mxu0 %v10076_v49  ;;  %v10163_v1 = vld [vmem:[#allocation9 + $0x60c] ss:$16 sps:$4 sm:$0xff]   ;;  %v5568_v49 = vmax.f32 %v11705_v44, 0.0 }
 0x4b2   :  { %7385 = vmatprep.subr.bf16.mxu1 %v10079_v36  ;;  %v10158_v36 = vld [vmem:[#allocation9 + $0x600] ss:$16 sps:$4 sm:$0xff]   ;;  %v10175_v44 = vld [vmem:[#allocation9 + $0x64c] ss:$16 sps:$4 sm:$0xff]  }
 0x4b4   :  { %7222 = vmatpush1.bf16.msra.mxu0 %v10074_v0  ;;  %v5573_v0 = vpack.c.bf16 %v5561_v42, %v5561_v42  ;;  %v10244_v42 = vld [vmem:[#allocation9 + $0x7c4] ss:$16 sps:$4 sm:$0xff]  }
 0x4b5   :  { %7386 = vmatpush1.bf16.msra.mxu1 %v10077_v11  ;;  %7223 = vmatprep.subr.bf16.mxu0 %v10082_v30  ;;  %v10161_v11 = vld [vmem:[#allocation9 + $0x608] ss:$16 sps:$4 sm:$0xff]   ;;  %v10166_v30 = vld [vmem:[#allocation9 + $0x624] ss:$16 sps:$4 sm:$0xff]  }
 0x4b6   :  { %7387 = vmatprep.subr.bf16.mxu1 %v10085_v17  ;;  %v5576_v17 = vpack.c.bf16 %v5568_v49, %v5568_v49  ;;  %v10250_v49 = vld [vmem:[#allocation9 + $0x7e4] ss:$16 sps:$4 sm:$0xff]  }
 0x4b8   :  { %7224 = vmatpush1.bf16.msra.mxu0 %v10080_v27  ;;  %v10169_v27 = vld [vmem:[#allocation9 + $0x62c] ss:$16 sps:$4 sm:$0xff]  }
 0x4b9   :  { %7388 = vmatpush1.bf16.msra.mxu1 %v10083_v4  ;;  %7225 = vmatprep.subr.bf16.mxu0 %v10088_v16  ;;  %v10167_v4 = vld [vmem:[#allocation9 + $0x628] ss:$16 sps:$4 sm:$0xff]   ;;  %v10172_v16 = vld [vmem:[#allocation9 + $0x644] ss:$16 sps:$4 sm:$0xff]  }
 0x4ba   :  { %7389 = vmatprep.subr.bf16.mxu1 %v10091_v43  ;;  %v10170_v43 = vld [vmem:[#allocation9 + $0x640] ss:$16 sps:$4 sm:$0xff]  }
 0x4bc   :  { %7226 = vmatpush1.bf16.msra.mxu0 %v10086_v6  ;;  %v10173_v6 = vld [vmem:[#allocation9 + $0x648] ss:$16 sps:$4 sm:$0xff]  }
 0x4bd   :  { %7390 = vmatpush1.bf16.msra.mxu1 %v10089_v8  ;;  %7227 = vmatprep.subr.bf16.mxu0 %v10094_v47  ;;  %v10178_v8 = vld [vmem:[#allocation9 + $0x664] ss:$16 sps:$4 sm:$0xff]   ;;  %v10181_v47 = vld [vmem:[#allocation9 + $0x66c] ss:$16 sps:$4 sm:$0xff]  }
 0x4be   :  { %7391 = vmatprep.subr.bf16.mxu1 %v10097_v37  ;;  %v10176_v37 = vld [vmem:[#allocation9 + $0x660] ss:$16 sps:$4 sm:$0xff]  }
 0x4c0   :  { %7228 = vmatpush1.bf16.msra.mxu0 %v10092_v57  ;;  %v10179_v57 = vld [vmem:[#allocation9 + $0x668] ss:$16 sps:$4 sm:$0xff]  }
 0x4c1   :  { %7392 = vmatpush1.bf16.msra.mxu1 %v10095_v55  ;;  %7229 = vmatprep.subr.bf16.mxu0 %v10100_v34  ;;  %v10184_v55 = vld [vmem:[#allocation9 + $0x684] ss:$16 sps:$4 sm:$0xff]   ;;  %v10187_v34 = vld [vmem:[#allocation9 + $0x68c] ss:$16 sps:$4 sm:$0xff]  }
 0x4c2   :  { %7393 = vmatprep.subr.bf16.mxu1 %v10103_v62  ;;  %v10182_v62 = vld [vmem:[#allocation9 + $0x680] ss:$16 sps:$4 sm:$0xff]  }
 0x4c4   :  { %7230 = vmatpush1.bf16.msra.mxu0 %v10098_v22  ;;  %v10185_v22 = vld [vmem:[#allocation9 + $0x688] ss:$16 sps:$4 sm:$0xff]  }
 0x4c5   :  { %7394 = vmatpush1.bf16.msra.mxu1 %v10101_v35  ;;  %7231 = vmatprep.subr.bf16.mxu0 %v10106_v58  ;;  %v10190_v35 = vld [vmem:[#allocation9 + $0x6a4] ss:$16 sps:$4 sm:$0xff]   ;;  %v10193_v58 = vld [vmem:[#allocation9 + $0x6ac] ss:$16 sps:$4 sm:$0xff]  }
 0x4c6   :  { %7395 = vmatprep.subr.bf16.mxu1 %v10109_v23  ;;  %v10188_v23 = vld [vmem:[#allocation9 + $0x6a0] ss:$16 sps:$4 sm:$0xff]  }
 0x4c8   :  { %7232 = vmatpush1.bf16.msra.mxu0 %v10104_v20  ;;  %v10191_v20 = vld [vmem:[#allocation9 + $0x6a8] ss:$16 sps:$4 sm:$0xff]  }
 0x4c9   :  { %7396 = vmatpush1.bf16.msra.mxu1 %v10107_v29  ;;  %7233 = vmatprep.subr.bf16.mxu0 %v10112_v9  ;;  %v10196_v29 = vld [vmem:[#allocation9 + $0x6c4] ss:$16 sps:$4 sm:$0xff]   ;;  %v10199_v9 = vld [vmem:[#allocation9 + $0x6cc] ss:$16 sps:$4 sm:$0xff]  }
 0x4ca   :  { %7397 = vmatprep.subr.bf16.mxu1 %v10115_v25  ;;  %v10194_v25 = vld [vmem:[#allocation9 + $0x6c0] ss:$16 sps:$4 sm:$0xff]  }
 0x4cc   :  { %7234 = vmatpush1.bf16.msra.mxu0 %v10110_v41  ;;  %v10197_v41 = vld [vmem:[#allocation9 + $0x6c8] ss:$16 sps:$4 sm:$0xff]  }
 0x4cd   :  { %7398 = vmatpush1.bf16.msra.mxu1 %v10113_v53  ;;  %7235 = vmatprep.subr.bf16.mxu0 %v10118_v38  ;;  %v10202_v53 = vld [vmem:[#allocation9 + $0x6e4] ss:$16 sps:$4 sm:$0xff]   ;;  %v10205_v38 = vld [vmem:[#allocation9 + $0x6ec] ss:$16 sps:$4 sm:$0xff]  }
 0x4ce   :  { %7399 = vmatprep.subr.bf16.mxu1 %v10121_v15  ;;  %v10200_v15 = vld [vmem:[#allocation9 + $0x6e0] ss:$16 sps:$4 sm:$0xff]  }
 0x4d0   :  { %7236 = vmatpush1.bf16.msra.mxu0 %v10116_v21  ;;  %v10203_v21 = vld [vmem:[#allocation9 + $0x6e8] ss:$16 sps:$4 sm:$0xff]  }
 0x4d1   :  { %7400 = vmatpush1.bf16.msra.mxu1 %v10119_v2  ;;  %7237 = vmatprep.subr.bf16.mxu0 %v10124_v45  ;;  %v10208_v2 = vld [vmem:[#allocation9 + $0x704] ss:$16 sps:$4 sm:$0xff]   ;;  %v10211_v45 = vld [vmem:[#allocation9 + $0x70c] ss:$16 sps:$4 sm:$0xff]  }
 0x4d2   :  { %7401 = vmatprep.subr.bf16.mxu1 %v10127_v33  ;;  %v10206_v33 = vld [vmem:[#allocation9 + $0x700] ss:$16 sps:$4 sm:$0xff]  }
 0x4d4   :  { %7238 = vmatpush1.bf16.msra.mxu0 %v10122_v3  ;;  %v10209_v3 = vld [vmem:[#allocation9 + $0x708] ss:$16 sps:$4 sm:$0xff]  }
 0x4d5   :  { %7402 = vmatpush1.bf16.msra.mxu1 %v10125_v5  ;;  %7239 = vmatprep.subr.bf16.mxu0 %v10130_v46  ;;  %v10214_v5 = vld [vmem:[#allocation9 + $0x724] ss:$16 sps:$4 sm:$0xff]   ;;  %v10217_v46 = vld [vmem:[#allocation9 + $0x72c] ss:$16 sps:$4 sm:$0xff]  }
 0x4d6   :  { %7403 = vmatprep.subr.bf16.mxu1 %v10133_v31  ;;  %v10212_v31 = vld [vmem:[#allocation9 + $0x720] ss:$16 sps:$4 sm:$0xff]  }
 0x4d8   :  { %7240 = vmatpush1.bf16.msra.mxu0 %v10128_v48  ;;  %v10215_v48 = vld [vmem:[#allocation9 + $0x728] ss:$16 sps:$4 sm:$0xff]  }
 0x4d9   :  { %7404 = vmatpush1.bf16.msra.mxu1 %v10131_v61  ;;  %7241 = vmatprep.subr.bf16.mxu0 %v10136_v28  ;;  %v10220_v61 = vld [vmem:[#allocation9 + $0x744] ss:$16 sps:$4 sm:$0xff]   ;;  %v10223_v28 = vld [vmem:[#allocation9 + $0x74c] ss:$16 sps:$4 sm:$0xff]  }
 0x4da   :  { %7405 = vmatprep.subr.bf16.mxu1 %v10139_v14  ;;  %v10218_v14 = vld [vmem:[#allocation9 + $0x740] ss:$16 sps:$4 sm:$0xff]  }
 0x4dc   :  { %7242 = vmatpush1.bf16.msra.mxu0 %v10134_v39  ;;  %v10221_v39 = vld [vmem:[#allocation9 + $0x748] ss:$16 sps:$4 sm:$0xff]  }
 0x4dd   :  { %7406 = vmatpush1.bf16.msra.mxu1 %v10137_v18  ;;  %7243 = vmatprep.subr.bf16.mxu0 %v10142_v63  ;;  %v10226_v18 = vld [vmem:[#allocation9 + $0x764] ss:$16 sps:$4 sm:$0xff]   ;;  %v10229_v63 = vld [vmem:[#allocation9 + $0x76c] ss:$16 sps:$4 sm:$0xff]  }
 0x4de   :  { %7407 = vmatprep.subr.bf16.mxu1 %v10145_v52  ;;  %v10224_v52 = vld [vmem:[#allocation9 + $0x760] ss:$16 sps:$4 sm:$0xff]  }
 0x4e0   :  { %7244 = vmatpush1.bf16.msra.mxu0 %v10140_v54  ;;  %v10227_v54 = vld [vmem:[#allocation9 + $0x768] ss:$16 sps:$4 sm:$0xff]  }
 0x4e1   :  { %7408 = vmatpush1.bf16.msra.mxu1 %v10143_v56  ;;  %7245 = vmatprep.subr.bf16.mxu0 %v10148_v12  ;;  %v10232_v56 = vld [vmem:[#allocation9 + $0x784] ss:$16 sps:$4 sm:$0xff]   ;;  %v10235_v12 = vld [vmem:[#allocation9 + $0x78c] ss:$16 sps:$4 sm:$0xff]  }
 0x4e2   :  { %7409 = vmatprep.subr.bf16.mxu1 %v10151_v13  ;;  %v10230_v13 = vld [vmem:[#allocation9 + $0x780] ss:$16 sps:$4 sm:$0xff]  }
 0x4e4   :  { %7246 = vmatpush1.bf16.msra.mxu0 %v10146_v24  ;;  %v10233_v24 = vld [vmem:[#allocation9 + $0x788] ss:$16 sps:$4 sm:$0xff]  }
 0x4e5   :  { %7410 = vmatpush1.bf16.msra.mxu1 %v10149_v59  ;;  %7247 = vmatprep.subr.bf16.mxu0 %v10154_v51  ;;  %v10238_v59 = vld [vmem:[#allocation9 + $0x7a4] ss:$16 sps:$4 sm:$0xff]   ;;  %v10241_v51 = vld [vmem:[#allocation9 + $0x7ac] ss:$16 sps:$4 sm:$0xff]  }
 0x4e6   :  { %7411 = vmatprep.subr.bf16.mxu1 %v10157_v19  ;;  %v10236_v19 = vld [vmem:[#allocation9 + $0x7a0] ss:$16 sps:$4 sm:$0xff]  }
 0x4e8   :  { %7248 = vmatpush1.bf16.msra.mxu0 %v10152_v26  ;;  %v10239_v26 = vld [vmem:[#allocation9 + $0x7a8] ss:$16 sps:$4 sm:$0xff]  }
 0x4e9   :  { %7412 = vmatpush1.bf16.msra.mxu1 %v10155_v60  ;;  %7258 = vmatprep.subr.bf16.mxu0 %v10160_v10  ;;  %v10247_v60 = vld [vmem:[#allocation9 + $0x7cc] ss:$16 sps:$4 sm:$0xff]   ;;  %v10242_v10 = vld [vmem:[#allocation9 + $0x7c0] ss:$16 sps:$4 sm:$0xff]  }
 0x4ea   :  { %7422 = vmatprep.subr.bf16.mxu1 %v10163_v1  ;;  %v10245_v1 = vld [vmem:[#allocation9 + $0x7c8] ss:$16 sps:$4 sm:$0xff]  }
 0x4eb   :  { %7250 = vmatmul.mubr.bf16.vlgmr.msra.gmra.mrb[88].mxu0 %v5573_v0 }
 0x4ec   :  { %7414 = vmatmul.mubr.bf16.vlgmr.msra.gmra.mrb[88].mxu1 %v5573_v0  ;;  %7259 = vmatpush1.bf16.msra.mxu0 %v10158_v36  ;;  %v10253_v36 = vld [vmem:[#allocation9 + $0x7ec] ss:$16 sps:$4 sm:$0xff]   ;;  %v10248_v0 = vld [vmem:[#allocation9 + $0x7e0] ss:$16 sps:$4 sm:$0xff]  }
 0x4ed   :  { %7290 = vmatprep.mubr.bf16.mxu0 %v5576_v17  ;;  %7423 = vmatpush1.bf16.msra.mxu1 %v10161_v11  ;;  %v5567_v11 = vmax.f32 %v11702_v40, 0.0  ;;  %v10257_v40 = vld [vmem:[%s11827_s8 + $0x80] sm:$0xff]  }
 0x4ee   :  { %7454 = vmatprep.mubr.bf16.mxu1 %v5576_v17  ;;  %7260 = vmatprep.subr.bf16.mxu0 %v10166_v30  ;;  %v10251_v30 = vld [vmem:[#allocation9 + $0x7e8] ss:$16 sps:$4 sm:$0xff]  }
 0x4ef   :  { %7424 = vmatprep.subr.bf16.mxu1 %v10169_v27  ;;  %v10254_v17 = vld [vmem:[%s11827_s8 + $0x40] sm:$0xff]  }
 0x4f0   :  { %7261 = vmatpush1.bf16.msra.mxu0 %v10164_v7  ;;  %v10255_v27 = vld [vmem:[%s11827_s8 + $0xc0] sm:$0xff]  }
 0x4f1   :  { %7425 = vmatpush1.bf16.msra.mxu1 %v10167_v4  ;;  %7262 = vmatprep.subr.bf16.mxu0 %v10172_v16  ;;  %v10256_v7 = vld [vmem:[%s11827_s8] sm:$0xff]   ;;  %v5575_v4 = vpack.c.bf16 %v5567_v11, %v5567_v11  ;;  %v10258_v16 = vld [vmem:[%s11827_s8 + $0x48] sm:$0xff]  }
 0x4f2   :  { %7426 = vmatprep.subr.bf16.mxu1 %v10175_v44  ;;  %v10259_v44 = vld [vmem:[%s11827_s8 + $0xc8] sm:$0xff]  }
 0x4f4   :  { %7263 = vmatpush1.bf16.msra.mxu0 %v10170_v43  ;;  %v10260_v43 = vld [vmem:[%s11827_s8 + $0x8] sm:$0xff]  }
 0x4f5   :  { %7427 = vmatpush1.bf16.msra.mxu1 %v10173_v6  ;;  %7264 = vmatprep.subr.bf16.mxu0 %v10178_v8  ;;  %v10261_v6 = vld [vmem:[%s11827_s8 + $0x88] sm:$0xff]   ;;  %v10262_v8 = vld [vmem:[%s11827_s8 + $0x50] sm:$0xff]  }
 0x4f6   :  { %7428 = vmatprep.subr.bf16.mxu1 %v10181_v47  ;;  %v10263_v47 = vld [vmem:[%s11827_s8 + $0xd0] sm:$0xff]  }
 0x4f8   :  { %7265 = vmatpush1.bf16.msra.mxu0 %v10176_v37  ;;  %v10264_v37 = vld [vmem:[%s11827_s8 + $0x10] sm:$0xff]  }
 0x4f9   :  { %7429 = vmatpush1.bf16.msra.mxu1 %v10179_v57  ;;  %7266 = vmatprep.subr.bf16.mxu0 %v10184_v55  ;;  %v10265_v57 = vld [vmem:[%s11827_s8 + $0x90] sm:$0xff]   ;;  %v10266_v55 = vld [vmem:[%s11827_s8 + $0x58] sm:$0xff]  }
 0x4fa   :  { %7430 = vmatprep.subr.bf16.mxu1 %v10187_v34  ;;  %v10267_v34 = vld [vmem:[%s11827_s8 + $0xd8] sm:$0xff]  }
 0x4fc   :  { %7267 = vmatpush1.bf16.msra.mxu0 %v10182_v62  ;;  %v10268_v62 = vld [vmem:[%s11827_s8 + $0x18] sm:$0xff]  }
 0x4fd   :  { %7431 = vmatpush1.bf16.msra.mxu1 %v10185_v22  ;;  %7268 = vmatprep.subr.bf16.mxu0 %v10190_v35  ;;  %v10269_v22 = vld [vmem:[%s11827_s8 + $0x98] sm:$0xff]   ;;  %v10270_v35 = vld [vmem:[%s11827_s8 + $0x60] sm:$0xff]  }
 0x4fe   :  { %7432 = vmatprep.subr.bf16.mxu1 %v10193_v58  ;;  %v10271_v58 = vld [vmem:[%s11827_s8 + $0xe0] sm:$0xff]  }
 0x500   :  { %7269 = vmatpush1.bf16.msra.mxu0 %v10188_v23  ;;  %v10272_v23 = vld [vmem:[%s11827_s8 + $0x20] sm:$0xff]  }
 0x501   :  { %7433 = vmatpush1.bf16.msra.mxu1 %v10191_v20  ;;  %7270 = vmatprep.subr.bf16.mxu0 %v10196_v29  ;;  %v10273_v20 = vld [vmem:[%s11827_s8 + $0xa0] sm:$0xff]   ;;  %v10274_v29 = vld [vmem:[%s11827_s8 + $0x68] sm:$0xff]  }
 0x502   :  { %7434 = vmatprep.subr.bf16.mxu1 %v10199_v9  ;;  %v10275_v9 = vld [vmem:[%s11827_s8 + $0xe8] sm:$0xff]  }
 0x504   :  { %7271 = vmatpush1.bf16.msra.mxu0 %v10194_v25  ;;  %v10276_v25 = vld [vmem:[%s11827_s8 + $0x28] sm:$0xff]  }
 0x505   :  { %7435 = vmatpush1.bf16.msra.mxu1 %v10197_v41  ;;  %7272 = vmatprep.subr.bf16.mxu0 %v10202_v53  ;;  %v10277_v41 = vld [vmem:[%s11827_s8 + $0xa8] sm:$0xff]   ;;  %v10278_v53 = vld [vmem:[%s11827_s8 + $0x70] sm:$0xff]  }
 0x506   :  { %7436 = vmatprep.subr.bf16.mxu1 %v10205_v38  ;;  %v10279_v38 = vld [vmem:[%s11827_s8 + $0xf0] sm:$0xff]  }
 0x508   :  { %7273 = vmatpush1.bf16.msra.mxu0 %v10200_v15  ;;  %v10280_v15 = vld [vmem:[%s11827_s8 + $0x30] sm:$0xff]  }
 0x509   :  { %7437 = vmatpush1.bf16.msra.mxu1 %v10203_v21  ;;  %7274 = vmatprep.subr.bf16.mxu0 %v10208_v2  ;;  %v10281_v21 = vld [vmem:[%s11827_s8 + $0xb0] sm:$0xff]   ;;  %v10282_v2 = vld [vmem:[%s11827_s8 + $0x78] sm:$0xff]  }
 0x50a   :  { %7438 = vmatprep.subr.bf16.mxu1 %v10211_v45  ;;  %v10283_v45 = vld [vmem:[%s11827_s8 + $0xf8] sm:$0xff]  }
 0x50c   :  { %7275 = vmatpush1.bf16.msra.mxu0 %v10206_v33  ;;  %v10284_v33 = vld [vmem:[%s11827_s8 + $0x38] sm:$0xff]  }
 0x50d   :  { %7439 = vmatpush1.bf16.msra.mxu1 %v10209_v3  ;;  %7276 = vmatprep.subr.bf16.mxu0 %v10214_v5  ;;  %v10285_v3 = vld [vmem:[%s11827_s8 + $0xb8] sm:$0xff]  }
 0x50e   :  { %7440 = vmatprep.subr.bf16.mxu1 %v10217_v46  ;;  %v5833_v5 = vld [vmem:[#allocation10] sm:$0xf]  ;;  %v11989_v46 = vld [vmem:[#allocation62_spill] sm:$0xff] }
 0x510   :  { %7277 = vmatpush1.bf16.msra.mxu0 %v10212_v31  ;;  %v5849_v31 = vsub.s32 3, %v11989_v46 }
 0x511   :  { %7441 = vmatpush1.bf16.msra.mxu1 %v10215_v48  ;;  %7278 = vmatprep.subr.bf16.mxu0 %v10220_v61  ;;  %v5838_v48 = vrot.slane %v5833_v5, %v11987_v50  ;;  %v11990_v61 = vsub.s32 2, %v11989_v46 }
 0x512   :  { %7442 = vmatprep.subr.bf16.mxu1 %v10223_v28 }
 0x513   :  { %v5846_v28 = vrot.slane %v5833_v5, %v11990_v61 }
 0x514   :  { %7279 = vmatpush1.bf16.msra.mxu0 %v10218_v14  ;;  %v5842_v14 = vrot.slane %v5833_v5, %v11988_v32 }
 0x515   :  { %7443 = vmatpush1.bf16.msra.mxu1 %v10221_v39  ;;  %7280 = vmatprep.subr.bf16.mxu0 %v10226_v18  ;;  %v5850_v39 = vrot.slane %v5833_v5, %v5849_v31 }
 0x516   :  { %7444 = vmatprep.subr.bf16.mxu1 %v10229_v63 }
 0x518   :  { %7281 = vmatpush1.bf16.msra.mxu0 %v10224_v52 }
 0x519   :  { %7445 = vmatpush1.bf16.msra.mxu1 %v10227_v54  ;;  %7282 = vmatprep.subr.bf16.mxu0 %v10232_v56 }
 0x51a   :  { %7446 = vmatprep.subr.bf16.mxu1 %v10235_v12 }
 0x51c   :  { %7283 = vmatpush1.bf16.msra.mxu0 %v10230_v13 }
 0x51d   :  { %7447 = vmatpush1.bf16.msra.mxu1 %v10233_v24  ;;  %7284 = vmatprep.subr.bf16.mxu0 %v10238_v59 }
 0x51e   :  { %7448 = vmatprep.subr.bf16.mxu1 %v10241_v51 }
 0x520   :  { %7285 = vmatpush1.bf16.msra.mxu0 %v10236_v19 }
 0x521   :  { %7449 = vmatpush1.bf16.msra.mxu1 %v10239_v26  ;;  %7286 = vmatprep.subr.bf16.mxu0 %v10244_v42 }
 0x522   :  { %7450 = vmatprep.subr.bf16.mxu1 %v10247_v60 }
 0x524   :  { %7287 = vmatpush1.bf16.msra.mxu0 %v10242_v10 }
 0x525   :  { %7451 = vmatpush1.bf16.msra.mxu1 %v10245_v1  ;;  %7288 = vmatprep.subr.bf16.mxu0 %v10250_v49 }
 0x526   :  { %7452 = vmatprep.subr.bf16.mxu1 %v10253_v36 }
 0x528   :  { %7289 = vmatpush1.bf16.msra.mxu0 %v10248_v0 }
 0x529   :  { %7453 = vmatpush1.bf16.msra.mxu1 %v10251_v30  ;;  %8725 = vmatprep.subr.bf16.mxu0 %v10254_v17  ;;  %v8692_v30 = vld [vmem:[#allocation12] ss:$0 sm:$0xff] }
 0x52a   :  { %8747 = vmatprep.subr.bf16.mxu1 %v10255_v27 }
 0x52b   :  { %7291 = vmatmul.mubr.bf16.vlgmr.msra.gmra.mrb[88].mxu0 %v5575_v4 }
 0x52c   :  { %7455 = vmatmul.mubr.bf16.vlgmr.msra.gmra.mrb[88].mxu1 %v5575_v4  ;;  %8726 = vmatpush3.bf16.msra.mxu0 %v10256_v7 }
 0x52d   :  { %8748 = vmatpush3.bf16.msra.mxu1 %v10257_v40  ;;  %8727 = vmatprep.subr.bf16.mxu0 %v10258_v16 }
 0x52e   :  { %8749 = vmatprep.subr.bf16.mxu1 %v10259_v44 }
 0x530   :  { %8728 = vmatpush3.bf16.msra.mxu0 %v10260_v43 }
 0x531   :  { %8750 = vmatpush3.bf16.msra.mxu1 %v10261_v6  ;;  %8729 = vmatprep.subr.bf16.mxu0 %v10262_v8 }
 0x532   :  { %8751 = vmatprep.subr.bf16.mxu1 %v10263_v47 }
 0x534   :  { %8730 = vmatpush3.bf16.msra.mxu0 %v10264_v37 }
 0x535   :  { %8752 = vmatpush3.bf16.msra.mxu1 %v10265_v57  ;;  %8731 = vmatprep.subr.bf16.mxu0 %v10266_v55 }
 0x536   :  { %8753 = vmatprep.subr.bf16.mxu1 %v10267_v34 }
 0x538   :  { %8732 = vmatpush3.bf16.msra.mxu0 %v10268_v62 }
 0x539   :  { %8754 = vmatpush3.bf16.msra.mxu1 %v10269_v22  ;;  %8733 = vmatprep.subr.bf16.mxu0 %v10270_v35 }
 0x53a   :  { %8755 = vmatprep.subr.bf16.mxu1 %v10271_v58 }
 0x53c   :  { %8734 = vmatpush3.bf16.msra.mxu0 %v10272_v23 }
 0x53d   :  { %8756 = vmatpush3.bf16.msra.mxu1 %v10273_v20  ;;  %8735 = vmatprep.subr.bf16.mxu0 %v10274_v29 }
 0x53e   :  { %8757 = vmatprep.subr.bf16.mxu1 %v10275_v9 }
 0x540   :  { %8736 = vmatpush3.bf16.msra.mxu0 %v10276_v25 }
 0x541   :  { %8758 = vmatpush3.bf16.msra.mxu1 %v10277_v41  ;;  %8737 = vmatprep.subr.bf16.mxu0 %v10278_v53 }
 0x542   :  { %8759 = vmatprep.subr.bf16.mxu1 %v10279_v38 }
 0x544   :  { %8738 = vmatpush3.bf16.msra.mxu0 %v10280_v15 }
 0x545   :  { %8760 = vmatpush3.bf16.msra.mxu1 %v10281_v21  ;;  %8739 = vmatprep.subr.bf16.mxu0 %v10282_v2 }
 0x546   :  { %8761 = vmatprep.subr.bf16.mxu1 %v10283_v45 }
 0x548   :  { %8740 = vmatpush3.bf16.msra.mxu0 %v10284_v33 }
 0x549   :  { %8762 = vmatpush3.bf16.msra.mxu1 %v10285_v3 }
 0x5fe   :  { %v7292_v18 = vpop.f32.mrb[88].mxu0 }
 0x5ff   :  { %v8769_v63 = vadd.f32 %v7292_v18, %v5838_v48  ;;  %v7456_v52 = vpop.f32.mrb[88].mxu1  ;;  %v7294_v54 = vpop.f32.mrb[89].mxu0 }
 0x600   :  { %v8771_v56 = vadd.f32 %v7456_v52, %v5846_v28  ;;  %v8770_v12 = vadd.f32 %v7294_v54, %v5842_v14  ;;  %v7458_v13 = vpop.f32.mrb[89].mxu1  ;;  %v7296_v24 = vpop.f32.mrb[90].mxu0 }
 0x601   :  { %v7463_v59 = vmax.f32 %v8769_v63, 0.0  ;;  %v8772_v51 = vadd.f32 %v7458_v13, %v5850_v39  ;;  %v7460_v19 = vpop.f32.mrb[90].mxu1  ;;  %v7297_v26 = vpop.f32.mrb[91].mxu0 }
 0x602   :  { %v7465_v42 = vmax.f32 %v8771_v56, 0.0  ;;  %v7464_v50 = vmax.f32 %v8770_v12, 0.0  ;;  %v7461_v60 = vpop.f32.mrb[91].mxu1 }
 0x603   :  { %v7466_v10 = vmax.f32 %v8772_v51, 0.0  ;;  %v7467_v49 = vpack.c.bf16 %v7463_v59, %v7463_v59 }
 0x604   :  { %v7468_v1 = vpack.c.bf16 %v7464_v50, %v7464_v50  ;;  %v7469_v36 = vpack.c.bf16 %v7465_v42, %v7465_v42 }
 0x605   :  { %v7470_v32 = vpack.c.bf16 %v7466_v10, %v7466_v10 }
 0x606   :  { %7766 = vmatprep.mubr.bf16.mxu0 %v7468_v1 }
 0x607   :  { %7806 = vmatprep.mubr.bf16.mxu1 %v7470_v32  ;;  %7767 = vmatmul.mubr.bf16.vlgmr.msra.gmra.mrb[92].mxu0 %v7467_v49 }
 0x608   :  { %7807 = vmatmul.mubr.bf16.vlgmr.msra.gmra.mrb[92].mxu1 %v7469_v36 }
 0x6da   :  { %v8741_v0 = vpop.f32.mrb[92].mxu0 }
 0x6db   :  { %v8763_v11 = vpop.f32.mrb[92].mxu1  ;;  %v8742_v17 = vpop.f32.mrb[93].mxu0 }
 0x6dc   :  { %v8743_v27 = vadd.f32 %v8742_v17, %v8741_v0  ;;  %v8764_v7 = vpop.f32.mrb[93].mxu1  ;;  %v8744_v4 = vpop.f32.mrb[94].mxu0 }
 0x6dd   :  { %v8765_v40 = vadd.f32 %v8764_v7, %v8763_v11  ;;  %v8766_v16 = vpop.f32.mrb[94].mxu1  ;;  %v8745_v44 = vpop.f32.mrb[95].mxu0 }
 0x6de   :  { %v7769_v43 = vadd.f32 %v8743_v27, %v8692_v30  ;;  %v8767_v6 = vpop.f32.mrb[95].mxu1 }
 0x6e0   :  { %v7809_v8 = vadd.f32 %v8765_v40, %v7769_v43 }
 0x6e2   :  { %v7815_v47 = vsel %vm7814_vm3, %v7809_v8, -inf }
 0x6e3   :  { %7816 = vmax.xlane.f32.xlu0 %v7815_v47 }
 0x770   :  { %v7817_v37 = vpop.xlane.xlu0 %7816 }
 0x771   :  { %v7818_v57 = vsub.f32 %v7809_v8, %v7817_v37 }
 0x773   :  { %v7819_v55 = vmul.f32 1.442695, %v7818_v57 }
 0x775   :  { %10286 = vpow2.f32 %v7819_v55 }
 0x77f   :  { %v10287_v34 = vpop.eup %10286 }
 0x780   :  { %v7821_v62 = vsel %vm7814_vm3, %v10287_v34, 0.0 }
 0x781   :  { %7822 = vadd.xlane.f32.xlu0 %v7821_v62 }
 0x80e   :  { %v7823_v22 = vpop.xlane.xlu0 %7822 }
 0x80f   :  { %10288 = vlog2.f32 %v7823_v22 }
 0x819   :  { %v10289_v35 = vpop.eup %10288 }
 0x81a   :  { %v7825_v58 = vmul.f32 0.6931472, %v10289_v35 }
 0x81c   :  { %v7826_v23 = vsub.f32 %v7818_v57, %v7825_v58 }
 0x81e   :  { %7827 = vst.msk [vmem:[%s11829_s10] sm:$0xff] %vm7814_vm3, %v7826_v23 }
 0x81f   :  { %7832 = vsyncpa [#allocation3], 1 }
 0x820   :  { %7833 = vsyncpa [#allocation5], 1 }
 0x821   :  { %7834 = vsyncpa [#allocation8], 1 }
 0x822   :  { %7835 = vsyncpa [#allocation11], 1 }

</bundles_post_ra>
